<compile_context>
chip_gen: v7x
topology: tpu7x:2x2x1
jax: 0.10.0
libtpu: 0.0.40
codegen_flags: <defaults>
</compile_context>

<pallas_src>
import functools

import jax
import jax.numpy as jnp
from jax import lax
from jax.experimental import pallas as pl
from jax.experimental.pallas import tpu as pltpu

LAMBDA = 0.01            # AFNO sparsity_threshold (softshrink lambda)
LN_EPS = 1e-5            # torch.nn.LayerNorm default eps
_SQRT_2_OVER_PI = 0.7978845608028654


# ----------------------------------------------------------------------------
# chip-aware defaults (VMEM limit, tile sizes)
# ----------------------------------------------------------------------------
def _tpu_vmem_capacity_bytes():
    try:
        return int(pltpu.get_tpu_info().vmem_capacity_bytes)
    except Exception:
        return 0


_VMEM_CAP = _tpu_vmem_capacity_bytes()
if _VMEM_CAP >= 96 * 2 ** 20:          # v5e / v6e: 128 MiB physical VMEM
    _VMEM_LIMIT = 96 * 2 ** 20
    _DEF_TILE_ROWS = 512
elif _VMEM_CAP > 0:                    # v7x: 64 MiB physical VMEM
    _VMEM_LIMIT = (_VMEM_CAP * 3) // 4
    _DEF_TILE_ROWS = 256
else:                                  # unknown backend -> stay conservative
    _VMEM_LIMIT = 32 * 2 ** 20
    _DEF_TILE_ROWS = 256
# LayerNorm moves only 2 thin streams -> bigger row tiles amortize grid-step overhead
_LN_TILE_ROWS = _DEF_TILE_ROWS * 8


def _probe_buffered_weights():
    """Probe once whether pipeline_mode=pl.Buffered(1) (single-buffered resident
    weight blocks) constructs, lowers and runs on this backend."""
    if not hasattr(pl, "Buffered"):
        return False
    try:
        def k(x_ref, w_ref, o_ref):
            o_ref[...] = x_ref[...] + w_ref[...]

        f = pl.pallas_call(
            k,
            grid=(2,),
            in_specs=[pl.BlockSpec((8, 128), lambda i: (i, 0)),
                      pl.BlockSpec((8, 128), lambda i: (0, 0),
                                   pipeline_mode=pl.Buffered(1))],
            out_specs=pl.BlockSpec((8, 128), lambda i: (i, 0)),
            out_shape=jax.ShapeDtypeStruct((16, 128), jnp.float32),
        )
        jax.block_until_ready(f(jnp.ones((16, 128), jnp.float32),
                                jnp.ones((8, 128), jnp.float32)))
        return True
    except Exception:
        return False


_USE_BUFFERED_WEIGHTS = _probe_buffered_weights()


def _const_spec(shape):
    """BlockSpec for a block resident across the whole 1-D grid (weights, biases,
    LN params).  Single-buffered when supported: the index_map is constant, so a
    second buffer is pure VMEM waste (critical at production C on v7x)."""
    if _USE_BUFFERED_WEIGHTS:
        return pl.BlockSpec(shape, lambda i: (0,) * len(shape),
                            pipeline_mode=pl.Buffered(1))
    return pl.BlockSpec(shape, lambda i: (0,) * len(shape))


# ----------------------------------------------------------------------------
# small shared math helpers (used by kernels AND the pure-JAX reference)
# ----------------------------------------------------------------------------
def _softshrink(x, lam):
    return jnp.where(x > lam, x - lam,
                     jnp.where(x < -lam, x + lam, jnp.zeros_like(x)))


def _gelu_tanh(x):
    return 0.5 * x * (1.0 + jnp.tanh(_SQRT_2_OVER_PI * (x + 0.044715 * x * x * x)))


def _layernorm(x, g, b, eps):
    mu = jnp.mean(x, axis=-1, keepdims=True)
    xc = x - mu
    var = jnp.mean(xc * xc, axis=-1, keepdims=True)
    return xc * jax.lax.rsqrt(var + eps) * g + b


def _block_diag(blocks):
    """(nb, bi, bo) -> dense (nb*bi, nb*bo) block-diagonal (mask-multiply)."""
    nb, bi, bo = blocks.shape
    eye = jnp.eye(nb, dtype=blocks.dtype)
    return (blocks[:, :, None, :] * eye[:, None, :, None]).reshape(nb * bi, nb * bo)


def _row_tile(n_rows, requested, *, min_tiles=2):
    """Row-tile size: a multiple of 8, no larger than `requested`, and small
    enough that the grid has at least `min_tiles` steps (so v7x's two
    TensorCores both get work under dimension_semantics=('parallel',))."""
    if n_rows <= 8:
        return max(1, n_rows)              # equals full dim -> legal block
    tile = min(requested, pl.cdiv(n_rows, min_tiles))
    return max(8, (tile // 8) * 8)


# ----------------------------------------------------------------------------
# Pallas kernels
# ----------------------------------------------------------------------------
def _layernorm_kernel(x_ref, g_ref, b_ref, o_ref, *, eps):
    o_ref[...] = _layernorm(x_ref[...], g_ref[...], b_ref[...], eps).astype(o_ref.dtype)


def _afno_freq_kernel_4mm(xr_ref, xi_ref,
                          w1r_ref, w1i_ref, b1r_ref, b1i_ref,
                          w2r_ref, w2i_ref, b2r_ref, b2i_ref,
                          o_ref, *, channels):
    """Complex 2-layer block-MLP, plain 4-matmul complex product (small C:
    DMA/VPU bound, Karatsuba's extra adds + third weight stream don't pay)."""
    xr = xr_ref[...]
    xi = xi_ref[...]
    h_r = jnp.maximum(
        jnp.dot(xr, w1r_ref[...], preferred_element_type=jnp.float32)
        - jnp.dot(xi, w1i_ref[...], preferred_element_type=jnp.float32)
        + b1r_ref[...], 0.0)
    h_i = jnp.maximum(
        jnp.dot(xi, w1r_ref[...], preferred_element_type=jnp.float32)
        + jnp.dot(xr, w1i_ref[...], preferred_element_type=jnp.float32)
        + b1i_ref[...], 0.0)
    o_r = (jnp.dot(h_r, w2r_ref[...], preferred_element_type=jnp.float32)
           - jnp.dot(h_i, w2i_ref[...], preferred_element_type=jnp.float32)
           + b2r_ref[...])
    o_i = (jnp.dot(h_i, w2r_ref[...], preferred_element_type=jnp.float32)
           + jnp.dot(h_r, w2i_ref[...], preferred_element_type=jnp.float32)
           + b2i_ref[...])
    o_ref[:, :channels] = _softshrink(o_r, LAMBDA).astype(o_ref.dtype)
    o_ref[:, channels:] = _softshrink(o_i, LAMBDA).astype(o_ref.dtype)


def _afno_freq_kernel_karatsuba(xr_ref, xi_ref,
                                w1r_ref, w1i_ref, w1s_ref, b1r_ref, b1i_ref,
                                w2r_ref, w2i_ref, w2s_ref, b2r_ref, b2i_ref,
                                o_ref, *, channels):
    """Complex 2-layer block-MLP, 3-matmul (Karatsuba) complex product for
    large C where the MXU is the binding unit.  All accumulation / the
    cancellation-prone (t3 - t1 - t2) chain stays in f32."""
    xr = xr_ref[...]
    xi = xi_ref[...]
    t1 = jnp.dot(xr, w1r_ref[...], preferred_element_type=jnp.float32)
    t2 = jnp.dot(xi, w1i_ref[...], preferred_element_type=jnp.float32)
    t3 = jnp.dot(xr + xi, w1s_ref[...], preferred_element_type=jnp.float32)
    h_r = jnp.maximum(t1 - t2 + b1r_ref[...], 0.0)
    h_i = jnp.maximum(t3 - t1 - t2 + b1i_ref[...], 0.0)

    u1 = jnp.dot(h_r, w2r_ref[...], preferred_element_type=jnp.float32)
    u2 = jnp.dot(h_i, w2i_ref[...], preferred_element_type=jnp.float32)
    u3 = jnp.dot(h_r + h_i, w2s_ref[...], preferred_element_type=jnp.float32)
    o_r = u1 - u2 + b2r_ref[...]
    o_i = u3 - u1 - u2 + b2i_ref[...]
    o_ref[:, :channels] = _softshrink(o_r, LAMBDA).astype(o_ref.dtype)
    o_ref[:, channels:] = _softshrink(o_i, LAMBDA).astype(o_ref.dtype)


def _norm_mlp_kernel(f_ref, n_ref, r_ref, g_ref, b_ref,
                     w1_ref, b1_ref, w2_ref, b2_ref, o_ref, *,
                     eps, double_skip, mm_dtype):
    """Fused: (filter out + AFNO '+bias' [+ block skip]) -> LayerNorm -> MLP
    (bf16 MXU matmuls, f32 accumulation) -> + skip."""
    if double_skip:
        x = f_ref[...] + n_ref[...] + r_ref[...]
        res = x
    else:
        x = f_ref[...] + n_ref[...]
        res = r_ref[...]
    h = _layernorm(x, g_ref[...], b_ref[...], eps)
    h1 = jnp.dot(h.astype(mm_dtype), w1_ref[...],
                 preferred_element_type=jnp.float32) + b1_ref[...]
    h1 = _gelu_tanh(h1)
    y = jnp.dot(h1.astype(mm_dtype), w2_ref[...],
                preferred_element_type=jnp.float32) + b2_ref[...]
    o_ref[...] = (y + res).astype(o_ref.dtype)


# ----------------------------------------------------------------------------
# wrappers
# ----------------------------------------------------------------------------
def layernorm_pallas(x_tok, gamma, beta, *, eps=LN_EPS, tile_rows=None):
    n, c = x_tok.shape
    tile = _row_tile(n, tile_rows or _LN_TILE_ROWS)
    spec_x = pl.BlockSpec((tile, c), lambda i: (i, 0))
    spec_p = _const_spec((1, c))
    return pl.pallas_call(
        functools.partial(_layernorm_kernel, eps=eps),
        grid=(pl.cdiv(n, tile),),
        in_specs=[spec_x, spec_p, spec_p],
        out_specs=spec_x,
        out_shape=jax.ShapeDtypeStruct((n, c), jnp.float32),
        compiler_params=pltpu.CompilerParams(
            dimension_semantics=("parallel",), vmem_limit_bytes=_VMEM_LIMIT),
    )(x_tok.astype(jnp.float32),
      gamma.reshape(1, c).astype(jnp.float32),
      beta.reshape(1, c).astype(jnp.float32))


def afno_spectral_pallas(x, w1, b1, w2, b2, *, num_blocks,
                         hard_thresholding_fraction=1.0, hidden_size_factor=1,
                         tile_n=None, force_karatsuba=None):
    """AFNO2D frequency path: rfft2 -> complex block-MLP on the kept-mode
    rectangle only (Pallas) -> softshrink -> zero-pad -> irfft2.
    Returns float32 WITHOUT the '+ bias' residual (fused downstream)."""
    B, H, W, C = x.shape
    Wf = W // 2 + 1
    CH = C * hidden_size_factor

    xf = jnp.fft.rfft2(x.astype(jnp.float32), axes=(1, 2), norm='ortho')

    # Kept (non-hard-thresholded) modes form a contiguous rectangle; restrict
    # the kernel grid to it -> zero HBM traffic for masked frequency tokens.
    total_modes = H // 2 + 1
    kept_modes = int(total_modes * hard_thresholding_fraction)
    if kept_modes <= 0:
        return jnp.zeros((B, H, W, C), jnp.float32)
    h_lo = total_modes - kept_modes
    h_hi = min(H, total_modes + kept_modes)
    w_hi = min(Wf, kept_modes)
    Hk, Wk = h_hi - h_lo, w_hi
    Nk = B * Hk * Wk

    xk = xf[:, h_lo:h_hi, :w_hi, :]
    xr = jnp.real(xk).reshape(Nk, C)
    xi = jnp.imag(xk).reshape(Nk, C)

    # dense block-diagonal weights (exactly equivalent to the per-block einsum)
    w1r = _block_diag(w1[0]); w1i = _block_diag(w1[1])       # (C, CH)
    w2r = _block_diag(w2[0]); w2i = _block_diag(w2[1])       # (CH, C)
    b1r = b1[0].reshape(1, CH); b1i = b1[1].reshape(1, CH)
    b2r = b2[0].reshape(1, C);  b2i = b2[1].reshape(1, C)

    tile = _row_tile(Nk, tile_n or _DEF_TILE_ROWS)
    nt = pl.cdiv(Nk, tile)

    # Karatsuba only pays once the MXU is binding (large C); small C is
    # DMA/VPU bound and the extra adds + third weight stream are a loss.
    if force_karatsuba is None:
        use_karatsuba = (C >= 256 and CH >= 256)
    else:
        use_karatsuba = bool(force_karatsuba)

    row_spec = pl.BlockSpec((tile, C), lambda i: (i, 0))
    out_spec = pl.BlockSpec((tile, 2 * C), lambda i: (i, 0))
    w1_spec, w2_spec = _const_spec((C, CH)), _const_spec((CH, C))
    b1_spec, b2_spec = _const_spec((1, CH)), _const_spec((1, C))

    if use_karatsuba:
        kernel = functools.partial(_afno_freq_kernel_karatsuba, channels=C)
        w_args = (w1r, w1i, w1r + w1i, b1r, b1i, w2r, w2i, w2r + w2i, b2r, b2i)
        w_specs = [w1_spec, w1_spec, w1_spec, b1_spec, b1_spec,
                   w2_spec, w2_spec, w2_spec, b2_spec, b2_spec]
        mm_per_layer, w_per_layer = 3, 3
    else:
        kernel = functools.partial(_afno_freq_kernel_4mm, channels=C)
        w_args = (w1r, w1i, b1r, b1i, w2r, w2i, b2r, b2i)
        w_specs = [w1_spec, w1_spec, b1_spec, b1_spec,
                   w2_spec, w2_spec, b2_spec, b2_spec]
        mm_per_layer, w_per_layer = 4, 2

    flops = 2 * mm_per_layer * 2 * Nk * C * CH
    bytes_accessed = 4 * (4 * Nk * C                    # xr, xi in + (2C) out
                          + 2 * w_per_layer * C * CH    # weight matrices
                          + 2 * (C + CH))               # biases

    out = pl.pallas_call(
        kernel,
        grid=(nt,),
        in_specs=[row_spec, row_spec, *w_specs],
        out_specs=out_spec,
        out_shape=jax.ShapeDtypeStruct((Nk, 2 * C), jnp.float32),
        compiler_params=pltpu.CompilerParams(
            dimension_semantics=("parallel",), vmem_limit_bytes=_VMEM_LIMIT),
        cost_estimate=pl.CostEstimate(flops=int(flops), transcendentals=0,
                                      bytes_accessed=int(bytes_accessed)),
    )(xr, xi, *w_args)

    o_r = out[:, :C].reshape(B, Hk, Wk, C)
    o_i = out[:, C:].reshape(B, Hk, Wk, C)
    pad = ((0, 0), (h_lo, H - h_hi), (0, Wf - w_hi), (0, 0))
    xc = lax.complex(jnp.pad(o_r, pad), jnp.pad(o_i, pad))
    return jnp.fft.irfft2(xc, s=(H, W), axes=(1, 2), norm='ortho')


def norm_mlp_pallas(f_tok, n_tok, r_tok, gamma, beta, w1, b1, w2, b2, *,
                    double_skip=True, eps=LN_EPS, out_dtype=jnp.float32,
                    tile_rows=None, matmul_dtype=jnp.bfloat16):
    n, c = f_tok.shape
    ch = w1.shape[1]
    tile = _row_tile(n, tile_rows or _DEF_TILE_ROWS)

    spec_x = pl.BlockSpec((tile, c), lambda i: (i, 0))
    spec_c = _const_spec((1, c))
    spec_w1 = _const_spec((c, ch))
    spec_b1 = _const_spec((1, ch))
    spec_w2 = _const_spec((ch, c))

    wbytes = jnp.dtype(matmul_dtype).itemsize
    flops = 2 * 2 * n * c * ch                      # two matmuls
    bytes_accessed = (4 * 4 * n * c                 # f, n, r in + out (f32)
                      + 2 * c * ch * wbytes         # w1, w2
                      + 4 * (ch + 3 * c))           # biases + LN params

    return pl.pallas_call(
        functools.partial(_norm_mlp_kernel, eps=eps, double_skip=double_skip,
                          mm_dtype=matmul_dtype),
        grid=(pl.cdiv(n, tile),),
        in_specs=[spec_x, spec_x, spec_x, spec_c, spec_c,
                  spec_w1, spec_b1, spec_w2, spec_c],
        out_specs=spec_x,
        out_shape=jax.ShapeDtypeStruct((n, c), out_dtype),
        compiler_params=pltpu.CompilerParams(
            dimension_semantics=("parallel",), vmem_limit_bytes=_VMEM_LIMIT),
        cost_estimate=pl.CostEstimate(flops=int(flops), transcendentals=int(n * ch),
                                      bytes_accessed=int(bytes_accessed)),
    )(f_tok.astype(jnp.float32), n_tok.astype(jnp.float32), r_tok.astype(jnp.float32),
      gamma.reshape(1, c).astype(jnp.float32), beta.reshape(1, c).astype(jnp.float32),
      w1.astype(matmul_dtype), b1.reshape(1, ch).astype(jnp.float32),
      w2.astype(matmul_dtype), b2.reshape(1, c).astype(jnp.float32))


def block_forward(x, params, *, num_blocks=8, hard_thresholding_fraction=1.0,
                  hidden_size_factor=1, double_skip=True,
                  tile_freq=None, tile_tokens=None, force_karatsuba=None,
                  mlp_matmul_dtype=jnp.bfloat16):
    """Pallas forward of `Block`: LN -> AFNO2D -> (skip) -> LN -> MLP -> skip."""
    B, H, W, C = x.shape
    nt = B * H * W
    x_tok = x.reshape(nt, C)

    n1_tok = layernorm_pallas(x_tok, params['ln1_g'], params['ln1_b'])
    f = afno_spectral_pallas(n1_tok.reshape(B, H, W, C),
                             params['afno_w1'], params['afno_b1'],
                             params['afno_w2'], params['afno_b2'],
                             num_blocks=num_blocks,
                             hard_thresholding_fraction=hard_thresholding_fraction,
                             hidden_size_factor=hidden_size_factor,
                             tile_n=tile_freq, force_karatsuba=force_karatsuba)
    out_tok = norm_mlp_pallas(f.reshape(nt, C), n1_tok, x_tok,
                              params['ln2_g'], params['ln2_b'],
                              params['mlp_w1'], params['mlp_b1'],
                              params['mlp_w2'], params['mlp_b2'],
                              double_skip=double_skip, out_dtype=x.dtype,
                              tile_rows=tile_tokens, matmul_dtype=mlp_matmul_dtype)
    return out_tok.reshape(B, H, W, C)


# ----------------------------------------------------------------------------
# params + pure-JAX reference (independent of the kernel path)
# ----------------------------------------------------------------------------
def init_block_params(key, dim, *, num_blocks=8, hidden_size_factor=1,
                      mlp_ratio=4.0, scale=0.02):
    bs = dim // num_blocks
    hf = bs * hidden_size_factor
    mh = int(dim * mlp_ratio)
    k = jax.random.split(key, 12)
    n = jax.random.normal
    return {
        'ln1_g': 1.0 + 0.1 * n(k[0], (dim,), jnp.float32),
        'ln1_b': 0.1 * n(k[1], (dim,), jnp.float32),
        'afno_w1': scale * n(k[2], (2, num_blocks, bs, hf), jnp.float32),
        'afno_b1': scale * n(k[3], (2, num_blocks, hf), jnp.float32),
        'afno_w2': scale * n(k[4], (2, num_blocks, hf, bs), jnp.float32),
        'afno_b2': scale * n(k[5], (2, num_blocks, bs), jnp.float32),
        'ln2_g': 1.0 + 0.1 * n(k[6], (dim,), jnp.float32),
        'ln2_b': 0.1 * n(k[7], (dim,), jnp.float32),
        'mlp_w1': scale * n(k[8], (dim, mh), jnp.float32),
        'mlp_b1': scale * n(k[9], (mh,), jnp.float32),
        'mlp_w2': scale * n(k[10], (mh, dim), jnp.float32),
        'mlp_b2': scale * n(k[11], (dim,), jnp.float32),
    }


def _afno_ref(x, w1, b1, w2, b2, num_blocks, hard_frac, factor):
    B, H, W, C = x.shape
    bs = C // num_blocks
    bias = x
    xf = jnp.fft.rfft2(x.astype(jnp.float32), axes=(1, 2), norm='ortho')
    xf = xf.reshape(B, H, W // 2 + 1, num_blocks, bs)
    total = H // 2 + 1
    kept = int(total * hard_frac)
    o1r = jnp.zeros((B, H, W // 2 + 1, num_blocks, bs * factor), jnp.float32)
    o1i = jnp.zeros_like(o1r)
    o2r = jnp.zeros(xf.shape, jnp.float32)
    o2i = jnp.zeros(xf.shape, jnp.float32)
    sl = (slice(None), slice(total - kept, total + kept), slice(0, kept))
    xs = xf[sl]
    e = lambda a, w: jnp.einsum('...bi,bio->...bo', a, w)
    r1 = jax.nn.relu(e(xs.real, w1[0]) - e(xs.imag, w1[1]) + b1[0])
    i1 = jax.nn.relu(e(xs.imag, w1[0]) + e(xs.real, w1[1]) + b1[1])
    o1r = o1r.at[sl].set(r1); o1i = o1i.at[sl].set(i1)
    r2 = e(o1r[sl], w2[0]) - e(o1i[sl], w2[1]) + b2[0]
    i2 = e(o1i[sl], w2[0]) + e(o1r[sl], w2[1]) + b2[1]
    o2r = o2r.at[sl].set(r2); o2i = o2i.at[sl].set(i2)
    xc = (_softshrink(o2r, LAMBDA) + 1j * _softshrink(o2i, LAMBDA)
          ).reshape(B, H, W // 2 + 1, C)
    out = jnp.fft.irfft2(xc, s=(H, W), axes=(1, 2), norm='ortho')
    return out.astype(x.dtype) + bias


def _block_ref(x, p, *, num_blocks, hard_thresholding_fraction, hidden_size_factor,
               double_skip):
    residual = x
    h = _layernorm(x, p['ln1_g'], p['ln1_b'], LN_EPS)
    h = _afno_ref(h, p['afno_w1'], p['afno_b1'], p['afno_w2'], p['afno_b2'],
                  num_blocks, hard_thresholding_fraction, hidden_size_factor)
    if double_skip:
        h = h + residual
        residual = h
    y = _layernorm(h, p['ln2_g'], p['ln2_b'], LN_EPS)
    y = _gelu_tanh(y @ p['mlp_w1'] + p['mlp_b1']) @ p['mlp_w2'] + p['mlp_b2']
    return y + residual


# ----------------------------------------------------------------------------
if __name__ == "__main__":
    key = jax.random.PRNGKey(0)
    kx1, kp1, kx2, kp2 = jax.random.split(key, 4)

    # ---- config 1: Block defaults (hard_frac=1.0, double_skip=True,
    #      4-matmul complex path, bf16 MLP matmuls, auto tiles) ----
    B, H, W, C = 2, 16, 16, 32
    x = jax.random.normal(kx1, (B, H, W, C), jnp.float32)
    params = init_block_params(kp1, C, num_blocks=8, hidden_size_factor=1,
                               mlp_ratio=4.0)
    fwd = jax.jit(functools.partial(
        block_forward, num_blocks=8, hard_thresholding_fraction=1.0,
        hidden_size_factor=1, double_skip=True))
    out = jax.block_until_ready(fwd(x, params))
    ref = jax.block_until_ready(_block_ref(
        x, params, num_blocks=8, hard_thresholding_fraction=1.0,
        hidden_size_factor=1, double_skip=True))
    assert out.shape == ref.shape
    err = float(jnp.max(jnp.abs(out - ref)))
    assert err < 2e-2, err

    # ---- config 2: hard-thresholding -> kept-rectangle-only grid, ragged
    #      tiles, hidden_size_factor=2, double_skip=False, and force the
    #      Karatsuba kernel variant so both AFNO paths are exercised ----
    C2, nb2, f2 = 32, 4, 2
    x2 = jax.random.normal(kx2, (2, 16, 16, C2), jnp.float32)
    params2 = init_block_params(kp2, C2, num_blocks=nb2, hidden_size_factor=f2,
                                mlp_ratio=4.0)
    fwd2 = jax.jit(functools.partial(
        block_forward, num_blocks=nb2, hard_thresholding_fraction=0.5,
        hidden_size_factor=f2, double_skip=False,
        tile_freq=24, tile_tokens=120, force_karatsuba=True))
    out2 = jax.block_until_ready(fwd2(x2, params2))
    ref2 = jax.block_until_ready(_block_ref(
        x2, params2, num_blocks=nb2, hard_thresholding_fraction=0.5,
        hidden_size_factor=f2, double_skip=False))
    err2 = float(jnp.max(jnp.abs(out2 - ref2)))
    assert err2 < 2e-2, err2

    print("KERNEL_OK")
</pallas_src>

<mosaic_0001>
module attributes {stable_mosaic.version = 11 : i64} {
  func.func @k(%arg0: i32, %arg1: memref<8x128xf32, #tpu.memory_space<vmem>>, %arg2: memref<8x128xf32, #tpu.memory_space<vmem>>, %arg3: memref<8x128xf32, #tpu.memory_space<vmem>>) attributes {dimension_semantics = [#tpu.dimension_semantics<arbitrary>], iteration_bounds = array<i64: 2>, scalar_prefetch = 0 : i64, scratch_operands = 0 : i64, tpu.core_type = #tpu.core_type<tc>, window_params = [{transform_indices = @transform_0, window_bounds = array<i64: 8, 128>}, {pipeline_mode = #tpu.pipeline_mode<synchronous>, transform_indices = @transform_1, window_bounds = array<i64: 8, 128>}, {transform_indices = @transform_2, window_bounds = array<i64: 8, 128>}]} {
    %c0 = arith.constant 0 : index
    %c0_0 = arith.constant 0 : index
    %0 = vector.load %arg1[%c0, %c0_0] : memref<8x128xf32, #tpu.memory_space<vmem>>, vector<8x128xf32>
    %c0_1 = arith.constant 0 : index
    %c0_2 = arith.constant 0 : index
    %1 = vector.load %arg2[%c0_1, %c0_2] : memref<8x128xf32, #tpu.memory_space<vmem>>, vector<8x128xf32>
    %2 = arith.addf %0, %1 : vector<8x128xf32>
    %c0_3 = arith.constant 0 : index
    %c0_4 = arith.constant 0 : index
    %3 = vector.load %arg3[%c0_3, %c0_4] : memref<8x128xf32, #tpu.memory_space<vmem>>, vector<8x128xf32>
    tpu.vector_store %arg3[%c0_3, %c0_4], %2 {strides = array<i32>} : memref<8x128xf32, #tpu.memory_space<vmem>>, vector<8x128xf32>,
    return
  }
  func.func @transform_0(%arg0: i32) -> (i32, i32) {
    %c0_i32 = arith.constant 0 : i32
    %c0_i32_0 = arith.constant 0 : i32
    return %arg0, %c0_i32 : i32, i32
  }
  func.func @transform_1(%arg0: i32) -> (i32, i32) {
    %c0_i32 = arith.constant 0 : i32
    %c0_i32_0 = arith.constant 0 : i32
    %c0_i32_1 = arith.constant 0 : i32
    return %c0_i32, %c0_i32_0 : i32, i32
  }
  func.func @transform_2(%arg0: i32) -> (i32, i32) {
    %c0_i32 = arith.constant 0 : i32
    %c0_i32_0 = arith.constant 0 : i32
    return %arg0, %c0_i32 : i32, i32
  }
}

module attributes {stable_mosaic.version = 11 : i64} {
  func.func @_layernorm_kernel(%arg0: i32, %arg1: memref<256x32xf32, #tpu.memory_space<vmem>>, %arg2: memref<1x32xf32, #tpu.memory_space<vmem>>, %arg3: memref<1x32xf32, #tpu.memory_space<vmem>>, %arg4: memref<256x32xf32, #tpu.memory_space<vmem>>) attributes {dimension_semantics = [#tpu.dimension_semantics<parallel>], iteration_bounds = array<i64: 2>, scalar_prefetch = 0 : i64, scratch_operands = 0 : i64, tpu.core_type = #tpu.core_type<tc>, window_params = [{transform_indices = @transform_0, window_bounds = array<i64: 256, 32>}, {pipeline_mode = #tpu.pipeline_mode<synchronous>, transform_indices = @transform_1, window_bounds = array<i64: 1, 32>}, {pipeline_mode = #tpu.pipeline_mode<synchronous>, transform_indices = @transform_2, window_bounds = array<i64: 1, 32>}, {transform_indices = @transform_3, window_bounds = array<i64: 256, 32>}]} {
    %c0 = arith.constant 0 : index
    %c0_0 = arith.constant 0 : index
    %0 = vector.load %arg1[%c0, %c0_0] : memref<256x32xf32, #tpu.memory_space<vmem>>, vector<256x32xf32>
    %c0_1 = arith.constant 0 : index
    %c0_2 = arith.constant 0 : index
    %1 = vector.load %arg2[%c0_1, %c0_2] : memref<1x32xf32, #tpu.memory_space<vmem>>, vector<1x32xf32>
    %c0_3 = arith.constant 0 : index
    %c0_4 = arith.constant 0 : index
    %2 = vector.load %arg3[%c0_3, %c0_4] : memref<1x32xf32, #tpu.memory_space<vmem>>, vector<1x32xf32>
    %cst = arith.constant dense<0.000000e+00> : vector<256xf32>
    %3 = vector.multi_reduction <add>, %0, %cst [1] : vector<256x32xf32> to vector<256xf32>
    %4 = vector.shape_cast %3 : vector<256xf32> to vector<256x1xf32>
    %cst_5 = arith.constant 3.200000e+01 : f32
    %5 = vector.broadcast %cst_5 : f32 to vector<256x1xf32>
    %6 = arith.divf %4, %5 : vector<256x1xf32>
    %7 = vector.broadcast %6 : vector<256x1xf32> to vector<256x32xf32>
    %8 = arith.subf %0, %7 : vector<256x32xf32>
    %9 = arith.mulf %8, %8 : vector<256x32xf32>
    %cst_6 = arith.constant dense<0.000000e+00> : vector<256xf32>
    %10 = vector.multi_reduction <add>, %9, %cst_6 [1] : vector<256x32xf32> to vector<256xf32>
    %11 = vector.shape_cast %10 : vector<256xf32> to vector<256x1xf32>
    %cst_7 = arith.constant 3.200000e+01 : f32
    %12 = vector.broadcast %cst_7 : f32 to vector<256x1xf32>
    %13 = arith.divf %11, %12 : vector<256x1xf32>
    %cst_8 = arith.constant 9.99999974E-6 : f32
    %14 = vector.broadcast %cst_8 : f32 to vector<256x1xf32>
    %15 = arith.addf %13, %14 : vector<256x1xf32>
    %16 = math.rsqrt %15 : vector<256x1xf32>
    %17 = vector.broadcast %16 : vector<256x1xf32> to vector<256x32xf32>
    %18 = arith.mulf %8, %17 : vector<256x32xf32>
    %19 = vector.broadcast %1 : vector<1x32xf32> to vector<256x32xf32>
    %20 = arith.mulf %18, %19 : vector<256x32xf32>
    %21 = vector.broadcast %2 : vector<1x32xf32> to vector<256x32xf32>
    %22 = arith.addf %20, %21 : vector<256x32xf32>
    %c0_9 = arith.constant 0 : index
    %c0_10 = arith.constant 0 : index
    %23 = vector.load %arg4[%c0_9, %c0_10] : memref<256x32xf32, #tpu.memory_space<vmem>>, vector<256x32xf32>
    tpu.vector_store %arg4[%c0_9, %c0_10], %22 {strides = array<i32>} : memref<256x32xf32, #tpu.memory_space<vmem>>, vector<256x32xf32>,
    return
  }
  func.func @transform_0(%arg0: i32) -> (i32, i32) {
    %c0_i32 = arith.constant 0 : i32
    %c0_i32_0 = arith.constant 0 : i32
    return %arg0, %c0_i32 : i32, i32
  }
  func.func @transform_1(%arg0: i32) -> (i32, i32) {
    %c0_i32 = arith.constant 0 : i32
    %c0_i32_0 = arith.constant 0 : i32
    %c0_i32_1 = arith.constant 0 : i32
    return %c0_i32, %c0_i32_0 : i32, i32
  }
  func.func @transform_2(%arg0: i32) -> (i32, i32) {
    %c0_i32 = arith.constant 0 : i32
    %c0_i32_0 = arith.constant 0 : i32
    %c0_i32_1 = arith.constant 0 : i32
    return %c0_i32, %c0_i32_0 : i32, i32
  }
  func.func @transform_3(%arg0: i32) -> (i32, i32) {
    %c0_i32 = arith.constant 0 : i32
    %c0_i32_0 = arith.constant 0 : i32
    return %arg0, %c0_i32 : i32, i32
  }
}

module attributes {stable_mosaic.version = 11 : i64} {
  func.func @_afno_freq_kernel_4mm(%arg0: i32, %arg1: memref<144x32xf32, #tpu.memory_space<vmem>>, %arg2: memref<144x32xf32, #tpu.memory_space<vmem>>, %arg3: memref<32x32xf32, #tpu.memory_space<vmem>>, %arg4: memref<32x32xf32, #tpu.memory_space<vmem>>, %arg5: memref<1x32xf32, #tpu.memory_space<vmem>>, %arg6: memref<1x32xf32, #tpu.memory_space<vmem>>, %arg7: memref<32x32xf32, #tpu.memory_space<vmem>>, %arg8: memref<32x32xf32, #tpu.memory_space<vmem>>, %arg9: memref<1x32xf32, #tpu.memory_space<vmem>>, %arg10: memref<1x32xf32, #tpu.memory_space<vmem>>, %arg11: memref<144x64xf32, #tpu.memory_space<vmem>>) attributes {dimension_semantics = [#tpu.dimension_semantics<parallel>], iteration_bounds = array<i64: 2>, scalar_prefetch = 0 : i64, scratch_operands = 0 : i64, tpu.core_type = #tpu.core_type<tc>, window_params = [{transform_indices = @transform_0, window_bounds = array<i64: 144, 32>}, {transform_indices = @transform_1, window_bounds = array<i64: 144, 32>}, {pipeline_mode = #tpu.pipeline_mode<synchronous>, transform_indices = @transform_2, window_bounds = array<i64: 32, 32>}, {pipeline_mode = #tpu.pipeline_mode<synchronous>, transform_indices = @transform_3, window_bounds = array<i64: 32, 32>}, {pipeline_mode = #tpu.pipeline_mode<synchronous>, transform_indices = @transform_4, window_bounds = array<i64: 1, 32>}, {pipeline_mode = #tpu.pipeline_mode<synchronous>, transform_indices = @transform_5, window_bounds = array<i64: 1, 32>}, {pipeline_mode = #tpu.pipeline_mode<synchronous>, transform_indices = @transform_6, window_bounds = array<i64: 32, 32>}, {pipeline_mode = #tpu.pipeline_mode<synchronous>, transform_indices = @transform_7, window_bounds = array<i64: 32, 32>}, {pipeline_mode = #tpu.pipeline_mode<synchronous>, transform_indices = @transform_8, window_bounds = array<i64: 1, 32>}, {pipeline_mode = #tpu.pipeline_mode<synchronous>, transform_indices = @transform_9, window_bounds = array<i64: 1, 32>}, {transform_indices = @transform_10, window_bounds = array<i64: 144, 64>}]} {
    %c0 = arith.constant 0 : index
    %c0_0 = arith.constant 0 : index
    %0 = vector.load %arg1[%c0, %c0_0] : memref<144x32xf32, #tpu.memory_space<vmem>>, vector<144x32xf32>
    %c0_1 = arith.constant 0 : index
    %c0_2 = arith.constant 0 : index
    %1 = vector.load %arg2[%c0_1, %c0_2] : memref<144x32xf32, #tpu.memory_space<vmem>>, vector<144x32xf32>
    %c0_3 = arith.constant 0 : index
    %c0_4 = arith.constant 0 : index
    %2 = vector.load %arg3[%c0_3, %c0_4] : memref<32x32xf32, #tpu.memory_space<vmem>>, vector<32x32xf32>
    %cst = arith.constant dense<0.000000e+00> : vector<144x32xf32>
    %3 = tpu.matmul %0, %2, %cst {dimension_numbers = #tpu.dot_dimension_numbers<[1], [0], [0], [1], [0, 0, 1, 1], [], []>} : vector<144x32xf32>, vector<32x32xf32>, vector<144x32xf32> -> vector<144x32xf32>
    %c0_5 = arith.constant 0 : index
    %c0_6 = arith.constant 0 : index
    %4 = vector.load %arg4[%c0_5, %c0_6] : memref<32x32xf32, #tpu.memory_space<vmem>>, vector<32x32xf32>
    %cst_7 = arith.constant dense<0.000000e+00> : vector<144x32xf32>
    %5 = tpu.matmul %1, %4, %cst_7 {dimension_numbers = #tpu.dot_dimension_numbers<[1], [0], [0], [1], [0, 0, 1, 1], [], []>} : vector<144x32xf32>, vector<32x32xf32>, vector<144x32xf32> -> vector<144x32xf32>
    %6 = arith.subf %3, %5 : vector<144x32xf32>
    %c0_8 = arith.constant 0 : index
    %c0_9 = arith.constant 0 : index
    %7 = vector.load %arg5[%c0_8, %c0_9] : memref<1x32xf32, #tpu.memory_space<vmem>>, vector<1x32xf32>
    %8 = vector.broadcast %7 : vector<1x32xf32> to vector<144x32xf32>
    %9 = arith.addf %6, %8 : vector<144x32xf32>
    %cst_10 = arith.constant 0.000000e+00 : f32
    %10 = vector.broadcast %cst_10 : f32 to vector<144x32xf32>
    %11 = arith.maximumf %9, %10 : vector<144x32xf32>
    %c0_11 = arith.constant 0 : index
    %c0_12 = arith.constant 0 : index
    %12 = vector.load %arg3[%c0_11, %c0_12] : memref<32x32xf32, #tpu.memory_space<vmem>>, vector<32x32xf32>
    %cst_13 = arith.constant dense<0.000000e+00> : vector<144x32xf32>
    %13 = tpu.matmul %1, %12, %cst_13 {dimension_numbers = #tpu.dot_dimension_numbers<[1], [0], [0], [1], [0, 0, 1, 1], [], []>} : vector<144x32xf32>, vector<32x32xf32>, vector<144x32xf32> -> vector<144x32xf32>
    %c0_14 = arith.constant 0 : index
    %c0_15 = arith.constant 0 : index
    %14 = vector.load %arg4[%c0_14, %c0_15] : memref<32x32xf32, #tpu.memory_space<vmem>>, vector<32x32xf32>
    %cst_16 = arith.constant dense<0.000000e+00> : vector<144x32xf32>
    %15 = tpu.matmul %0, %14, %cst_16 {dimension_numbers = #tpu.dot_dimension_numbers<[1], [0], [0], [1], [0, 0, 1, 1], [], []>} : vector<144x32xf32>, vector<32x32xf32>, vector<144x32xf32> -> vector<144x32xf32>
    %16 = arith.addf %13, %15 : vector<144x32xf32>
    %c0_17 = arith.constant 0 : index
    %c0_18 = arith.constant 0 : index
    %17 = vector.load %arg6[%c0_17, %c0_18] : memref<1x32xf32, #tpu.memory_space<vmem>>, vector<1x32xf32>
    %18 = vector.broadcast %17 : vector<1x32xf32> to vector<144x32xf32>
    %19 = arith.addf %16, %18 : vector<144x32xf32>
    %cst_19 = arith.constant 0.000000e+00 : f32
    %20 = vector.broadcast %cst_19 : f32 to vector<144x32xf32>
    %21 = arith.maximumf %19, %20 : vector<144x32xf32>
    %c0_20 = arith.constant 0 : index
    %c0_21 = arith.constant 0 : index
    %22 = vector.load %arg7[%c0_20, %c0_21] : memref<32x32xf32, #tpu.memory_space<vmem>>, vector<32x32xf32>
    %cst_22 = arith.constant dense<0.000000e+00> : vector<144x32xf32>
    %23 = tpu.matmul %11, %22, %cst_22 {dimension_numbers = #tpu.dot_dimension_numbers<[1], [0], [0], [1], [0, 0, 1, 1], [], []>} : vector<144x32xf32>, vector<32x32xf32>, vector<144x32xf32> -> vector<144x32xf32>
    %c0_23 = arith.constant 0 : index
    %c0_24 = arith.constant 0 : index
    %24 = vector.load %arg8[%c0_23, %c0_24] : memref<32x32xf32, #tpu.memory_space<vmem>>, vector<32x32xf32>
    %cst_25 = arith.constant dense<0.000000e+00> : vector<144x32xf32>
    %25 = tpu.matmul %21, %24, %cst_25 {dimension_numbers = #tpu.dot_dimension_numbers<[1], [0], [0], [1], [0, 0, 1, 1], [], []>} : vector<144x32xf32>, vector<32x32xf32>, vector<144x32xf32> -> vector<144x32xf32>
    %26 = arith.subf %23, %25 : vector<144x32xf32>
    %c0_26 = arith.constant 0 : index
    %c0_27 = arith.constant 0 : index
    %27 = vector.load %arg9[%c0_26, %c0_27] : memref<1x32xf32, #tpu.memory_space<vmem>>, vector<1x32xf32>
    %28 = vector.broadcast %27 : vector<1x32xf32> to vector<144x32xf32>
    %29 = arith.addf %26, %28 : vector<144x32xf32>
    %c0_28 = arith.constant 0 : index
    %c0_29 = arith.constant 0 : index
    %30 = vector.load %arg7[%c0_28, %c0_29] : memref<32x32xf32, #tpu.memory_space<vmem>>, vector<32x32xf32>
    %cst_30 = arith.constant dense<0.000000e+00> : vector<144x32xf32>
    %31 = tpu.matmul %21, %30, %cst_30 {dimension_numbers = #tpu.dot_dimension_numbers<[1], [0], [0], [1], [0, 0, 1, 1], [], []>} : vector<144x32xf32>, vector<32x32xf32>, vector<144x32xf32> -> vector<144x32xf32>
    %c0_31 = arith.constant 0 : index
    %c0_32 = arith.constant 0 : index
    %32 = vector.load %arg8[%c0_31, %c0_32] : memref<32x32xf32, #tpu.memory_space<vmem>>, vector<32x32xf32>
    %cst_33 = arith.constant dense<0.000000e+00> : vector<144x32xf32>
    %33 = tpu.matmul %11, %32, %cst_33 {dimension_numbers = #tpu.dot_dimension_numbers<[1], [0], [0], [1], [0, 0, 1, 1], [], []>} : vector<144x32xf32>, vector<32x32xf32>, vector<144x32xf32> -> vector<144x32xf32>
    %34 = arith.addf %31, %33 : vector<144x32xf32>
    %c0_34 = arith.constant 0 : index
    %c0_35 = arith.constant 0 : index
    %35 = vector.load %arg10[%c0_34, %c0_35] : memref<1x32xf32, #tpu.memory_space<vmem>>, vector<1x32xf32>
    %36 = vector.broadcast %35 : vector<1x32xf32> to vector<144x32xf32>
    %37 = arith.addf %34, %36 : vector<144x32xf32>
    %cst_36 = arith.constant 0.00999999977 : f32
    %38 = vector.broadcast %cst_36 : f32 to vector<144x32xf32>
    %39 = arith.cmpf ogt, %29, %38 : vector<144x32xf32>
    %cst_37 = arith.constant 0.00999999977 : f32
    %40 = vector.broadcast %cst_37 : f32 to vector<144x32xf32>
    %41 = arith.subf %29, %40 : vector<144x32xf32>
    %cst_38 = arith.constant -0.00999999977 : f32
    %42 = vector.broadcast %cst_38 : f32 to vector<144x32xf32>
    %43 = arith.cmpf olt, %29, %42 : vector<144x32xf32>
    %cst_39 = arith.constant 0.00999999977 : f32
    %44 = vector.broadcast %cst_39 : f32 to vector<144x32xf32>
    %45 = arith.addf %29, %44 : vector<144x32xf32>
    %cst_40 = arith.constant 0.000000e+00 : f32
    %46 = vector.broadcast %cst_40 : f32 to vector<144x32xf32>
    %47 = arith.select %43, %45, %46 : vector<144x32xi1>, vector<144x32xf32>
    %48 = arith.select %39, %41, %47 : vector<144x32xi1>, vector<144x32xf32>
    %c0_41 = arith.constant 0 : index
    %c0_42 = arith.constant 0 : index
    %49 = vector.load %arg11[%c0_41, %c0_42] : memref<144x64xf32, #tpu.memory_space<vmem>>, vector<144x32xf32>
    tpu.vector_store %arg11[%c0_41, %c0_42], %48 {strides = array<i32>} : memref<144x64xf32, #tpu.memory_space<vmem>>, vector<144x32xf32>,
    %cst_43 = arith.constant 0.00999999977 : f32
    %50 = vector.broadcast %cst_43 : f32 to vector<144x32xf32>
    %51 = arith.cmpf ogt, %37, %50 : vector<144x32xf32>
    %cst_44 = arith.constant 0.00999999977 : f32
    %52 = vector.broadcast %cst_44 : f32 to vector<144x32xf32>
    %53 = arith.subf %37, %52 : vector<144x32xf32>
    %cst_45 = arith.constant -0.00999999977 : f32
    %54 = vector.broadcast %cst_45 : f32 to vector<144x32xf32>
    %55 = arith.cmpf olt, %37, %54 : vector<144x32xf32>
    %cst_46 = arith.constant 0.00999999977 : f32
    %56 = vector.broadcast %cst_46 : f32 to vector<144x32xf32>
    %57 = arith.addf %37, %56 : vector<144x32xf32>
    %cst_47 = arith.constant 0.000000e+00 : f32
    %58 = vector.broadcast %cst_47 : f32 to vector<144x32xf32>
    %59 = arith.select %55, %57, %58 : vector<144x32xi1>, vector<144x32xf32>
    %60 = arith.select %51, %53, %59 : vector<144x32xi1>, vector<144x32xf32>
    %c0_48 = arith.constant 0 : index
    %c32 = arith.constant 32 : index
    %61 = vector.load %arg11[%c0_48, %c32] : memref<144x64xf32, #tpu.memory_space<vmem>>, vector<144x32xf32>
    tpu.vector_store %arg11[%c0_48, %c32], %60 {strides = array<i32>} : memref<144x64xf32, #tpu.memory_space<vmem>>, vector<144x32xf32>,
    return
  }
  func.func @transform_0(%arg0: i32) -> (i32, i32) {
    %c0_i32 = arith.constant 0 : i32
    %c0_i32_0 = arith.constant 0 : i32
    return %arg0, %c0_i32 : i32, i32
  }
  func.func @transform_1(%arg0: i32) -> (i32, i32) {
    %c0_i32 = arith.constant 0 : i32
    %c0_i32_0 = arith.constant 0 : i32
    return %arg0, %c0_i32 : i32, i32
  }
  func.func @transform_2(%arg0: i32) -> (i32, i32) {
    %c0_i32 = arith.constant 0 : i32
    %c0_i32_0 = arith.constant 0 : i32
    %c0_i32_1 = arith.constant 0 : i32
    return %c0_i32, %c0_i32_0 : i32, i32
  }
  func.func @transform_3(%arg0: i32) -> (i32, i32) {
    %c0_i32 = arith.constant 0 : i32
    %c0_i32_0 = arith.constant 0 : i32
    %c0_i32_1 = arith.constant 0 : i32
    return %c0_i32, %c0_i32_0 : i32, i32
  }
  func.func @transform_4(%arg0: i32) -> (i32, i32) {
    %c0_i32 = arith.constant 0 : i32
    %c0_i32_0 = arith.constant 0 : i32
    %c0_i32_1 = arith.constant 0 : i32
    return %c0_i32, %c0_i32_0 : i32, i32
  }
  func.func @transform_5(%arg0: i32) -> (i32, i32) {
    %c0_i32 = arith.constant 0 : i32
    %c0_i32_0 = arith.constant 0 : i32
    %c0_i32_1 = arith.constant 0 : i32
    return %c0_i32, %c0_i32_0 : i32, i32
  }
  func.func @transform_6(%arg0: i32) -> (i32, i32) {
    %c0_i32 = arith.constant 0 : i32
    %c0_i32_0 = arith.constant 0 : i32
    %c0_i32_1 = arith.constant 0 : i32
    return %c0_i32, %c0_i32_0 : i32, i32
  }
  func.func @transform_7(%arg0: i32) -> (i32, i32) {
    %c0_i32 = arith.constant 0 : i32
    %c0_i32_0 = arith.constant 0 : i32
    %c0_i32_1 = arith.constant 0 : i32
    return %c0_i32, %c0_i32_0 : i32, i32
  }
  func.func @transform_8(%arg0: i32) -> (i32, i32) {
    %c0_i32 = arith.constant 0 : i32
    %c0_i32_0 = arith.constant 0 : i32
    %c0_i32_1 = arith.constant 0 : i32
    return %c0_i32, %c0_i32_0 : i32, i32
  }
  func.func @transform_9(%arg0: i32) -> (i32, i32) {
    %c0_i32 = arith.constant 0 : i32
    %c0_i32_0 = arith.constant 0 : i32
    %c0_i32_1 = arith.constant 0 : i32
    return %c0_i32, %c0_i32_0 : i32, i32
  }
  func.func @transform_10(%arg0: i32) -> (i32, i32) {
    %c0_i32 = arith.constant 0 : i32
    %c0_i32_0 = arith.constant 0 : i32
    return %arg0, %c0_i32 : i32, i32
  }
}

module attributes {stable_mosaic.version = 11 : i64} {
  func.func @_norm_mlp_kernel(%arg0: i32, %arg1: memref<256x32xf32, #tpu.memory_space<vmem>>, %arg2: memref<256x32xf32, #tpu.memory_space<vmem>>, %arg3: memref<256x32xf32, #tpu.memory_space<vmem>>, %arg4: memref<1x32xf32, #tpu.memory_space<vmem>>, %arg5: memref<1x32xf32, #tpu.memory_space<vmem>>, %arg6: memref<32x128xbf16, #tpu.memory_space<vmem>>, %arg7: memref<1x128xf32, #tpu.memory_space<vmem>>, %arg8: memref<128x32xbf16, #tpu.memory_space<vmem>>, %arg9: memref<1x32xf32, #tpu.memory_space<vmem>>, %arg10: memref<256x32xf32, #tpu.memory_space<vmem>>) attributes {dimension_semantics = [#tpu.dimension_semantics<parallel>], iteration_bounds = array<i64: 2>, scalar_prefetch = 0 : i64, scratch_operands = 0 : i64, tpu.core_type = #tpu.core_type<tc>, window_params = [{transform_indices = @transform_0, window_bounds = array<i64: 256, 32>}, {transform_indices = @transform_1, window_bounds = array<i64: 256, 32>}, {transform_indices = @transform_2, window_bounds = array<i64: 256, 32>}, {pipeline_mode = #tpu.pipeline_mode<synchronous>, transform_indices = @transform_3, window_bounds = array<i64: 1, 32>}, {pipeline_mode = #tpu.pipeline_mode<synchronous>, transform_indices = @transform_4, window_bounds = array<i64: 1, 32>}, {pipeline_mode = #tpu.pipeline_mode<synchronous>, transform_indices = @transform_5, window_bounds = array<i64: 32, 128>}, {pipeline_mode = #tpu.pipeline_mode<synchronous>, transform_indices = @transform_6, window_bounds = array<i64: 1, 128>}, {pipeline_mode = #tpu.pipeline_mode<synchronous>, transform_indices = @transform_7, window_bounds = array<i64: 128, 32>}, {pipeline_mode = #tpu.pipeline_mode<synchronous>, transform_indices = @transform_8, window_bounds = array<i64: 1, 32>}, {transform_indices = @transform_9, window_bounds = array<i64: 256, 32>}]} {
    %c0 = arith.constant 0 : index
    %c0_0 = arith.constant 0 : index
    %0 = vector.load %arg1[%c0, %c0_0] : memref<256x32xf32, #tpu.memory_space<vmem>>, vector<256x32xf32>
    %c0_1 = arith.constant 0 : index
    %c0_2 = arith.constant 0 : index
    %1 = vector.load %arg2[%c0_1, %c0_2] : memref<256x32xf32, #tpu.memory_space<vmem>>, vector<256x32xf32>
    %2 = arith.addf %0, %1 : vector<256x32xf32>
    %c0_3 = arith.constant 0 : index
    %c0_4 = arith.constant 0 : index
    %3 = vector.load %arg3[%c0_3, %c0_4] : memref<256x32xf32, #tpu.memory_space<vmem>>, vector<256x32xf32>
    %4 = arith.addf %2, %3 : vector<256x32xf32>
    %c0_5 = arith.constant 0 : index
    %c0_6 = arith.constant 0 : index
    %5 = vector.load %arg4[%c0_5, %c0_6] : memref<1x32xf32, #tpu.memory_space<vmem>>, vector<1x32xf32>
    %c0_7 = arith.constant 0 : index
    %c0_8 = arith.constant 0 : index
    %6 = vector.load %arg5[%c0_7, %c0_8] : memref<1x32xf32, #tpu.memory_space<vmem>>, vector<1x32xf32>
    %cst = arith.constant dense<0.000000e+00> : vector<256xf32>
    %7 = vector.multi_reduction <add>, %4, %cst [1] : vector<256x32xf32> to vector<256xf32>
    %8 = vector.shape_cast %7 : vector<256xf32> to vector<256x1xf32>
    %cst_9 = arith.constant 3.200000e+01 : f32
    %9 = vector.broadcast %cst_9 : f32 to vector<256x1xf32>
    %10 = arith.divf %8, %9 : vector<256x1xf32>
    %11 = vector.broadcast %10 : vector<256x1xf32> to vector<256x32xf32>
    %12 = arith.subf %4, %11 : vector<256x32xf32>
    %13 = arith.mulf %12, %12 : vector<256x32xf32>
    %cst_10 = arith.constant dense<0.000000e+00> : vector<256xf32>
    %14 = vector.multi_reduction <add>, %13, %cst_10 [1] : vector<256x32xf32> to vector<256xf32>
    %15 = vector.shape_cast %14 : vector<256xf32> to vector<256x1xf32>
    %cst_11 = arith.constant 3.200000e+01 : f32
    %16 = vector.broadcast %cst_11 : f32 to vector<256x1xf32>
    %17 = arith.divf %15, %16 : vector<256x1xf32>
    %cst_12 = arith.constant 9.99999974E-6 : f32
    %18 = vector.broadcast %cst_12 : f32 to vector<256x1xf32>
    %19 = arith.addf %17, %18 : vector<256x1xf32>
    %20 = math.rsqrt %19 : vector<256x1xf32>
    %21 = vector.broadcast %20 : vector<256x1xf32> to vector<256x32xf32>
    %22 = arith.mulf %12, %21 : vector<256x32xf32>
    %23 = vector.broadcast %5 : vector<1x32xf32> to vector<256x32xf32>
    %24 = arith.mulf %22, %23 : vector<256x32xf32>
    %25 = vector.broadcast %6 : vector<1x32xf32> to vector<256x32xf32>
    %26 = arith.addf %24, %25 : vector<256x32xf32>
    %27 = arith.truncf %26 : vector<256x32xf32> to vector<256x32xbf16>
    %c0_13 = arith.constant 0 : index
    %c0_14 = arith.constant 0 : index
    %28 = vector.load %arg6[%c0_13, %c0_14] : memref<32x128xbf16, #tpu.memory_space<vmem>>, vector<32x128xbf16>
    %cst_15 = arith.constant dense<0.000000e+00> : vector<256x128xf32>
    %29 = tpu.matmul %27, %28, %cst_15 {dimension_numbers = #tpu.dot_dimension_numbers<[1], [0], [0], [1], [0, 0, 1, 1], [], []>} : vector<256x32xbf16>, vector<32x128xbf16>, vector<256x128xf32> -> vector<256x128xf32>
    %c0_16 = arith.constant 0 : index
    %c0_17 = arith.constant 0 : index
    %30 = vector.load %arg7[%c0_16, %c0_17] : memref<1x128xf32, #tpu.memory_space<vmem>>, vector<1x128xf32>
    %31 = vector.broadcast %30 : vector<1x128xf32> to vector<256x128xf32>
    %32 = arith.addf %29, %31 : vector<256x128xf32>
    %cst_18 = arith.constant 5.000000e-01 : f32
    %33 = vector.broadcast %cst_18 : f32 to vector<256x128xf32>
    %34 = arith.mulf %33, %32 : vector<256x128xf32>
    %cst_19 = arith.constant 4.471500e-02 : f32
    %35 = vector.broadcast %cst_19 : f32 to vector<256x128xf32>
    %36 = arith.mulf %35, %32 : vector<256x128xf32>
    %37 = arith.mulf %36, %32 : vector<256x128xf32>
    %38 = arith.mulf %37, %32 : vector<256x128xf32>
    %39 = arith.addf %32, %38 : vector<256x128xf32>
    %cst_20 = arith.constant 0.797884583 : f32
    %40 = vector.broadcast %cst_20 : f32 to vector<256x128xf32>
    %41 = arith.mulf %40, %39 : vector<256x128xf32>
    %42 = math.tanh %41 : vector<256x128xf32>
    %cst_21 = arith.constant 1.000000e+00 : f32
    %43 = vector.broadcast %cst_21 : f32 to vector<256x128xf32>
    %44 = arith.addf %43, %42 : vector<256x128xf32>
    %45 = arith.mulf %34, %44 : vector<256x128xf32>
    %46 = arith.truncf %45 : vector<256x128xf32> to vector<256x128xbf16>
    %c0_22 = arith.constant 0 : index
    %c0_23 = arith.constant 0 : index
    %47 = vector.load %arg8[%c0_22, %c0_23] : memref<128x32xbf16, #tpu.memory_space<vmem>>, vector<128x32xbf16>
    %cst_24 = arith.constant dense<0.000000e+00> : vector<256x32xf32>
    %48 = tpu.matmul %46, %47, %cst_24 {dimension_numbers = #tpu.dot_dimension_numbers<[1], [0], [0], [1], [0, 0, 1, 1], [], []>} : vector<256x128xbf16>, vector<128x32xbf16>, vector<256x32xf32> -> vector<256x32xf32>
    %c0_25 = arith.constant 0 : index
    %c0_26 = arith.constant 0 : index
    %49 = vector.load %arg9[%c0_25, %c0_26] : memref<1x32xf32, #tpu.memory_space<vmem>>, vector<1x32xf32>
    %50 = vector.broadcast %49 : vector<1x32xf32> to vector<256x32xf32>
    %51 = arith.addf %48, %50 : vector<256x32xf32>
    %52 = arith.addf %51, %4 : vector<256x32xf32>
    %c0_27 = arith.constant 0 : index
    %c0_28 = arith.constant 0 : index
    %53 = vector.load %arg10[%c0_27, %c0_28] : memref<256x32xf32, #tpu.memory_space<vmem>>, vector<256x32xf32>
    tpu.vector_store %arg10[%c0_27, %c0_28], %52 {strides = array<i32>} : memref<256x32xf32, #tpu.memory_space<vmem>>, vector<256x32xf32>,
    return
  }
  func.func @transform_0(%arg0: i32) -> (i32, i32) {
    %c0_i32 = arith.constant 0 : i32
    %c0_i32_0 = arith.constant 0 : i32
    return %arg0, %c0_i32 : i32, i32
  }
  func.func @transform_1(%arg0: i32) -> (i32, i32) {
    %c0_i32 = arith.constant 0 : i32
    %c0_i32_0 = arith.constant 0 : i32
    return %arg0, %c0_i32 : i32, i32
  }
  func.func @transform_2(%arg0: i32) -> (i32, i32) {
    %c0_i32 = arith.constant 0 : i32
    %c0_i32_0 = arith.constant 0 : i32
    return %arg0, %c0_i32 : i32, i32
  }
  func.func @transform_3(%arg0: i32) -> (i32, i32) {
    %c0_i32 = arith.constant 0 : i32
    %c0_i32_0 = arith.constant 0 : i32
    %c0_i32_1 = arith.constant 0 : i32
    return %c0_i32, %c0_i32_0 : i32, i32
  }
  func.func @transform_4(%arg0: i32) -> (i32, i32) {
    %c0_i32 = arith.constant 0 : i32
    %c0_i32_0 = arith.constant 0 : i32
    %c0_i32_1 = arith.constant 0 : i32
    return %c0_i32, %c0_i32_0 : i32, i32
  }
  func.func @transform_5(%arg0: i32) -> (i32, i32) {
    %c0_i32 = arith.constant 0 : i32
    %c0_i32_0 = arith.constant 0 : i32
    %c0_i32_1 = arith.constant 0 : i32
    return %c0_i32, %c0_i32_0 : i32, i32
  }
  func.func @transform_6(%arg0: i32) -> (i32, i32) {
    %c0_i32 = arith.constant 0 : i32
    %c0_i32_0 = arith.constant 0 : i32
    %c0_i32_1 = arith.constant 0 : i32
    return %c0_i32, %c0_i32_0 : i32, i32
  }
  func.func @transform_7(%arg0: i32) -> (i32, i32) {
    %c0_i32 = arith.constant 0 : i32
    %c0_i32_0 = arith.constant 0 : i32
    %c0_i32_1 = arith.constant 0 : i32
    return %c0_i32, %c0_i32_0 : i32, i32
  }
  func.func @transform_8(%arg0: i32) -> (i32, i32) {
    %c0_i32 = arith.constant 0 : i32
    %c0_i32_0 = arith.constant 0 : i32
    %c0_i32_1 = arith.constant 0 : i32
    return %c0_i32, %c0_i32_0 : i32, i32
  }
  func.func @transform_9(%arg0: i32) -> (i32, i32) {
    %c0_i32 = arith.constant 0 : i32
    %c0_i32_0 = arith.constant 0 : i32
    return %arg0, %c0_i32 : i32, i32
  }
}

</mosaic_0001>

<bundles_post_ra>
// kernel: tpu_custom_call.1
= control target key start
LH: loop header
LB: loop body
LE: loop exit
PB: predicated region body
PF: predicated region fallthrough
CT: control target
= control target key end

     0   :  { %7 = vsyncpa [#allocation3], 0  ;;  %s690_s0 = inlined_call_operand.hbm [shape: f32[16,128], index: 0, kind: input, shape index: {}]   ;;  %s691_s1 = inlined_call_operand.hbm [shape: f32[8,128], index: 1, kind: input, shape index: {}]   ;;  %s692_s2 = inlined_call_operand.hbm [shape: f32[16,128], index: 2, kind: output, shape index: {}]  }
   0x1   :  { %9 = vsyncpa [#allocation3 + $0x1], 0 }
   0x2   :  { %10 = vsyncpa [#allocation6], 0 }
   0x3   :  { %11 = vsyncpa [#allocation4], 0 }
   0x4   :  { %13 = vsyncpa [#allocation4 + $0x1], 0  ;;  %s489_s9 = smov 0   ;;  %s491_s10 = smov 0  }
   0x5   :  { %s493_s11 = smov 0   ;;  %s495_s12 = smov 0  }
   0x6 LB: > { %s510_s13 = sadd.s32 4294967295, %s469_s12   ;;  %s270_s14 = sadd.s32 4294967294, %s469_s12   ;;  %s469_s12 = sphi %s495_s12, %s716_s12   ;;  %s465_s11 = sphi %s493_s11, %s715_s11   ;;  %s461_s10 = sphi %s491_s10, %s714_s10   ;;  %s457_s9 = sphi %s489_s9, %s713_s9  }
   0x7   : > { %p39_p0 = scmp.ne.s32.totalorder %s461_s10, %s457_s9  ;;  %p693_p1 = scmp.eq.s32.totalorder %s510_s13, 0 }
   0x8   : > { %p90_p3 = scmp.eq.s32.totalorder %s270_s14, 1  ;;  %p271_p5 = scmp.ge.s32.totalorder %s469_s12, 1 }
   0x9   : > { %p519_p4 = por %p693_p1, %p39_p0  ;;  %p97_p7 = scmp.lt.s32.totalorder %s469_s12, 3 }
   0xa   : > { %p524_p6 = por %p90_p3, %p39_p0  ;;  %s471_s18 = smov [#allocation5]  }
   0xb   : > { %s696_s15 = scalar_select %p519_p4, 1, 0 }
   0xc   : > { %s697_s16 = scalar_select %p524_p6, 1, 0 }
   0xd   : > { %p529_p8 = pnand %p271_p5, %p97_p7  ;;  %s110_s19 = sshll.u32 %s471_s18, 4  ;;  %s111_s19 = int_to_ptr.vmem [resolvable:$true] %s110_s19 }
   0xe   : > { %s537_s20 = sadd.s32 1, %s469_s12   ;;  %s26_s24 = sadd.s32 1, %s465_s11 }
   0xf   : > { %s698_s17 = scalar_select %p529_p8, 1, 0 }
  0x10   : > { %p292_p10 = pneg %p529_p8  ;;  %s23_s22 = ssub.s32 %s469_s12, %s537_s20 }
  0x11   : > { %p547_p12 = scmp.eq.s32.totalorder %s23_s22, 0  ;;  %s341_s27 = scalar_lea.hbm %s691_s1, 128 }
  0x12   : > { %p541_p11 = pnand %p292_p10, %p693_p1  ;;  %p342_p0 = scmp.ne.s32.totalorder %s691_s1, %s341_s27 }
  0x13   : > { %s700_s23 = scalar_select %p547_p12, 1, 0 }
  0x14   : > { %p343_p3 = pneg %p541_p11  ;;  %p348_p10 = scmp.lt.u32.totalorder %s341_s27, %s691_s1 }
  0x16   : > { %p344_p5 = pnand %p343_p3, %p342_p0 }
  0x18   : > { %p345_p7 = pneg %p344_p5 }
  0x1a   : > { %p350_p9 = pnand %p348_p10, %p345_p7 }
  0x1c   : > { %353 = shalt.err (!%p350_p9)
}
  0x1d   : > { %s354_s4 = scalar_lea.vmem %s111_s19, 128  ;;  %p362_p6 = scmp.lt.s32.totalorder %s111_s19, %s111_s19 }
  0x1e   : > { %p355_p1 = scmp.ne.s32.totalorder %s111_s19, %s354_s4  ;;  %p363_p4 = scmp.lt.s32.totalorder %s354_s4, %s354_s4 }
  0x20   : > { %p357_p2 = pnand %p355_p1, %p343_p3  ;;  %p364_p8 = por %p363_p4, %p362_p6 }
  0x22   : > { %p358_p13 = pneg %p357_p2 }
  0x24   : > { %p365_p12 = pnand %p364_p8, %p358_p13 }
  0x26   : > { %368 = shalt.err (!%p365_p12)
}
  0x27   : > { %295 = dma.hbm_to_vmem [thread:$0]  (!%p541_p11), %s691_s1, 128, %s111_s19, [#allocation6]  }
  0x28   : > { %p701_p1 = scmp.ne.s32.totalorder %s700_s23, 0  ;;  %p34_p2 = scmp.eq.s32.totalorder %s469_s12, 0 }
  0x29   : > { %p702_p4 = scmp.ne.s32.totalorder %s465_s11, %s461_s10  ;;  %p703_p6 = scmp.eq.s32.totalorder %s510_s13, 1 }
  0x2a   : > { %s573_s7 = scalar_select %p701_p1, %s465_s11, %s26_s24  }
  0x2b   : > { %p581_p8 = por %p703_p6, %p702_p4  ;;  %p305_p9 = scmp.lt.s32.totalorder %s469_s12, 2 }
  0x2c   : > { %s121_s14 = sand.u32 1, %s465_s11   ;;  %p705_p12 = pmov %p702_p4 }
  0x2d   : > { %s274_s18 = sshll.u32 %s121_s14, 3  ;;  %s275_s21 = sshll.u32 %s469_s12, 7 }
  0x2e   : > { %p35_p13 = por %p34_p2, %p705_p12  ;;  %s594_s19 = scalar_lea.hbm %s690_s0, %s275_s21 }
  0x2f   : > { %s125_s23 = scalar_lea.vmem [#allocation2], %s274_s18  ;;  %s122_s27 = scalar_lea.sflag [#allocation3], %s121_s14 }
  0x30   : > { %s132_s24 = sshll.u32 %s125_s23, 4  ;;  %p596_p11 = pnand %p305_p9, %p35_p13  ;;  %s600_s24 = int_to_ptr.vmem [resolvable:$true] %s132_s24 }
  0x31   : > { %s369_s28 = scalar_lea.hbm %s594_s19, 128  ;;  %s374_s3 = scalar_lea.hbm %s690_s0, 256 }
  0x32   : > { %p370_p0 = scmp.ne.s32.totalorder %s594_s19, %s369_s28  ;;  %p371_p3 = pneg %p596_p11 }
  0x33   : > { %p375_p10 = scmp.lt.u32.totalorder %s594_s19, %s690_s0  ;;  %p376_p1 = scmp.lt.u32.totalorder %s374_s3, %s369_s28 }
  0x34   : > { %p372_p5 = pnand %p371_p3, %p370_p0  ;;  %p378_p4 = scmp.lt.u32.totalorder %s369_s28, %s594_s19 }
  0x35   : > { %p377_p2 = por %p376_p1, %p375_p10 }
  0x36   : > { %p373_p7 = pneg %p372_p5 }
  0x37   : > { %p379_p6 = por %p378_p4, %p377_p2 }
  0x39   : > { %p380_p9 = pnand %p379_p6, %p373_p7 }
  0x3b   : > { %383 = shalt.err (!%p380_p9)
}
  0x3c   : > { %s384_s6 = scalar_lea.vmem %s600_s24, 128  ;;  %s472_s14 = smov [#allocation2]  }
  0x3d   : > { %p385_p12 = scmp.ne.s32.totalorder %s600_s24, %s384_s6  ;;  %s389_s18 = sshll.u32 %s472_s14, 4  ;;  %s390_s18 = int_to_ptr.vmem [resolvable:$false] %s389_s18 }
  0x3e   : > { %s391_s21 = scalar_lea.vmem %s390_s18, 256  ;;  %p392_p5 = scmp.lt.s32.totalorder %s600_s24, %s390_s18 }
  0x3f   : > { %p387_p13 = pnand %p385_p12, %p371_p3  ;;  %p393_p10 = scmp.lt.s32.totalorder %s391_s21, %s384_s6 }
  0x41   : > { %p388_p0 = pneg %p387_p13  ;;  %p394_p1 = por %p393_p10, %p392_p5 }
  0x43   : > { %p395_p2 = pnand %p394_p1, %p388_p0 }
  0x45   : > { %398 = shalt.err (!%p395_p2)
}
  0x46   : > { %299 = dma.hbm_to_vmem [thread:$0]  (!%p596_p11), %s594_s19, 128, %s600_s24, %s122_s27  }
  0x47   : > { %p707_p7 = scmp.ne.s32.totalorder %s698_s17, 0 }
  0x48   : > { %s630_s22 = sand.u32 (!%p707_p7), 1, %s461_s10   ;;  %p708_p3 = scmp.ne.s32.totalorder (!%p707_p7), %s696_s15, 0 }
  0x49   : > { %141 = sbr.rel (%p707_p7) target bundleno = 109 (0x6d), region = 28  ;;  %s277_s25 = sshll.u32 (!%p707_p7), %s630_s22, 3 }
  0x4a   : > { %s144_s23 = scalar_lea.sflag (!%p707_p7), [#allocation3], %s630_s22  ;;  %s147_s28 = scalar_lea.vmem (!%p707_p7), [#allocation2], %s277_s25 }
  0x50   : > { %444 = dma.done.wait (%p708_p3), %s144_s23, 128  }
  0x51   : > { %446 = vsyncadd (%p708_p3), %s144_s23, 4294967168  ;;  %p709_p4 = scmp.eq.s32.totalorder %s510_s13, 0 }
  0x53   : > { %448 = dma.done.wait (%p709_p4), [#allocation6], 128   ;;  %p710_p11 = pmov %p709_p4 }
  0x54   : > { %s171_s17 = scalar_lea.vmem [#allocation7], %s277_s25  ;;  %s281_s24 = sshll.u32 %s510_s13, 7  ;;  %v172_v0 = vld [vmem:[%s147_s28] sm:$0xff]  ;;  %v173_v1 = vld [vmem:[#allocation5] sm:$0xff] }
  0x55   : > { %450 = vsyncadd (%p710_p11), [#allocation6], 4294967168  ;;  %s190_s19 = sshll.u32 %s171_s17, 4  ;;  %v174_v2 = vadd.f32 %v173_v1, %v172_v0  ;;  %s648_s27 = scalar_lea.hbm %s692_s2, %s281_s24  ;;  %s643_s19 = int_to_ptr.vmem [resolvable:$true] %s190_s19 }
  0x56   : > { %s177_s29 = scalar_lea.sflag [#allocation4], %s630_s22  ;;  %s399_s30 = scalar_lea.vmem %s643_s19, 128 }
  0x57   : > { %175 = vst [vmem:[%s171_s17] sm:$0xff] %v174_v2  ;;  %p400_p6 = scmp.ne.s32.totalorder %s643_s19, %s399_s30  ;;  %s473_s13 = smov [#allocation7]  }
  0x58   : > { %s403_s3 = sshll.u32 %s473_s13, 4  ;;  %s404_s3 = int_to_ptr.vmem [resolvable:$false] %s403_s3 }
  0x59   : > { %p401_p9 = pnand %p400_p6, %p581_p8  ;;  %s405_s4 = scalar_lea.vmem %s404_s3, 256 }
  0x5a   : > { %p406_p13 = scmp.lt.s32.totalorder %s643_s19, %s404_s3  ;;  %p407_p0 = scmp.lt.s32.totalorder %s405_s4, %s399_s30 }
  0x5b   : > { %p402_p12 = pneg %p401_p9 }
  0x5c   : > { %p408_p5 = por %p407_p0, %p406_p13 }
  0x5e   : > { %p409_p10 = pnand %p408_p5, %p402_p12 }
  0x60   : > { %412 = shalt.err (!%p409_p10)
}
  0x61   : > { %s413_s5 = scalar_lea.hbm %s648_s27, 128  ;;  %s417_s18 = scalar_lea.hbm %s692_s2, 256 }
  0x62   : > { %p414_p1 = scmp.ne.s32.totalorder %s648_s27, %s413_s5  ;;  %p418_p3 = scmp.lt.u32.totalorder %s648_s27, %s692_s2 }
  0x63   : > { %p419_p4 = scmp.lt.u32.totalorder %s417_s18, %s413_s5  ;;  %p421_p6 = scmp.lt.u32.totalorder %s413_s5, %s648_s27 }
  0x64   : > { %p415_p2 = pnand %p414_p1, %p581_p8 }
  0x65   : > { %p420_p11 = por %p419_p4, %p418_p3 }
  0x66   : > { %p416_p7 = pneg %p415_p2 }
  0x67   : > { %p422_p9 = por %p421_p6, %p420_p11 }
  0x69   : > { %p423_p12 = pnand %p422_p9, %p416_p7 }
  0x6b   : > { %426 = shalt.err (!%p423_p12)
}
  0x6c   : > { %290 = dma.vmem_to_hbm [thread:$0]  (%p581_p8), %s643_s19, 128, %s648_s27, %s177_s29  }
  0x6d PF: > { %s202_s25 = sand.u32 1, %s457_s9   ;;  %p711_p13 = scmp.ne.s32.totalorder %s697_s16, 0 }
  0x6e   : > { %p712_p0 = scmp.ge.s32.totalorder %s469_s12, 2  ;;  %s203_s23 = scalar_lea.sflag [#allocation4], %s202_s25 }
  0x70   : > { %p301_p5 = pnand %p712_p0, %p711_p13 }
  0x72   : > { %452 = dma.done.wait (!%p301_p5), %s203_s23, 128  }
  0x73   : > { %454 = vsyncadd (!%p301_p5), %s203_s23, 4294967168  ;;  %p16_p10 = scmp.ge.s32.totalorder %s537_s20, 4   ;;  %s713_s9 = smov %s461_s10 }
  0x74   : > { %s714_s10 = smov %s465_s11  ;;  %s715_s11 = smov %s573_s7 }
  0x75   : > { %s716_s12 = smov %s537_s20  ;;  %18 = sbr.rel (!%p16_p10) target bundleno = 6 (0x6), region = 77 }
  0x7c   :  { %208 = vsyncpa [#allocation3], 1 }
  0x7d   :  { %210 = vsyncpa [#allocation3 + $0x1], 1 }
  0x7e   :  { %211 = vsyncpa [#allocation6], 1 }
  0x7f   :  { %212 = vsyncpa [#allocation4], 1 }
  0x80   :  { %214 = vsyncpa [#allocation4 + $0x1], 1 }

// kernel: block_forward.3
= control target key start
LH: loop header
LB: loop body
LE: loop exit
PB: predicated region body
PF: predicated region fallthrough
CT: control target
= control target key end

     0   :  { %8 = vsyncpa [#allocation3], 0  ;;  %s1663_s0 = inlined_call_operand.hbm [shape: f32[512,32], index: 0, kind: input, shape index: {}]   ;;  %s1664_s1 = inlined_call_operand.vmem [shape: f32[1,32], index: 1, kind: input, shape index: {}]   ;;  %s1665_s2 = inlined_call_operand.vmem [shape: f32[1,32], index: 2, kind: input, shape index: {}]   ;;  %s1666_s3 = inlined_call_operand.vmem [shape: f32[512,32], index: 3, kind: output, shape index: {}]  }
   0x1   :  { %10 = vsyncpa [#allocation3 + $0x1], 0  ;;  %s1030_s12 = smov 0   ;;  %s1032_s13 = smov 0  }
   0x2   :  { %s1034_s14 = smov 0   ;;  %s1036_s15 = smov 0  }
   0x3 LB: > { %s820_s16 = sadd.s32 4294967295, %s1005_s15   ;;  %s1050_s17 = sadd.s32 1, %s1005_s15   ;;  %s1005_s15 = sphi %s1036_s15, %s1673_s15   ;;  %s1001_s14 = sphi %s1034_s14, %s1672_s14   ;;  %s997_s13 = sphi %s1032_s13, %s1671_s13   ;;  %s993_s12 = sphi %s1030_s12, %s1670_s12  }
   0x4   : > { %s20_s18 = ssub.s32 %s1005_s15, %s1050_s17  ;;  %s23_s19 = sadd.s32 1, %s1001_s14 }
   0x5   : > { %p21_p0 = scmp.eq.s32.totalorder %s20_s18, 0  ;;  %p30_p1 = scmp.ne.s32.totalorder %s1001_s14, %s997_s13 }
   0x6   : > { %p31_p2 = scmp.eq.s32.totalorder %s1005_s15, 0  ;;  %p36_p3 = scmp.ne.s32.totalorder %s997_s13, %s993_s12 }
   0x7   : > { %s1060_s20 = scalar_select %p21_p0, %s1001_s14, %s23_s19  }
   0x8   : > { %p32_p4 = por %p31_p2, %p30_p1  ;;  %p37_p5 = scmp.eq.s32.totalorder %s820_s16, 0 }
   0x9   : > { %p842_p6 = scmp.lt.s32.totalorder %s1005_s15, 2  ;;  %s134_s22 = sand.u32 1, %s1001_s14  }
   0xa   : > { %p1065_p7 = por %p37_p5, %p36_p3  ;;  %s824_s23 = sshll.u32 %s134_s22, 8 }
   0xb   : > { %s835_s24 = sshll.u32 %s1005_s15, 12  ;;  %s138_s28 = scalar_lea.vmem [#allocation2], %s824_s23 }
   0xc   : > { %s1074_s27 = scalar_lea.hbm %s1663_s0, %s835_s24  ;;  %s145_s29 = sshll.u32 %s138_s28, 4  ;;  %s1076_s29 = int_to_ptr.vmem [resolvable:$true] %s145_s29 }
   0xd   : > { %p1078_p8 = pnand %p842_p6, %p32_p4  ;;  %s1083_s4 = scalar_lea.sflag [#allocation3], %s134_s22 }
   0xe   : > { %s941_s5 = scalar_lea.hbm %s1074_s27, 4096  ;;  %s946_s8 = scalar_lea.hbm %s1663_s0, 8192 }
   0xf   : > { %p942_p10 = scmp.ne.s32.totalorder %s1074_s27, %s941_s5  ;;  %p943_p11 = pneg %p1078_p8 }
  0x10   : > { %p947_p0 = scmp.lt.u32.totalorder %s1074_s27, %s1663_s0  ;;  %p948_p1 = scmp.lt.u32.totalorder %s946_s8, %s941_s5 }
  0x11   : > { %p944_p12 = pnand %p943_p11, %p942_p10  ;;  %p950_p3 = scmp.lt.u32.totalorder %s941_s5, %s1074_s27 }
  0x12   : > { %p949_p2 = por %p948_p1, %p947_p0 }
  0x13   : > { %p945_p13 = pneg %p944_p12 }
  0x14   : > { %p951_p4 = por %p950_p3, %p949_p2 }
  0x16   : > { %p952_p5 = pnand %p951_p4, %p945_p13 }
  0x18   : > { %955 = shalt.err (!%p952_p5)
}
  0x19   : > { %s956_s11 = scalar_lea.vmem %s1076_s29, 4096  ;;  %s1007_s12 = smov [#allocation2]  }
  0x1a   : > { %p957_p6 = scmp.ne.s32.totalorder %s1076_s29, %s956_s11  ;;  %s961_s18 = sshll.u32 %s1007_s12, 4  ;;  %s962_s18 = int_to_ptr.vmem [resolvable:$false] %s961_s18 }
  0x1b   : > { %s963_s19 = scalar_lea.vmem %s962_s18, 8192  ;;  %p964_p9 = scmp.lt.s32.totalorder %s1076_s29, %s962_s18 }
  0x1c   : > { %p959_p10 = pnand %p957_p6, %p943_p11  ;;  %p965_p0 = scmp.lt.s32.totalorder %s963_s19, %s956_s11 }
  0x1e   : > { %p960_p12 = pneg %p959_p10  ;;  %p966_p1 = por %p965_p0, %p964_p9 }
  0x20   : > { %p967_p2 = pnand %p966_p1, %p960_p12 }
  0x22   : > { %970 = shalt.err (!%p967_p2)
}
  0x23   : > { %s1008_s22 = smov 128   ;;  %s1009_s23 = smov 8  }
  0x24   : > { %841 = dma.hbm_to_vmem [thread:$0]  (!%p1078_p8), %s1074_s27, 4096, %s1076_s29, %s1083_s4, %s1008_s22, %s1008_s22, %s1009_s23  }
  0x25   : > { %p153_p11 = scmp.lt.s32.totalorder %s1005_s15, 3  ;;  %p1669_p13 = scmp.ge.s32.totalorder %s1005_s15, 1 }
  0x27   : > { %p154_p3 = pnand %p1669_p13, %p153_p11 }
  0x28   : > { %s159_s24 = sand.u32 (!%p154_p3), 1, %s997_s13  }
  0x29   : > { %157 = sbr.rel (%p154_p3) target bundleno = 428 (0x1ac), region = 32  ;;  %s828_s25 = sshll.u32 (!%p154_p3), %s159_s24, 8 }
  0x2a   : > { %s160_s26 = scalar_lea.sflag (!%p154_p3), [#allocation3], %s159_s24  ;;  %s1115_s28 = scalar_lea.vmem (!%p154_p3), [#allocation2], %s828_s25 }
  0x30   : > { %988 = dma.done.wait (%p1065_p7), %s160_s26, 4096  }
  0x31   : > { %990 = vsyncadd (%p1065_p7), %s160_s26, 4294963200  ;;  %vm227_vm0 = vcmask 261120   ;;  %v1122_v0 = vld [vmem:[%s1115_s28] sm:$0xff]  ;;  %v1125_v1 = vld [vmem:[%s1115_s28 + $0x10] sm:$0xff]  ;;  %s829_s21 = sshll.u32 %s820_s16, 5 }
  0x32   : > { %v1128_v2 = vld [vmem:[%s1115_s28 + $0x8] sm:$0xff]  ;;  %v228_v3 = vsel %vm227_vm0, %v1122_v0, 0.0  ;;  %v234_v4 = vsel %vm227_vm0, %v1125_v1, 0.0  ;;  %v1135_v5 = vld [vmem:[%s1115_s28 + $0x18] sm:$0xff]  ;;  %v1142_v8 = vld [vmem:[%s1115_s28 + $0x20] sm:$0xff]  ;;  %p188_p7 = scmp.lt.s32.totalorder %s829_s21, 63 }
  0x33   : > { %229 = vadd.xlane.f32.xlu0 %v228_v3  ;;  %235 = vadd.xlane.f32.xlu1 %v234_v4  ;;  %v231_v6 = vsel %vm227_vm0, %v1128_v2, 0.0  ;;  %v237_v7 = vsel %vm227_vm0, %v1135_v5, 0.0  ;;  %v1145_v9 = vld [vmem:[%s1115_s28 + $0x28] sm:$0xff]  ;;  %v240_v10 = vsel %vm227_vm0, %v1142_v8, 0.0  ;;  %v1152_v12 = vld [vmem:[%s1115_s28 + $0x30] sm:$0xff]  ;;  %v1155_v13 = vld [vmem:[%s1115_s28 + $0x38] sm:$0xff] }
  0x34   : > { %v243_v11 = vsel %vm227_vm0, %v1145_v9, 0.0  ;;  %v246_v14 = vsel %vm227_vm0, %v1152_v12, 0.0  ;;  %v249_v15 = vsel %vm227_vm0, %v1155_v13, 0.0  ;;  %v1162_v16 = vld [vmem:[%s1115_s28 + $0x40] sm:$0xff]  ;;  %v1165_v17 = vld [vmem:[%s1115_s28 + $0x48] sm:$0xff]  ;;  %v1172_v20 = vld [vmem:[%s1115_s28 + $0x50] sm:$0xff] }
  0x35   : > { %v252_v18 = vsel %vm227_vm0, %v1162_v16, 0.0  ;;  %v255_v19 = vsel %vm227_vm0, %v1165_v17, 0.0  ;;  %v1175_v21 = vld [vmem:[%s1115_s28 + $0x58] sm:$0xff]  ;;  %v258_v22 = vsel %vm227_vm0, %v1172_v20, 0.0  ;;  %v1182_v24 = vld [vmem:[%s1115_s28 + $0x60] sm:$0xff]  ;;  %v1185_v25 = vld [vmem:[%s1115_s28 + $0x68] sm:$0xff] }
  0x36   : > { %v261_v23 = vsel %vm227_vm0, %v1175_v21, 0.0  ;;  %v264_v26 = vsel %vm227_vm0, %v1182_v24, 0.0  ;;  %v267_v27 = vsel %vm227_vm0, %v1185_v25, 0.0  ;;  %v1192_v28 = vld [vmem:[%s1115_s28 + $0x70] sm:$0xff]  ;;  %v1195_v29 = vld [vmem:[%s1115_s28 + $0x78] sm:$0xff]  ;;  %v1202_v32 = vld [vmem:[%s1115_s28 + $0x80] sm:$0xff] }
  0x37   : > { %232 = vadd.xlane.f32.xlu0 %v231_v6  ;;  %238 = vadd.xlane.f32.xlu1 %v237_v7  ;;  %v270_v30 = vsel %vm227_vm0, %v1192_v28, 0.0  ;;  %v273_v31 = vsel %vm227_vm0, %v1195_v29, 0.0  ;;  %v1205_v33 = vld [vmem:[%s1115_s28 + $0x88] sm:$0xff]  ;;  %v276_v34 = vsel %vm227_vm0, %v1202_v32, 0.0  ;;  %v1212_v36 = vld [vmem:[%s1115_s28 + $0x90] sm:$0xff]  ;;  %v1215_v37 = vld [vmem:[%s1115_s28 + $0x98] sm:$0xff] }
  0x38   : > { %v279_v35 = vsel %vm227_vm0, %v1205_v33, 0.0  ;;  %v282_v38 = vsel %vm227_vm0, %v1212_v36, 0.0  ;;  %v285_v39 = vsel %vm227_vm0, %v1215_v37, 0.0  ;;  %v1222_v40 = vld [vmem:[%s1115_s28 + $0xa0] sm:$0xff]  ;;  %v1225_v41 = vld [vmem:[%s1115_s28 + $0xa8] sm:$0xff]  ;;  %v1232_v44 = vld [vmem:[%s1115_s28 + $0xb0] sm:$0xff] }
  0x39   : > { %v288_v42 = vsel %vm227_vm0, %v1222_v40, 0.0  ;;  %v291_v43 = vsel %vm227_vm0, %v1225_v41, 0.0  ;;  %v1235_v45 = vld [vmem:[%s1115_s28 + $0xb8] sm:$0xff]  ;;  %v294_v46 = vsel %vm227_vm0, %v1232_v44, 0.0  ;;  %v1242_v48 = vld [vmem:[%s1115_s28 + $0xc0] sm:$0xff]  ;;  %v1245_v49 = vld [vmem:[%s1115_s28 + $0xc8] sm:$0xff] }
  0x3a   : > { %v297_v47 = vsel %vm227_vm0, %v1235_v45, 0.0  ;;  %v300_v50 = vsel %vm227_vm0, %v1242_v48, 0.0  ;;  %v303_v51 = vsel %vm227_vm0, %v1245_v49, 0.0  ;;  %v1252_v52 = vld [vmem:[%s1115_s28 + $0xd0] sm:$0xff]  ;;  %v1255_v53 = vld [vmem:[%s1115_s28 + $0xd8] sm:$0xff]  ;;  %v1262_v56 = vld [vmem:[%s1115_s28 + $0xe0] sm:$0xff] }
  0x3b   : > { %241 = vadd.xlane.f32.xlu0 %v240_v10  ;;  %244 = vadd.xlane.f32.xlu1 %v243_v11  ;;  %v306_v54 = vsel %vm227_vm0, %v1252_v52, 0.0  ;;  %v309_v55 = vsel %vm227_vm0, %v1255_v53, 0.0  ;;  %v1265_v57 = vld [vmem:[%s1115_s28 + $0xe8] sm:$0xff]  ;;  %v312_v58 = vsel %vm227_vm0, %v1262_v56, 0.0  ;;  %v1272_v60 = vld [vmem:[%s1115_s28 + $0xf0] sm:$0xff]  ;;  %v1275_v61 = vld [vmem:[%s1115_s28 + $0xf8] sm:$0xff] }
  0x3c   : > { %v315_v59 = vsel %vm227_vm0, %v1265_v57, 0.0  ;;  %v318_v62 = vsel %vm227_vm0, %v1272_v60, 0.0  ;;  %v321_v63 = vsel %vm227_vm0, %v1275_v61, 0.0  ;;  %s1675_s21 = smov (!%p188_p7, %s829_s21), 63 }
  0x3d   : > { %s830_s27 = sshll.u32 %s1675_s21, 3 }
  0x3e   : > { %s1490_s6 = scalar_lea.vmem %s1666_s3, %s830_s27 }
  0x3f   : > { %247 = vadd.xlane.f32.xlu0 %v246_v14  ;;  %250 = vadd.xlane.f32.xlu1 %v249_v15 }
  0x43   : > { %253 = vadd.xlane.f32.xlu0 %v252_v18  ;;  %256 = vadd.xlane.f32.xlu1 %v255_v19 }
  0x47   : > { %259 = vadd.xlane.f32.xlu0 %v258_v22  ;;  %262 = vadd.xlane.f32.xlu1 %v261_v23 }
  0x4b   : > { %265 = vadd.xlane.f32.xlu0 %v264_v26  ;;  %268 = vadd.xlane.f32.xlu1 %v267_v27 }
  0x4f   : > { %271 = vadd.xlane.f32.xlu0 %v270_v30  ;;  %274 = vadd.xlane.f32.xlu1 %v273_v31 }
  0x53   : > { %277 = vadd.xlane.f32.xlu0 %v276_v34  ;;  %280 = vadd.xlane.f32.xlu1 %v279_v35 }
  0x57   : > { %283 = vadd.xlane.f32.xlu0 %v282_v38  ;;  %286 = vadd.xlane.f32.xlu1 %v285_v39 }
  0x5b   : > { %289 = vadd.xlane.f32.xlu0 %v288_v42  ;;  %292 = vadd.xlane.f32.xlu1 %v291_v43 }
  0x5f   : > { %295 = vadd.xlane.f32.xlu0 %v294_v46  ;;  %298 = vadd.xlane.f32.xlu1 %v297_v47 }
  0x63   : > { %301 = vadd.xlane.f32.xlu0 %v300_v50  ;;  %304 = vadd.xlane.f32.xlu1 %v303_v51 }
  0x67   : > { %307 = vadd.xlane.f32.xlu0 %v306_v54  ;;  %310 = vadd.xlane.f32.xlu1 %v309_v55 }
  0x6b   : > { %313 = vadd.xlane.f32.xlu0 %v312_v58  ;;  %316 = vadd.xlane.f32.xlu1 %v315_v59 }
  0x6f   : > { %319 = vadd.xlane.f32.xlu0 %v318_v62  ;;  %322 = vadd.xlane.f32.xlu1 %v321_v63 }
  0xc0   : > { %v230_v3 = vpop.xlane.xlu0 %229  ;;  %v236_v4 = vpop.xlane.xlu1 %235 }
  0xc1   : > { %v325_v6 = vmul.f32 0.03125, %v230_v3  ;;  %v327_v7 = vmul.f32 0.03125, %v236_v4 }
  0xc3   : > { %v1282_v10 = vsub.f32 %v1122_v0, %v325_v6  ;;  %v1285_v11 = vsub.f32 %v1125_v1, %v327_v7 }
  0xc4   : > { %v233_v14 = vpop.xlane.xlu0 %232  ;;  %v239_v15 = vpop.xlane.xlu1 %238 }
  0xc5   : > { %v326_v18 = vmul.f32 0.03125, %v233_v14  ;;  %v328_v19 = vmul.f32 0.03125, %v239_v15  ;;  %v389_v22 = vmul.f32 %v1282_v10, %v1282_v10  ;;  %v391_v23 = vmul.f32 %v1285_v11, %v1285_v11 }
  0xc7   : > { %v1292_v26 = vsub.f32 %v1128_v2, %v326_v18  ;;  %v1295_v27 = vsub.f32 %v1135_v5, %v328_v19  ;;  %v421_v0 = vsel %vm227_vm0, %v389_v22, 0.0  ;;  %v427_v31 = vsel %vm227_vm0, %v391_v23, 0.0 }
  0xc8   : > { %422 = vadd.xlane.f32.xlu0 %v421_v0  ;;  %v242_v1 = vpop.xlane.xlu0 %241  ;;  %v245_v30 = vpop.xlane.xlu1 %244 }
  0xc9   : > { %v329_v34 = vmul.f32 0.03125, %v242_v1  ;;  %v330_v35 = vmul.f32 0.03125, %v245_v30  ;;  %v390_v38 = vmul.f32 %v1292_v26, %v1292_v26  ;;  %v392_v39 = vmul.f32 %v1295_v27, %v1295_v27 }
  0xcb   : > { %v1304_v2 = vsub.f32 %v1142_v8, %v329_v34  ;;  %v1307_v5 = vsub.f32 %v1145_v9, %v330_v35  ;;  %v424_v42 = vsel %vm227_vm0, %v390_v38, 0.0  ;;  %v430_v47 = vsel %vm227_vm0, %v392_v39, 0.0 }
  0xcc   : > { %428 = vadd.xlane.f32.xlu0 %v427_v31  ;;  %425 = vadd.xlane.f32.xlu1 %v424_v42  ;;  %v248_v43 = vpop.xlane.xlu0 %247  ;;  %v251_v46 = vpop.xlane.xlu1 %250 }
  0xcd   : > { %v331_v50 = vmul.f32 0.03125, %v248_v43  ;;  %v332_v51 = vmul.f32 0.03125, %v251_v46  ;;  %v393_v54 = vmul.f32 %v1304_v2, %v1304_v2  ;;  %v394_v8 = vmul.f32 %v1307_v5, %v1307_v5 }
  0xcf   : > { %v1316_v55 = vsub.f32 %v1152_v12, %v331_v50  ;;  %v1319_v9 = vsub.f32 %v1155_v13, %v332_v51  ;;  %v433_v58 = vsel %vm227_vm0, %v393_v54, 0.0  ;;  %v436_v63 = vsel %vm227_vm0, %v394_v8, 0.0 }
  0xd0   : > { %431 = vadd.xlane.f32.xlu1 %v430_v47  ;;  %434 = vadd.xlane.f32.xlu0 %v433_v58  ;;  %v254_v59 = vpop.xlane.xlu0 %253  ;;  %v257_v62 = vpop.xlane.xlu1 %256 }
  0xd1   : > { %v333_v3 = vmul.f32 0.03125, %v254_v59  ;;  %v334_v4 = vmul.f32 0.03125, %v257_v62  ;;  %v395_v6 = vmul.f32 %v1316_v55, %v1316_v55  ;;  %v396_v12 = vmul.f32 %v1319_v9, %v1319_v9 }
  0xd3   : > { %v1328_v7 = vsub.f32 %v1162_v16, %v333_v3  ;;  %v1331_v13 = vsub.f32 %v1165_v17, %v334_v4  ;;  %v439_v14 = vsel %vm227_vm0, %v395_v6, 0.0  ;;  %v442_v19 = vsel %vm227_vm0, %v396_v12, 0.0 }
  0xd4   : > { %437 = vadd.xlane.f32.xlu1 %v436_v63  ;;  %440 = vadd.xlane.f32.xlu0 %v439_v14  ;;  %v260_v15 = vpop.xlane.xlu0 %259  ;;  %v263_v18 = vpop.xlane.xlu1 %262 }
  0xd5   : > { %v335_v22 = vmul.f32 0.03125, %v260_v15  ;;  %v336_v23 = vmul.f32 0.03125, %v263_v18  ;;  %v397_v0 = vmul.f32 %v1328_v7, %v1328_v7  ;;  %v398_v16 = vmul.f32 %v1331_v13, %v1331_v13 }
  0xd7   : > { %v1340_v1 = vsub.f32 %v1172_v20, %v335_v22  ;;  %v1343_v17 = vsub.f32 %v1175_v21, %v336_v23  ;;  %v445_v30 = vsel %vm227_vm0, %v397_v0, 0.0  ;;  %v448_v35 = vsel %vm227_vm0, %v398_v16, 0.0 }
  0xd8   : > { %443 = vadd.xlane.f32.xlu1 %v442_v19  ;;  %446 = vadd.xlane.f32.xlu0 %v445_v30  ;;  %v266_v31 = vpop.xlane.xlu0 %265  ;;  %v269_v34 = vpop.xlane.xlu1 %268 }
  0xd9   : > { %v337_v38 = vmul.f32 0.03125, %v266_v31  ;;  %v338_v39 = vmul.f32 0.03125, %v269_v34  ;;  %v399_v42 = vmul.f32 %v1340_v1, %v1340_v1  ;;  %v400_v20 = vmul.f32 %v1343_v17, %v1343_v17 }
  0xdb   : > { %v1352_v43 = vsub.f32 %v1182_v24, %v337_v38  ;;  %v1355_v21 = vsub.f32 %v1185_v25, %v338_v39  ;;  %v451_v46 = vsel %vm227_vm0, %v399_v42, 0.0  ;;  %v454_v51 = vsel %vm227_vm0, %v400_v20, 0.0 }
  0xdc   : > { %449 = vadd.xlane.f32.xlu1 %v448_v35  ;;  %452 = vadd.xlane.f32.xlu0 %v451_v46  ;;  %v272_v47 = vpop.xlane.xlu0 %271  ;;  %v275_v50 = vpop.xlane.xlu1 %274 }
  0xdd   : > { %v339_v54 = vmul.f32 0.03125, %v272_v47  ;;  %v340_v8 = vmul.f32 0.03125, %v275_v50  ;;  %v401_v58 = vmul.f32 %v1352_v43, %v1352_v43  ;;  %v402_v24 = vmul.f32 %v1355_v21, %v1355_v21 }
  0xdf   : > { %v1364_v59 = vsub.f32 %v1192_v28, %v339_v54  ;;  %v1367_v25 = vsub.f32 %v1195_v29, %v340_v8  ;;  %v457_v62 = vsel %vm227_vm0, %v401_v58, 0.0  ;;  %v460_v4 = vsel %vm227_vm0, %v402_v24, 0.0 }
  0xe0   : > { %455 = vadd.xlane.f32.xlu1 %v454_v51  ;;  %458 = vadd.xlane.f32.xlu0 %v457_v62  ;;  %v278_v63 = vpop.xlane.xlu0 %277  ;;  %v281_v3 = vpop.xlane.xlu1 %280 }
  0xe1   : > { %v341_v6 = vmul.f32 0.03125, %v278_v63  ;;  %v342_v12 = vmul.f32 0.03125, %v281_v3  ;;  %v403_v14 = vmul.f32 %v1364_v59, %v1364_v59  ;;  %v404_v28 = vmul.f32 %v1367_v25, %v1367_v25 }
  0xe3   : > { %v1376_v15 = vsub.f32 %v1202_v32, %v341_v6  ;;  %v1379_v29 = vsub.f32 %v1205_v33, %v342_v12  ;;  %v463_v18 = vsel %vm227_vm0, %v403_v14, 0.0  ;;  %v466_v23 = vsel %vm227_vm0, %v404_v28, 0.0 }
  0xe4   : > { %461 = vadd.xlane.f32.xlu1 %v460_v4  ;;  %464 = vadd.xlane.f32.xlu0 %v463_v18  ;;  %v284_v19 = vpop.xlane.xlu0 %283  ;;  %v287_v22 = vpop.xlane.xlu1 %286 }
  0xe5   : > { %v343_v0 = vmul.f32 0.03125, %v284_v19  ;;  %v344_v16 = vmul.f32 0.03125, %v287_v22  ;;  %v405_v30 = vmul.f32 %v1376_v15, %v1376_v15  ;;  %v406_v32 = vmul.f32 %v1379_v29, %v1379_v29 }
  0xe7   : > { %v1388_v31 = vsub.f32 %v1212_v36, %v343_v0  ;;  %v1391_v33 = vsub.f32 %v1215_v37, %v344_v16  ;;  %v469_v34 = vsel %vm227_vm0, %v405_v30, 0.0  ;;  %v472_v39 = vsel %vm227_vm0, %v406_v32, 0.0 }
  0xe8   : > { %467 = vadd.xlane.f32.xlu1 %v466_v23  ;;  %470 = vadd.xlane.f32.xlu0 %v469_v34  ;;  %v290_v35 = vpop.xlane.xlu0 %289  ;;  %v293_v38 = vpop.xlane.xlu1 %292 }
  0xe9   : > { %v345_v42 = vmul.f32 0.03125, %v290_v35  ;;  %v346_v20 = vmul.f32 0.03125, %v293_v38  ;;  %v407_v46 = vmul.f32 %v1388_v31, %v1388_v31  ;;  %v408_v36 = vmul.f32 %v1391_v33, %v1391_v33 }
  0xeb   : > { %v1400_v47 = vsub.f32 %v1222_v40, %v345_v42  ;;  %v1403_v37 = vsub.f32 %v1225_v41, %v346_v20  ;;  %v475_v50 = vsel %vm227_vm0, %v407_v46, 0.0  ;;  %v478_v8 = vsel %vm227_vm0, %v408_v36, 0.0 }
  0xec   : > { %473 = vadd.xlane.f32.xlu1 %v472_v39  ;;  %476 = vadd.xlane.f32.xlu0 %v475_v50  ;;  %v296_v51 = vpop.xlane.xlu0 %295  ;;  %v299_v54 = vpop.xlane.xlu1 %298 }
  0xed   : > { %v347_v58 = vmul.f32 0.03125, %v296_v51  ;;  %v348_v24 = vmul.f32 0.03125, %v299_v54  ;;  %v409_v62 = vmul.f32 %v1400_v47, %v1400_v47  ;;  %v410_v40 = vmul.f32 %v1403_v37, %v1403_v37 }
  0xef   : > { %v1412_v63 = vsub.f32 %v1232_v44, %v347_v58  ;;  %v1415_v41 = vsub.f32 %v1235_v45, %v348_v24  ;;  %v481_v3 = vsel %vm227_vm0, %v409_v62, 0.0  ;;  %v484_v12 = vsel %vm227_vm0, %v410_v40, 0.0 }
  0xf0   : > { %479 = vadd.xlane.f32.xlu1 %v478_v8  ;;  %482 = vadd.xlane.f32.xlu0 %v481_v3  ;;  %v302_v4 = vpop.xlane.xlu0 %301  ;;  %v305_v6 = vpop.xlane.xlu1 %304 }
  0xf1   : > { %v349_v14 = vmul.f32 0.03125, %v302_v4  ;;  %v350_v28 = vmul.f32 0.03125, %v305_v6  ;;  %v411_v18 = vmul.f32 %v1412_v63, %v1412_v63  ;;  %v412_v44 = vmul.f32 %v1415_v41, %v1415_v41 }
  0xf3   : > { %v1424_v19 = vsub.f32 %v1242_v48, %v349_v14  ;;  %v1427_v45 = vsub.f32 %v1245_v49, %v350_v28  ;;  %v487_v22 = vsel %vm227_vm0, %v411_v18, 0.0  ;;  %v490_v16 = vsel %vm227_vm0, %v412_v44, 0.0 }
  0xf4   : > { %485 = vadd.xlane.f32.xlu1 %v484_v12  ;;  %488 = vadd.xlane.f32.xlu0 %v487_v22  ;;  %v308_v23 = vpop.xlane.xlu0 %307  ;;  %v311_v0 = vpop.xlane.xlu1 %310 }
  0xf5   : > { %v351_v30 = vmul.f32 0.03125, %v308_v23  ;;  %v352_v32 = vmul.f32 0.03125, %v311_v0  ;;  %v413_v34 = vmul.f32 %v1424_v19, %v1424_v19  ;;  %v414_v48 = vmul.f32 %v1427_v45, %v1427_v45 }
  0xf7   : > { %v1436_v35 = vsub.f32 %v1252_v52, %v351_v30  ;;  %v1439_v49 = vsub.f32 %v1255_v53, %v352_v32  ;;  %v493_v38 = vsel %vm227_vm0, %v413_v34, 0.0  ;;  %v496_v20 = vsel %vm227_vm0, %v414_v48, 0.0 }
  0xf8   : > { %491 = vadd.xlane.f32.xlu1 %v490_v16  ;;  %494 = vadd.xlane.f32.xlu0 %v493_v38  ;;  %v314_v39 = vpop.xlane.xlu0 %313  ;;  %v317_v42 = vpop.xlane.xlu1 %316 }
  0xf9   : > { %v353_v46 = vmul.f32 0.03125, %v314_v39  ;;  %v354_v36 = vmul.f32 0.03125, %v317_v42  ;;  %v415_v50 = vmul.f32 %v1436_v35, %v1436_v35  ;;  %v416_v52 = vmul.f32 %v1439_v49, %v1439_v49 }
  0xfb   : > { %v1448_v51 = vsub.f32 %v1262_v56, %v353_v46  ;;  %v1451_v53 = vsub.f32 %v1265_v57, %v354_v36  ;;  %v499_v54 = vsel %vm227_vm0, %v415_v50, 0.0  ;;  %v502_v24 = vsel %vm227_vm0, %v416_v52, 0.0 }
  0xfc   : > { %497 = vadd.xlane.f32.xlu1 %v496_v20  ;;  %500 = vadd.xlane.f32.xlu0 %v499_v54  ;;  %v320_v8 = vpop.xlane.xlu0 %319  ;;  %v323_v58 = vpop.xlane.xlu1 %322 }
  0xfd   : > { %v355_v62 = vmul.f32 0.03125, %v320_v8  ;;  %v356_v40 = vmul.f32 0.03125, %v323_v58  ;;  %v417_v3 = vmul.f32 %v1448_v51, %v1448_v51  ;;  %v418_v56 = vmul.f32 %v1451_v53, %v1451_v53  ;;  %v1478_v58 = vld [vmem:[%s1664_s1] ss:$0 sm:$0xff] }
  0xff   : > { %v1460_v4 = vsub.f32 %v1272_v60, %v355_v62  ;;  %v1463_v57 = vsub.f32 %v1275_v61, %v356_v40  ;;  %v505_v6 = vsel %vm227_vm0, %v417_v3, 0.0  ;;  %v508_v12 = vsel %vm227_vm0, %v418_v56, 0.0 }
 0x100   : > { %503 = vadd.xlane.f32.xlu1 %v502_v24  ;;  %506 = vadd.xlane.f32.xlu0 %v505_v6  ;;  %v1484_v6 = vld [vmem:[%s1665_s2] ss:$0 sm:$0xff] }
 0x101   : > { %v419_v14 = vmul.f32 %v1460_v4, %v1460_v4  ;;  %v420_v28 = vmul.f32 %v1463_v57, %v1463_v57 }
 0x103   : > { %v511_v18 = vsel %vm227_vm0, %v419_v14, 0.0  ;;  %v514_v60 = vsel %vm227_vm0, %v420_v28, 0.0 }
 0x104   : > { %509 = vadd.xlane.f32.xlu1 %v508_v12  ;;  %512 = vadd.xlane.f32.xlu0 %v511_v18 }
 0x108   : > { %515 = vadd.xlane.f32.xlu1 %v514_v60 }
 0x155   : > { %v423_v61 = vpop.xlane.xlu0 %422 }
 0x156   : > { %v517_v44 = vmul.f32 0.03125, %v423_v61 }
 0x158   : > { %v549_v22 = vadd.f32 1e-05, %v517_v44 }
 0x159   : > { %v426_v23 = vpop.xlane.xlu1 %425  ;;  %v429_v0 = vpop.xlane.xlu0 %428 }
 0x15a   : > { %877 = vrsqrt.f32 %v549_v22  ;;  %v518_v16 = vmul.f32 0.03125, %v426_v23  ;;  %v519_v30 = vmul.f32 0.03125, %v429_v0 }
 0x15c   : > { %v550_v32 = vadd.f32 1e-05, %v518_v16  ;;  %v551_v34 = vadd.f32 1e-05, %v519_v30 }
 0x15d   : > { %v432_v48 = vpop.xlane.xlu1 %431  ;;  %v435_v38 = vpop.xlane.xlu0 %434 }
 0x15e   : > { %879 = vrsqrt.f32 %v550_v32  ;;  %v520_v39 = vmul.f32 0.03125, %v432_v48  ;;  %v521_v42 = vmul.f32 0.03125, %v435_v38 }
 0x15f   : > { %881 = vrsqrt.f32 %v551_v34 }
 0x160   : > { %v552_v20 = vadd.f32 1e-05, %v520_v39  ;;  %v553_v46 = vadd.f32 1e-05, %v521_v42 }
 0x161   : > { %v438_v36 = vpop.xlane.xlu1 %437  ;;  %v441_v50 = vpop.xlane.xlu0 %440 }
 0x162   : > { %883 = vrsqrt.f32 %v552_v20  ;;  %v522_v52 = vmul.f32 0.03125, %v438_v36  ;;  %v523_v54 = vmul.f32 0.03125, %v441_v50 }
 0x163   : > { %885 = vrsqrt.f32 %v553_v46 }
 0x164   : > { %v878_v8 = vpop.eup %877  ;;  %v554_v24 = vadd.f32 1e-05, %v522_v52  ;;  %v555_v62 = vadd.f32 1e-05, %v523_v54 }
 0x165   : > { %v613_v40 = vmul.f32 %v878_v8, %v1282_v10  ;;  %v444_v3 = vpop.xlane.xlu1 %443  ;;  %v447_v56 = vpop.xlane.xlu0 %446 }
 0x166   : > { %887 = vrsqrt.f32 %v554_v24  ;;  %v524_v12 = vmul.f32 0.03125, %v444_v3  ;;  %v525_v14 = vmul.f32 0.03125, %v447_v56 }
 0x167   : > { %v651_v28 = vmul.f32 %v1478_v58, %v613_v40  ;;  %889 = vrsqrt.f32 %v555_v62 }
 0x168   : > { %v880_v18 = vpop.eup %879  ;;  %v556_v10 = vadd.f32 1e-05, %v524_v12  ;;  %v557_v60 = vadd.f32 1e-05, %v525_v14 }
 0x169   : > { %v882_v61 = vpop.eup %881  ;;  %v689_v44 = vadd.f32 %v1484_v6, %v651_v28  ;;  %v614_v22 = vmul.f32 %v880_v18, %v1292_v26  ;;  %v450_v23 = vpop.xlane.xlu1 %449 }
 0x16a   : > { %v453_v0 = vpop.xlane.xlu0 %452  ;;  %v615_v16 = vmul.f32 %v882_v61, %v1285_v11  ;;  %891 = vrsqrt.f32 %v556_v10  ;;  %v526_v30 = vmul.f32 0.03125, %v450_v23 }
 0x16b   : > { %v527_v32 = vmul.f32 0.03125, %v453_v0  ;;  %721 = vst.msk [vmem:[%s1490_s6] sm:$0xff] %vm227_vm0, %v689_v44  ;;  %v652_v34 = vmul.f32 %v1478_v58, %v614_v22  ;;  %893 = vrsqrt.f32 %v557_v60 }
 0x16c   : > { %v884_v48 = vpop.eup %883  ;;  %v653_v38 = vmul.f32 %v1478_v58, %v615_v16  ;;  %v558_v39 = vadd.f32 1e-05, %v526_v30 }
 0x16d   : > { %v559_v42 = vadd.f32 1e-05, %v527_v32  ;;  %v886_v26 = vpop.eup %885  ;;  %v690_v20 = vadd.f32 %v1484_v6, %v652_v34  ;;  %v616_v11 = vmul.f32 %v884_v48, %v1295_v27  ;;  %v456_v46 = vpop.xlane.xlu1 %455 }
 0x16e   : > { %v459_v36 = vpop.xlane.xlu0 %458  ;;  %v691_v50 = vadd.f32 %v1484_v6, %v653_v38  ;;  %v617_v52 = vmul.f32 %v886_v26, %v1304_v2  ;;  %895 = vrsqrt.f32 %v558_v39  ;;  %v528_v54 = vmul.f32 0.03125, %v456_v46 }
 0x16f   : > { %722 = vst.msk [vmem:[%s1490_s6 + $0x8] sm:$0xff] %vm227_vm0, %v690_v20  ;;  %v654_v8 = vmul.f32 %v1478_v58, %v616_v11  ;;  %897 = vrsqrt.f32 %v559_v42  ;;  %v529_v24 = vmul.f32 0.03125, %v459_v36 }
 0x170   : > { %v888_v62 = vpop.eup %887  ;;  %723 = vst.msk [vmem:[%s1490_s6 + $0x10] sm:$0xff] %vm227_vm0, %v691_v50  ;;  %v655_v27 = vmul.f32 %v1478_v58, %v617_v52  ;;  %v560_v40 = vadd.f32 1e-05, %v528_v54 }
 0x171   : > { %v890_v3 = vpop.eup %889  ;;  %v692_v56 = vadd.f32 %v1484_v6, %v654_v8  ;;  %v618_v2 = vmul.f32 %v888_v62, %v1307_v5  ;;  %v561_v12 = vadd.f32 1e-05, %v529_v24  ;;  %v462_v14 = vpop.xlane.xlu1 %461 }
 0x172   : > { %v465_v28 = vpop.xlane.xlu0 %464  ;;  %v693_v18 = vadd.f32 %v1484_v6, %v655_v27  ;;  %v619_v10 = vmul.f32 %v890_v3, %v1316_v55  ;;  %899 = vrsqrt.f32 %v560_v40  ;;  %v530_v60 = vmul.f32 0.03125, %v462_v14 }
 0x173   : > { %724 = vst.msk [vmem:[%s1490_s6 + $0x18] sm:$0xff] %vm227_vm0, %v692_v56  ;;  %v656_v61 = vmul.f32 %v1478_v58, %v618_v2  ;;  %901 = vrsqrt.f32 %v561_v12  ;;  %v531_v44 = vmul.f32 0.03125, %v465_v28 }
 0x174   : > { %v892_v22 = vpop.eup %891  ;;  %725 = vst.msk [vmem:[%s1490_s6 + $0x20] sm:$0xff] %vm227_vm0, %v693_v18  ;;  %v657_v5 = vmul.f32 %v1478_v58, %v619_v10  ;;  %v562_v23 = vadd.f32 1e-05, %v530_v60 }
 0x175   : > { %v894_v0 = vpop.eup %893  ;;  %v694_v16 = vadd.f32 %v1484_v6, %v656_v61  ;;  %v620_v55 = vmul.f32 %v892_v22, %v1319_v9  ;;  %v563_v30 = vadd.f32 1e-05, %v531_v44  ;;  %v468_v32 = vpop.xlane.xlu1 %467 }
 0x176   : > { %v471_v34 = vpop.xlane.xlu0 %470  ;;  %v695_v48 = vadd.f32 %v1484_v6, %v657_v5  ;;  %v621_v38 = vmul.f32 %v894_v0, %v1328_v7  ;;  %903 = vrsqrt.f32 %v562_v23  ;;  %v532_v39 = vmul.f32 0.03125, %v468_v32 }
 0x177   : > { %726 = vst.msk [vmem:[%s1490_s6 + $0x28] sm:$0xff] %vm227_vm0, %v694_v16  ;;  %v658_v42 = vmul.f32 %v1478_v58, %v620_v55  ;;  %905 = vrsqrt.f32 %v563_v30  ;;  %v533_v26 = vmul.f32 0.03125, %v471_v34 }
 0x178   : > { %v896_v20 = vpop.eup %895  ;;  %727 = vst.msk [vmem:[%s1490_s6 + $0x30] sm:$0xff] %vm227_vm0, %v695_v48  ;;  %v659_v9 = vmul.f32 %v1478_v58, %v621_v38  ;;  %v564_v11 = vadd.f32 1e-05, %v532_v39 }
 0x179   : > { %v898_v46 = vpop.eup %897  ;;  %v696_v36 = vadd.f32 %v1484_v6, %v658_v42  ;;  %v622_v7 = vmul.f32 %v896_v20, %v1331_v13  ;;  %v565_v50 = vadd.f32 1e-05, %v533_v26  ;;  %v474_v52 = vpop.xlane.xlu1 %473 }
 0x17a   : > { %v477_v54 = vpop.xlane.xlu0 %476  ;;  %v697_v8 = vadd.f32 %v1484_v6, %v659_v9  ;;  %v623_v24 = vmul.f32 %v898_v46, %v1340_v1  ;;  %907 = vrsqrt.f32 %v564_v11  ;;  %v534_v62 = vmul.f32 0.03125, %v474_v52 }
 0x17b   : > { %728 = vst.msk [vmem:[%s1490_s6 + $0x38] sm:$0xff] %vm227_vm0, %v696_v36  ;;  %v660_v27 = vmul.f32 %v1478_v58, %v622_v7  ;;  %909 = vrsqrt.f32 %v565_v50  ;;  %v535_v40 = vmul.f32 0.03125, %v477_v54 }
 0x17c   : > { %v900_v3 = vpop.eup %899  ;;  %729 = vst.msk [vmem:[%s1490_s6 + $0x40] sm:$0xff] %vm227_vm0, %v697_v8  ;;  %v661_v13 = vmul.f32 %v1478_v58, %v623_v24  ;;  %v566_v56 = vadd.f32 1e-05, %v534_v62 }
 0x17d   : > { %v902_v2 = vpop.eup %901  ;;  %v698_v12 = vadd.f32 %v1484_v6, %v660_v27  ;;  %v624_v1 = vmul.f32 %v900_v3, %v1343_v17  ;;  %v567_v14 = vadd.f32 1e-05, %v535_v40  ;;  %v480_v28 = vpop.xlane.xlu1 %479 }
 0x17e   : > { %v483_v18 = vpop.xlane.xlu0 %482  ;;  %v699_v10 = vadd.f32 %v1484_v6, %v661_v13  ;;  %v625_v60 = vmul.f32 %v902_v2, %v1352_v43  ;;  %911 = vrsqrt.f32 %v566_v56  ;;  %v536_v61 = vmul.f32 0.03125, %v480_v28 }
 0x17f   : > { %730 = vst.msk [vmem:[%s1490_s6 + $0x48] sm:$0xff] %vm227_vm0, %v698_v12  ;;  %v662_v44 = vmul.f32 %v1478_v58, %v624_v1  ;;  %913 = vrsqrt.f32 %v567_v14  ;;  %v537_v22 = vmul.f32 0.03125, %v483_v18 }
 0x180   : > { %v904_v5 = vpop.eup %903  ;;  %731 = vst.msk [vmem:[%s1490_s6 + $0x50] sm:$0xff] %vm227_vm0, %v699_v10  ;;  %v663_v17 = vmul.f32 %v1478_v58, %v625_v60  ;;  %v568_v23 = vadd.f32 1e-05, %v536_v61 }
 0x181   : > { %v906_v0 = vpop.eup %905  ;;  %v700_v16 = vadd.f32 %v1484_v6, %v662_v44  ;;  %v626_v43 = vmul.f32 %v904_v5, %v1355_v21  ;;  %v569_v55 = vadd.f32 1e-05, %v537_v22  ;;  %v486_v30 = vpop.xlane.xlu1 %485 }
 0x182   : > { %v489_v32 = vpop.xlane.xlu0 %488  ;;  %v701_v34 = vadd.f32 %v1484_v6, %v663_v17  ;;  %v627_v48 = vmul.f32 %v906_v0, %v1364_v59  ;;  %915 = vrsqrt.f32 %v568_v23  ;;  %v538_v38 = vmul.f32 0.03125, %v486_v30 }
 0x183   : > { %732 = vst.msk [vmem:[%s1490_s6 + $0x58] sm:$0xff] %vm227_vm0, %v700_v16  ;;  %v664_v39 = vmul.f32 %v1478_v58, %v626_v43  ;;  %917 = vrsqrt.f32 %v569_v55  ;;  %v539_v42 = vmul.f32 0.03125, %v489_v32 }
 0x184   : > { %v908_v26 = vpop.eup %907  ;;  %733 = vst.msk [vmem:[%s1490_s6 + $0x60] sm:$0xff] %vm227_vm0, %v701_v34  ;;  %v665_v21 = vmul.f32 %v1478_v58, %v627_v48  ;;  %v570_v20 = vadd.f32 1e-05, %v538_v38 }
 0x185   : > { %v910_v9 = vpop.eup %909  ;;  %v702_v11 = vadd.f32 %v1484_v6, %v664_v39  ;;  %v628_v59 = vmul.f32 %v908_v26, %v1367_v25  ;;  %v571_v46 = vadd.f32 1e-05, %v539_v42  ;;  %v492_v36 = vpop.xlane.xlu1 %491 }
 0x186   : > { %v495_v7 = vpop.xlane.xlu0 %494  ;;  %v703_v50 = vadd.f32 %v1484_v6, %v665_v21  ;;  %v629_v52 = vmul.f32 %v910_v9, %v1376_v15  ;;  %919 = vrsqrt.f32 %v570_v20  ;;  %v540_v54 = vmul.f32 0.03125, %v492_v36 }
 0x187   : > { %734 = vst.msk [vmem:[%s1490_s6 + $0x68] sm:$0xff] %vm227_vm0, %v702_v11  ;;  %v666_v8 = vmul.f32 %v1478_v58, %v628_v59  ;;  %921 = vrsqrt.f32 %v571_v46  ;;  %v541_v24 = vmul.f32 0.03125, %v495_v7 }
 0x188   : > { %v912_v62 = vpop.eup %911  ;;  %735 = vst.msk [vmem:[%s1490_s6 + $0x70] sm:$0xff] %vm227_vm0, %v703_v50  ;;  %v667_v25 = vmul.f32 %v1478_v58, %v629_v52  ;;  %v572_v27 = vadd.f32 1e-05, %v540_v54 }
 0x189   : > { %v914_v40 = vpop.eup %913  ;;  %v704_v3 = vadd.f32 %v1484_v6, %v666_v8  ;;  %v630_v15 = vmul.f32 %v912_v62, %v1379_v29  ;;  %v573_v13 = vadd.f32 1e-05, %v541_v24  ;;  %v498_v56 = vpop.xlane.xlu1 %497 }
 0x18a   : > { %v501_v2 = vpop.xlane.xlu0 %500  ;;  %v705_v12 = vadd.f32 %v1484_v6, %v667_v25  ;;  %v631_v1 = vmul.f32 %v914_v40, %v1388_v31  ;;  %923 = vrsqrt.f32 %v572_v27  ;;  %v542_v14 = vmul.f32 0.03125, %v498_v56 }
 0x18b   : > { %736 = vst.msk [vmem:[%s1490_s6 + $0x78] sm:$0xff] %vm227_vm0, %v704_v3  ;;  %v668_v28 = vmul.f32 %v1478_v58, %v630_v15  ;;  %925 = vrsqrt.f32 %v573_v13  ;;  %v543_v18 = vmul.f32 0.03125, %v501_v2 }
 0x18c   : > { %v916_v10 = vpop.eup %915  ;;  %737 = vst.msk [vmem:[%s1490_s6 + $0x80] sm:$0xff] %vm227_vm0, %v705_v12  ;;  %v669_v29 = vmul.f32 %v1478_v58, %v631_v1  ;;  %v574_v60 = vadd.f32 1e-05, %v542_v14 }
 0x18d   : > { %v918_v61 = vpop.eup %917  ;;  %v706_v44 = vadd.f32 %v1484_v6, %v668_v28  ;;  %v632_v31 = vmul.f32 %v916_v10, %v1391_v33  ;;  %v575_v22 = vadd.f32 1e-05, %v543_v18  ;;  %v504_v5 = vpop.xlane.xlu1 %503 }
 0x18e   : > { %v507_v17 = vpop.xlane.xlu0 %506  ;;  %v707_v23 = vadd.f32 %v1484_v6, %v669_v29  ;;  %v633_v0 = vmul.f32 %v918_v61, %v1400_v47  ;;  %927 = vrsqrt.f32 %v574_v60  ;;  %v544_v16 = vmul.f32 0.03125, %v504_v5 }
 0x18f   : > { %738 = vst.msk [vmem:[%s1490_s6 + $0x88] sm:$0xff] %vm227_vm0, %v706_v44  ;;  %v670_v43 = vmul.f32 %v1478_v58, %v632_v31  ;;  %929 = vrsqrt.f32 %v575_v22  ;;  %v545_v55 = vmul.f32 0.03125, %v507_v17 }
 0x190   : > { %v920_v30 = vpop.eup %919  ;;  %739 = vst.msk [vmem:[%s1490_s6 + $0x90] sm:$0xff] %vm227_vm0, %v707_v23  ;;  %v671_v33 = vmul.f32 %v1478_v58, %v633_v0  ;;  %v576_v32 = vadd.f32 1e-05, %v544_v16 }
 0x191   : > { %v922_v34 = vpop.eup %921  ;;  %v708_v48 = vadd.f32 %v1484_v6, %v670_v43  ;;  %v634_v47 = vmul.f32 %v920_v30, %v1403_v37  ;;  %v577_v38 = vadd.f32 1e-05, %v545_v55  ;;  %v510_v39 = vpop.xlane.xlu1 %509 }
 0x192   : > { %v513_v42 = vpop.xlane.xlu0 %512  ;;  %v709_v26 = vadd.f32 %v1484_v6, %v671_v33  ;;  %v635_v21 = vmul.f32 %v922_v34, %v1412_v63  ;;  %931 = vrsqrt.f32 %v576_v32  ;;  %v546_v20 = vmul.f32 0.03125, %v510_v39 }
 0x193   : > { %740 = vst.msk [vmem:[%s1490_s6 + $0x98] sm:$0xff] %vm227_vm0, %v708_v48  ;;  %v672_v9 = vmul.f32 %v1478_v58, %v634_v47  ;;  %933 = vrsqrt.f32 %v577_v38  ;;  %v547_v11 = vmul.f32 0.03125, %v513_v42 }
 0x194   : > { %v924_v59 = vpop.eup %923  ;;  %741 = vst.msk [vmem:[%s1490_s6 + $0xa0] sm:$0xff] %vm227_vm0, %v709_v26  ;;  %v673_v37 = vmul.f32 %v1478_v58, %v635_v21  ;;  %v578_v46 = vadd.f32 1e-05, %v546_v20 }
 0x195   : > { %v926_v36 = vpop.eup %925  ;;  %v710_v7 = vadd.f32 %v1484_v6, %v672_v9  ;;  %v636_v63 = vmul.f32 %v924_v59, %v1415_v41  ;;  %v579_v50 = vadd.f32 1e-05, %v547_v11  ;;  %v516_v52 = vpop.xlane.xlu1 %515 }
 0x196   : > { %v711_v54 = vadd.f32 %v1484_v6, %v673_v37  ;;  %v637_v8 = vmul.f32 %v926_v36, %v1424_v19  ;;  %935 = vrsqrt.f32 %v578_v46  ;;  %v548_v24 = vmul.f32 0.03125, %v516_v52 }
 0x197   : > { %742 = vst.msk [vmem:[%s1490_s6 + $0xa8] sm:$0xff] %vm227_vm0, %v710_v7  ;;  %v674_v62 = vmul.f32 %v1478_v58, %v636_v63  ;;  %937 = vrsqrt.f32 %v579_v50 }
 0x198   : > { %v928_v25 = vpop.eup %927  ;;  %743 = vst.msk [vmem:[%s1490_s6 + $0xb0] sm:$0xff] %vm227_vm0, %v711_v54  ;;  %v675_v41 = vmul.f32 %v1478_v58, %v637_v8  ;;  %v580_v27 = vadd.f32 1e-05, %v548_v24 }
 0x199   : > { %v930_v40 = vpop.eup %929  ;;  %v712_v3 = vadd.f32 %v1484_v6, %v674_v62  ;;  %v638_v19 = vmul.f32 %v928_v25, %v1427_v45 }
 0x19a   : > { %v713_v15 = vadd.f32 %v1484_v6, %v675_v41  ;;  %v639_v13 = vmul.f32 %v930_v40, %v1436_v35  ;;  %939 = vrsqrt.f32 %v580_v27 }
 0x19b   : > { %744 = vst.msk [vmem:[%s1490_s6 + $0xb8] sm:$0xff] %vm227_vm0, %v712_v3  ;;  %v676_v56 = vmul.f32 %v1478_v58, %v638_v19 }
 0x19c   : > { %v932_v2 = vpop.eup %931  ;;  %745 = vst.msk [vmem:[%s1490_s6 + $0xc0] sm:$0xff] %vm227_vm0, %v713_v15  ;;  %v677_v12 = vmul.f32 %v1478_v58, %v639_v13 }
 0x19d   : > { %v934_v1 = vpop.eup %933  ;;  %v714_v14 = vadd.f32 %v1484_v6, %v676_v56  ;;  %v640_v45 = vmul.f32 %v932_v2, %v1439_v49 }
 0x19e   : > { %v715_v28 = vadd.f32 %v1484_v6, %v677_v12  ;;  %v641_v35 = vmul.f32 %v934_v1, %v1448_v51 }
 0x19f   : > { %746 = vst.msk [vmem:[%s1490_s6 + $0xc8] sm:$0xff] %vm227_vm0, %v714_v14  ;;  %v678_v18 = vmul.f32 %v1478_v58, %v640_v45 }
 0x1a0   : > { %v936_v10 = vpop.eup %935  ;;  %747 = vst.msk [vmem:[%s1490_s6 + $0xd0] sm:$0xff] %vm227_vm0, %v715_v28  ;;  %v679_v29 = vmul.f32 %v1478_v58, %v641_v35 }
 0x1a1   : > { %v938_v60 = vpop.eup %937  ;;  %v716_v61 = vadd.f32 %v1484_v6, %v678_v18  ;;  %v642_v49 = vmul.f32 %v936_v10, %v1451_v53 }
 0x1a2   : > { %v717_v44 = vadd.f32 %v1484_v6, %v679_v29  ;;  %v643_v51 = vmul.f32 %v938_v60, %v1460_v4 }
 0x1a3   : > { %748 = vst.msk [vmem:[%s1490_s6 + $0xd8] sm:$0xff] %vm227_vm0, %v716_v61  ;;  %v680_v31 = vmul.f32 %v1478_v58, %v642_v49 }
 0x1a4   : > { %v940_v22 = vpop.eup %939  ;;  %749 = vst.msk [vmem:[%s1490_s6 + $0xe0] sm:$0xff] %vm227_vm0, %v717_v44  ;;  %v681_v5 = vmul.f32 %v1478_v58, %v643_v51 }
 0x1a5   : > { %v718_v17 = vadd.f32 %v1484_v6, %v680_v31  ;;  %v644_v23 = vmul.f32 %v940_v22, %v1463_v57 }
 0x1a6   : > { %v719_v0 = vadd.f32 %v1484_v6, %v681_v5 }
 0x1a7   : > { %750 = vst.msk [vmem:[%s1490_s6 + $0xe8] sm:$0xff] %vm227_vm0, %v718_v17  ;;  %v682_v53 = vmul.f32 %v1478_v58, %v644_v23 }
 0x1a8   : > { %751 = vst.msk [vmem:[%s1490_s6 + $0xf0] sm:$0xff] %vm227_vm0, %v719_v0 }
 0x1a9   : > { %v720_v4 = vadd.f32 %v1484_v6, %v682_v53 }
 0x1ab   : > { %752 = vst.msk [vmem:[%s1490_s6 + $0xf8] sm:$0xff] %vm227_vm0, %v720_v4 }
 0x1ac PF: > { %p13_p8 = scmp.ge.s32.totalorder %s1050_s17, 4   ;;  %s1670_s12 = smov %s997_s13 }
 0x1ad   : > { %s1671_s13 = smov %s1001_s14  ;;  %s1672_s14 = smov %s1060_s20 }
 0x1ae   : > { %s1673_s15 = smov %s1050_s17  ;;  %15 = sbr.rel (!%p13_p8) target bundleno = 3 (0x3), region = 72 }
 0x1b5   :  { %775 = vsyncpa [#allocation3], 1 }
 0x1b6   :  { %777 = vsyncpa [#allocation3 + $0x1], 1 }

// kernel: squeeze.12
= control target key start
LH: loop header
LB: loop body
LE: loop exit
PB: predicated region body
PF: predicated region fallthrough
CT: control target
= control target key end

     0   :  { %s67_s10 = smov 28   ;;  %s68_s11 = smov 20   ;;  %vm3_vm0 = vcmask 31744   ;;  %vm9_vm1 = vcmask 261344   ;;  %vm15_vm2 = vcmask 228544   ;;  %vm21_vm3 = vcmask 195744   ;;  %s111_s0 = inlined_call_operand.vmem [shape: f32[1,8,4], index: 0, kind: input, shape index: {}]   ;;  %s112_s1 = inlined_call_operand.vmem [shape: f32[1,32], index: 1, kind: output, shape index: {}]  }
   0x1   :  { %v53_v0 = vld [vmem:[%s111_s0 + $0x7] sm:$0x1]   ;;  %v55_v1 = vld [vmem:[%s111_s0 + $0x5] sm:$0x1]   ;;  %v54_v2 = vld [vmem:[%s111_s0 + $0x6] sm:$0x1]  }
   0x2   :  { %7 = vrot.lane.b32.xlu0 %v53_v0, %s67_s10  ;;  %19 = vrot.lane.b32.xlu1 %v55_v1, %s68_s11  ;;  %v56_v3 = vld [vmem:[%s111_s0 + $0x4] sm:$0x1]   ;;  %v2_v4 = vld [vmem:[%s111_s0] sm:$0x1]   ;;  %s69_s18 = smov 24   ;;  %s70_s19 = smov 16  }
   0x3   :  { %4 = vst.msk [vmem:[#allocation0] sm:$0x1] %vm3_vm0, %v2_v4   ;;  %v57_v5 = vld [vmem:[%s111_s0 + $0x3] sm:$0x1]   ;;  %v58_v6 = vld [vmem:[%s111_s0 + $0x2] sm:$0x1]  }
   0x4   :  { %s71_s24 = smov 12   ;;  %s72_s25 = smov 8   ;;  %v59_v7 = vld [vmem:[%s111_s0 + $0x1] sm:$0x1]   ;;  %vm27_vm4 = vcmask 162944   ;;  %vm33_vm5 = vcmask 130144  }
   0x5   :  { %s73_s0 = smov 4   ;;  %vm39_vm6 = vcmask 97344   ;;  %vm45_vm7 = vcmask 64544  }
   0x6   :  { %13 = vrot.lane.b32.xlu0 %v54_v2, %s69_s18  ;;  %25 = vrot.lane.b32.xlu1 %v56_v3, %s70_s19 }
   0xa   :  { %31 = vrot.lane.b32.xlu0 %v57_v5, %s71_s24  ;;  %37 = vrot.lane.b32.xlu1 %v58_v6, %s72_s25 }
   0xe   :  { %43 = vrot.lane.b32.xlu0 %v59_v7, %s73_s0 }
  0x74   :  { %v8_v8 = vpop.permute.xlu0 %7   ;;  %v20_v9 = vpop.permute.xlu1 %19  }
  0x75   :  { %10 = vst.msk [vmem:[#allocation0] sm:$0x1] %vm9_vm1, %v8_v8  }
  0x78   :  { %v14_v10 = vpop.permute.xlu0 %13   ;;  %v26_v11 = vpop.permute.xlu1 %25  }
  0x79   :  { %16 = vst.msk [vmem:[#allocation0] sm:$0x1] %vm15_vm2, %v14_v10  }
  0x7a   :  { %22 = vst.msk [vmem:[#allocation0] sm:$0x1] %vm21_vm3, %v20_v9  }
  0x7b   :  { %28 = vst.msk [vmem:[#allocation0] sm:$0x1] %vm27_vm4, %v26_v11  }
  0x7c   :  { %v32_v12 = vpop.permute.xlu0 %31   ;;  %v38_v13 = vpop.permute.xlu1 %37  }
  0x7d   :  { %34 = vst.msk [vmem:[#allocation0] sm:$0x1] %vm33_vm5, %v32_v12  }
  0x7e   :  { %40 = vst.msk [vmem:[#allocation0] sm:$0x1] %vm39_vm6, %v38_v13  }
  0x80   :  { %v44_v14 = vpop.permute.xlu0 %43  }
  0x81   :  { %46 = vst.msk [vmem:[#allocation0] sm:$0x1] %vm45_vm7, %v44_v14  }
  0x88   :  { %v50_v15 = vld [vmem:[#allocation0] sm:$0x1] }
  0x89   :  { %52 = vst [vmem:[%s112_s1] sm:$0x1] %v50_v15 }

// kernel: reverse.1
= control target key start
LH: loop header
LB: loop body
LE: loop exit
PB: predicated region body
PF: predicated region fallthrough
CT: control target
= control target key end

     0   :  { %s344_s0 = inlined_call_operand.vmem [shape: f32[2,32,16,7], index: 0, kind: input, shape index: {}]   ;;  %s345_s1 = inlined_call_operand.vmem [shape: f32[2,32,16,7], index: 1, kind: output, shape index: {}]  }
   0x1   :  { %v112_v0 = vld [vmem:[%s344_s0 + $0x60] sm:$0xff]  ;;  %v113_v1 = vld [vmem:[%s344_s0 + $0xd0] sm:$0xff]  ;;  %v138_v14 = vld [vmem:[%s344_s0 + $0x68] sm:$0xff] }
   0x2   :  { %v115_v2 = vld [vmem:[%s344_s0 + $0x50] sm:$0xff]  ;;  %4 = vst [vmem:[%s345_s1] sm:$0xff] %v112_v0  ;;  %114 = vst [vmem:[%s345_s1 + $0x70] sm:$0xff] %v113_v1  ;;  %v117_v3 = vld [vmem:[%s344_s0 + $0xc0] sm:$0xff] }
   0x3   :  { %116 = vst [vmem:[%s345_s1 + $0x10] sm:$0xff] %v115_v2  ;;  %v119_v4 = vld [vmem:[%s344_s0 + $0x40] sm:$0xff]  ;;  %v121_v5 = vld [vmem:[%s344_s0 + $0xb0] sm:$0xff]  ;;  %118 = vst [vmem:[%s345_s1 + $0x80] sm:$0xff] %v117_v3 }
   0x4   :  { %120 = vst [vmem:[%s345_s1 + $0x20] sm:$0xff] %v119_v4  ;;  %122 = vst [vmem:[%s345_s1 + $0x90] sm:$0xff] %v121_v5  ;;  %v123_v6 = vld [vmem:[%s344_s0 + $0x30] sm:$0xff]  ;;  %v125_v7 = vld [vmem:[%s344_s0 + $0xa0] sm:$0xff] }
   0x5   :  { %v127_v8 = vld [vmem:[%s344_s0 + $0x20] sm:$0xff]  ;;  %124 = vst [vmem:[%s345_s1 + $0x30] sm:$0xff] %v123_v6  ;;  %126 = vst [vmem:[%s345_s1 + $0xa0] sm:$0xff] %v125_v7  ;;  %v129_v9 = vld [vmem:[%s344_s0 + $0x90] sm:$0xff] }
   0x6   :  { %128 = vst [vmem:[%s345_s1 + $0x40] sm:$0xff] %v127_v8  ;;  %v131_v10 = vld [vmem:[%s344_s0 + $0x10] sm:$0xff]  ;;  %v133_v11 = vld [vmem:[%s344_s0 + $0x80] sm:$0xff]  ;;  %130 = vst [vmem:[%s345_s1 + $0xb0] sm:$0xff] %v129_v9 }
   0x7   :  { %132 = vst [vmem:[%s345_s1 + $0x50] sm:$0xff] %v131_v10  ;;  %134 = vst [vmem:[%s345_s1 + $0xc0] sm:$0xff] %v133_v11  ;;  %v49_v12 = vld [vmem:[%s344_s0] sm:$0xff]  ;;  %v136_v13 = vld [vmem:[%s344_s0 + $0x70] sm:$0xff] }
   0x8   :  { %135 = vst [vmem:[%s345_s1 + $0x60] sm:$0xff] %v49_v12  ;;  %137 = vst [vmem:[%s345_s1 + $0xd0] sm:$0xff] %v136_v13  ;;  %v140_v15 = vld [vmem:[%s344_s0 + $0xd8] sm:$0xff]  ;;  %v144_v17 = vld [vmem:[%s344_s0 + $0xc8] sm:$0xff] }
   0x9   :  { %139 = vst [vmem:[%s345_s1 + $0x8] sm:$0xff] %v138_v14  ;;  %v142_v16 = vld [vmem:[%s344_s0 + $0x58] sm:$0xff]  ;;  %141 = vst [vmem:[%s345_s1 + $0x78] sm:$0xff] %v140_v15  ;;  %v146_v18 = vld [vmem:[%s344_s0 + $0x48] sm:$0xff] }
   0xa   :  { %143 = vst [vmem:[%s345_s1 + $0x18] sm:$0xff] %v142_v16  ;;  %145 = vst [vmem:[%s345_s1 + $0x88] sm:$0xff] %v144_v17  ;;  %v148_v19 = vld [vmem:[%s344_s0 + $0xb8] sm:$0xff]  ;;  %v152_v21 = vld [vmem:[%s344_s0 + $0xa8] sm:$0xff] }
   0xb   :  { %v150_v20 = vld [vmem:[%s344_s0 + $0x38] sm:$0xff]  ;;  %147 = vst [vmem:[%s345_s1 + $0x28] sm:$0xff] %v146_v18  ;;  %149 = vst [vmem:[%s345_s1 + $0x98] sm:$0xff] %v148_v19  ;;  %v154_v22 = vld [vmem:[%s344_s0 + $0x28] sm:$0xff] }
   0xc   :  { %151 = vst [vmem:[%s345_s1 + $0x38] sm:$0xff] %v150_v20  ;;  %v156_v23 = vld [vmem:[%s344_s0 + $0x98] sm:$0xff]  ;;  %153 = vst [vmem:[%s345_s1 + $0xa8] sm:$0xff] %v152_v21  ;;  %v160_v25 = vld [vmem:[%s344_s0 + $0x88] sm:$0xff] }
   0xd   :  { %155 = vst [vmem:[%s345_s1 + $0x48] sm:$0xff] %v154_v22  ;;  %157 = vst [vmem:[%s345_s1 + $0xb8] sm:$0xff] %v156_v23  ;;  %v158_v24 = vld [vmem:[%s344_s0 + $0x18] sm:$0xff]  ;;  %v162_v26 = vld [vmem:[%s344_s0 + $0x8] sm:$0xff] }
   0xe   :  { %159 = vst [vmem:[%s345_s1 + $0x58] sm:$0xff] %v158_v24  ;;  %161 = vst [vmem:[%s345_s1 + $0xc8] sm:$0xff] %v160_v25  ;;  %v164_v27 = vld [vmem:[%s344_s0 + $0x78] sm:$0xff] }
   0xf   :  { %163 = vst [vmem:[%s345_s1 + $0x68] sm:$0xff] %v162_v26  ;;  %165 = vst [vmem:[%s345_s1 + $0xd8] sm:$0xff] %v164_v27 }

// kernel: block_forward.4
= control target key start
LH: loop header
LB: loop body
LE: loop exit
PB: predicated region body
PF: predicated region fallthrough
CT: control target
= control target key end

     0   :  { %s3282_s13 = smov 0   ;;  %s4199_s0 = inlined_call_operand.vmem [shape: f32[288,32], index: 0, kind: input, shape index: {}]   ;;  %s4200_s1 = inlined_call_operand.vmem [shape: f32[288,32], index: 1, kind: input, shape index: {}]   ;;  %s4201_s2 = inlined_call_operand.vmem [shape: f32[32,32], index: 2, kind: input, shape index: {}]   ;;  %s4202_s3 = inlined_call_operand.vmem [shape: f32[32,32], index: 3, kind: input, shape index: {}]   ;;  %s4203_s4 = inlined_call_operand.vmem [shape: f32[1,32], index: 4, kind: input, shape index: {}]   ;;  %s4204_s5 = inlined_call_operand.vmem [shape: f32[1,32], index: 5, kind: input, shape index: {}]   ;;  %s4205_s6 = inlined_call_operand.vmem [shape: f32[32,32], index: 6, kind: input, shape index: {}]   ;;  %s4206_s7 = inlined_call_operand.vmem [shape: f32[32,32], index: 7, kind: input, shape index: {}]   ;;  %s4207_s8 = inlined_call_operand.vmem [shape: f32[1,32], index: 8, kind: input, shape index: {}]   ;;  %s4208_s9 = inlined_call_operand.vmem [shape: f32[1,32], index: 9, kind: input, shape index: {}]   ;;  %s4209_s10 = inlined_call_operand.vmem [shape: f32[288,64], index: 10, kind: output, shape index: {}]  }
   0x1 LB: > { %s2459_s14 = sadd.s32 4294967295, %s3224_s13   ;;  %p2463_p0 = scmp.ge.s32.totalorder %s3224_s13, 1  ;;  %s3224_s13 = sphi %s3282_s13, %s20_s13  }
   0x2   : > { %p324_p1 = scmp.lt.s32.totalorder %s3224_s13, 3 }
   0x4   : > { %p325_p2 = pnand %p2463_p0, %p324_p1 }
   0x6   : > { %328 = sbr.rel (%p325_p2) target bundleno = 713 (0x2c9), region = 60 }
   0xd   : > { %v421_v0 = vld [vmem:[%s4201_s2] sm:$0xff]  ;;  %v422_v1 = vld [vmem:[%s4201_s2 + $0x8] sm:$0xff]  ;;  %s367_s21 = smul.u32 18, %s2459_s14  ;;  %v423_v5 = vld [vmem:[%s4201_s2 + $0x10] sm:$0xff]  ;;  %vm425_vm0 = vcmask 261120   ;;  %s3226_s26 = smov 32  }
   0xe   : > { %v635_v2 = vld [vmem:[%s4202_s3] sm:$0xff]  ;;  %v3109_v3 = vpack.c.bf16 %v422_v1, %v421_v0  ;;  %v636_v4 = vld [vmem:[%s4202_s3 + $0x8] sm:$0xff]  ;;  %v424_v6 = vld [vmem:[%s4201_s2 + $0x18] sm:$0xff] }
   0xf   : > { %v3117_v7 = vpack.c.bf16 %v636_v4, %v635_v2  ;;  %v3113_v8 = vpack.c.bf16 %v424_v6, %v423_v5  ;;  %v637_v9 = vld [vmem:[%s4202_s3 + $0x10] sm:$0xff]  ;;  %v638_v10 = vld [vmem:[%s4202_s3 + $0x18] sm:$0xff]  ;;  %p368_p3 = scmp.lt.s32.totalorder %s367_s21, 35  ;;  %v1475_v48 = vld [vmem:[%s4206_s7] sm:$0xff] }
  0x10   : > { %3110 = vmatprep.subr.bf16.mxu1 %v3109_v3  ;;  %v3121_v11 = vpack.c.bf16 %v638_v10, %v637_v9  ;;  %v1476_v49 = vld [vmem:[%s4206_s7 + $0x8] sm:$0xff]  ;;  %v1477_v51 = vld [vmem:[%s4206_s7 + $0x10] sm:$0xff]  ;;  %v1478_v52 = vld [vmem:[%s4206_s7 + $0x18] sm:$0xff] }
  0x11   : > { %3112 = vmatpush3.bf16.msra.mxu1 %v3109_v3  ;;  %3126 = vmatprep.subr.bf16.mxu0 %v3117_v7  ;;  %s4224_s21 = smov (!%p368_p3, %s367_s21), 35  ;;  %v3442_v50 = vpack.c.bf16 %v1476_v49, %v1475_v48  ;;  %v3452_v53 = vpack.c.bf16 %v1478_v52, %v1477_v51  ;;  %v1262_v54 = vld [vmem:[%s4205_s6] sm:$0xff]  ;;  %v1263_v55 = vld [vmem:[%s4205_s6 + $0x8] sm:$0xff]  ;;  %v1264_v57 = vld [vmem:[%s4205_s6 + $0x10] sm:$0xff] }
  0x12   : > { %3128 = vmatpush3.bf16.msra.mxu0 %v3117_v7  ;;  %3114 = vmatprep.subr.bf16.mxu1 %v3113_v8  ;;  %s3314_s12 = sshll.u32 %s4224_s21, 3  ;;  %v3141_v56 = vpack.c.bf16 %v1263_v55, %v1262_v54  ;;  %v1265_v58 = vld [vmem:[%s4205_s6 + $0x18] sm:$0xff] }
  0x13   : > { %3130 = vmatprep.subr.bf16.mxu0 %v3121_v11  ;;  %s3320_s16 = scalar_lea.vmem %s4199_s0, %s3314_s12  ;;  %s3373_s19 = scalar_lea.vmem %s4200_s1, %s3314_s12  ;;  %v3468_v59 = vpack.c.bf16 %v1265_v58, %v1264_v57 }
  0x14   : > { %v385_v12 = vld [vmem:[%s3320_s16] sm:$0xff]  ;;  %v386_v13 = vld [vmem:[%s3320_s16 + $0x8] sm:$0xff]  ;;  %v387_v14 = vld [vmem:[%s3320_s16 + $0x10] sm:$0xff]  ;;  %s3749_s29 = scalar_lea.vmem %s4209_s10, %s3314_s12 }
  0x15   : > { %3116 = vmatpush3.bf16.msra.mxu1 %v3113_v8  ;;  %2837 = vmatprep.mubr.msk.f32.mxu1 %vm425_vm0, %v385_v12  ;;  %v388_v15 = vld [vmem:[%s3320_s16 + $0x18] sm:$0xff]  ;;  %v389_v16 = vld [vmem:[%s3320_s16 + $0x20] sm:$0xff]  ;;  %v390_v17 = vld [vmem:[%s3320_s16 + $0x28] sm:$0xff] }
  0x16   : > { %3132 = vmatpush3.bf16.msra.mxu0 %v3121_v11  ;;  %3118 = vmatprep.subr.bf16.mxu1 %v3117_v7  ;;  %v391_v18 = vld [vmem:[%s3320_s16 + $0x30] sm:$0xff]  ;;  %v392_v19 = vld [vmem:[%s3320_s16 + $0x38] sm:$0xff]  ;;  %v393_v20 = vld [vmem:[%s3320_s16 + $0x40] sm:$0xff] }
  0x17   : > { %2907 = vmatprep.mubr.msk.f32.mxu0 %vm425_vm0, %v385_v12  ;;  %3134 = vmatprep.subr.bf16.mxu0 %v3109_v3  ;;  %v394_v21 = vld [vmem:[%s3320_s16 + $0x48] sm:$0xff]  ;;  %v395_v22 = vld [vmem:[%s3320_s16 + $0x50] sm:$0xff]  ;;  %v396_v23 = vld [vmem:[%s3320_s16 + $0x58] sm:$0xff] }
  0x18   : > { %2838 = vmatmul.mubr.msk.f32.vlgmr.msra.gmra.mrb[0].mxu1 %vm425_vm0, %v386_v13  ;;  %v397_v24 = vld [vmem:[%s3320_s16 + $0x60] sm:$0xff]  ;;  %v398_v25 = vld [vmem:[%s3320_s16 + $0x68] sm:$0xff]  ;;  %v399_v26 = vld [vmem:[%s3320_s16 + $0x70] sm:$0xff] }
  0x19   : > { %3120 = vmatpush3.bf16.msra.mxu1 %v3117_v7  ;;  %2908 = vmatmul.mubr.msk.f32.vlgmr.msra.gmra.mrb[0].mxu0 %vm425_vm0, %v386_v13  ;;  %v400_v27 = vld [vmem:[%s3320_s16 + $0x78] sm:$0xff]  ;;  %v401_v28 = vld [vmem:[%s3320_s16 + $0x80] sm:$0xff]  ;;  %v402_v29 = vld [vmem:[%s3320_s16 + $0x88] sm:$0xff] }
  0x1a   : > { %2840 = vmatprep.mubr.msk.f32.mxu1 %vm425_vm0, %v387_v14  ;;  %2910 = vmatprep.mubr.msk.f32.mxu0 %vm425_vm0, %v387_v14  ;;  %v403_v30 = vld [vmem:[%s3373_s19] sm:$0xff]  ;;  %v404_v31 = vld [vmem:[%s3373_s19 + $0x8] sm:$0xff]  ;;  %v405_v32 = vld [vmem:[%s3373_s19 + $0x10] sm:$0xff] }
  0x1b   : > { %3122 = vmatprep.subr.bf16.mxu1 %v3121_v11  ;;  %3136 = vmatpush3.bf16.msra.mxu0 %v3109_v3  ;;  %v406_v33 = vld [vmem:[%s3373_s19 + $0x18] sm:$0xff]  ;;  %v407_v34 = vld [vmem:[%s3373_s19 + $0x20] sm:$0xff]  ;;  %v408_v35 = vld [vmem:[%s3373_s19 + $0x28] sm:$0xff] }
  0x1c   : > { %2841 = vmatmul.mubr.msk.f32.gmra.mrb[2].mxu1 %vm425_vm0, %v388_v15  ;;  %3138 = vmatprep.subr.bf16.mxu0 %v3113_v8  ;;  %v409_v36 = vld [vmem:[%s3373_s19 + $0x30] sm:$0xff]  ;;  %v410_v37 = vld [vmem:[%s3373_s19 + $0x38] sm:$0xff]  ;;  %v411_v38 = vld [vmem:[%s3373_s19 + $0x40] sm:$0xff] }
  0x1d   : > { %2911 = vmatmul.mubr.msk.f32.gmra.mrb[2].mxu0 %vm425_vm0, %v388_v15  ;;  %2843 = vmatprep.mubr.msk.f32.mxu1 %vm425_vm0, %v389_v16  ;;  %v412_v39 = vld [vmem:[%s3373_s19 + $0x48] sm:$0xff]  ;;  %v413_v40 = vld [vmem:[%s3373_s19 + $0x50] sm:$0xff]  ;;  %v414_v41 = vld [vmem:[%s3373_s19 + $0x58] sm:$0xff] }
  0x1e   : > { %2913 = vmatprep.mubr.msk.f32.mxu0 %vm425_vm0, %v389_v16  ;;  %3124 = vmatpush3.bf16.msra.mxu1 %v3121_v11  ;;  %v415_v42 = vld [vmem:[%s3373_s19 + $0x60] sm:$0xff]  ;;  %v416_v43 = vld [vmem:[%s3373_s19 + $0x68] sm:$0xff]  ;;  %v417_v44 = vld [vmem:[%s3373_s19 + $0x70] sm:$0xff] }
  0x1f   : > { %3140 = vmatpush3.bf16.msra.mxu0 %v3113_v8  ;;  %v418_v45 = vld [vmem:[%s3373_s19 + $0x78] sm:$0xff]  ;;  %v419_v46 = vld [vmem:[%s3373_s19 + $0x80] sm:$0xff]  ;;  %v420_v47 = vld [vmem:[%s3373_s19 + $0x88] sm:$0xff]  ;;  %3142 = vmatprep.subr.bf16.mxu1 %v3141_v56 }
  0x20   : > { %2844 = vmatmul.mubr.msk.f32.gmra.mrb[4].mxu1 %vm425_vm0, %v390_v17  ;;  %3158 = vmatprep.subr.bf16.mxu0 %v3442_v50  ;;  %v3500_v15 = vld [vmem:[%s4203_s4] ss:$0 sm:$0xff] }
  0x21   : > { %2914 = vmatmul.mubr.msk.f32.gmra.mrb[4].mxu0 %vm425_vm0, %v390_v17  ;;  %2846 = vmatprep.mubr.msk.f32.mxu1 %vm425_vm0, %v391_v18 }
  0x22   : > { %2916 = vmatprep.mubr.msk.f32.mxu0 %vm425_vm0, %v391_v18 }
  0x24   : > { %2847 = vmatmul.mubr.msk.f32.gmra.mrb[6].mxu1 %vm425_vm0, %v392_v19 }
  0x25   : > { %2917 = vmatmul.mubr.msk.f32.gmra.mrb[6].mxu0 %vm425_vm0, %v392_v19  ;;  %2849 = vmatprep.mubr.msk.f32.mxu1 %vm425_vm0, %v393_v20 }
  0x26   : > { %2919 = vmatprep.mubr.msk.f32.mxu0 %vm425_vm0, %v393_v20 }
  0x28   : > { %2850 = vmatmul.mubr.msk.f32.gmra.mrb[8].mxu1 %vm425_vm0, %v394_v21 }
  0x29   : > { %2920 = vmatmul.mubr.msk.f32.gmra.mrb[8].mxu0 %vm425_vm0, %v394_v21  ;;  %2852 = vmatprep.mubr.msk.f32.mxu1 %vm425_vm0, %v395_v22 }
  0x2a   : > { %2922 = vmatprep.mubr.msk.f32.mxu0 %vm425_vm0, %v395_v22 }
  0x2c   : > { %2853 = vmatmul.mubr.msk.f32.gmra.mrb[10].mxu1 %vm425_vm0, %v396_v23 }
  0x2d   : > { %2923 = vmatmul.mubr.msk.f32.gmra.mrb[10].mxu0 %vm425_vm0, %v396_v23  ;;  %2855 = vmatprep.mubr.msk.f32.mxu1 %vm425_vm0, %v397_v24 }
  0x2e   : > { %2925 = vmatprep.mubr.msk.f32.mxu0 %vm425_vm0, %v397_v24 }
  0x30   : > { %2856 = vmatmul.mubr.msk.f32.gmra.mrb[12].mxu1 %vm425_vm0, %v398_v25 }
  0x31   : > { %2926 = vmatmul.mubr.msk.f32.gmra.mrb[12].mxu0 %vm425_vm0, %v398_v25  ;;  %2858 = vmatprep.mubr.msk.f32.mxu1 %vm425_vm0, %v399_v26 }
  0x32   : > { %2928 = vmatprep.mubr.msk.f32.mxu0 %vm425_vm0, %v399_v26 }
  0x34   : > { %2859 = vmatmul.mubr.msk.f32.gmra.mrb[14].mxu1 %vm425_vm0, %v400_v27 }
  0x35   : > { %2929 = vmatmul.mubr.msk.f32.gmra.mrb[14].mxu0 %vm425_vm0, %v400_v27  ;;  %2861 = vmatprep.mubr.msk.f32.mxu1 %vm425_vm0, %v401_v28 }
  0x36   : > { %2931 = vmatprep.mubr.msk.f32.mxu0 %vm425_vm0, %v401_v28 }
  0x38   : > { %2862 = vmatmul.mubr.msk.f32.gmra.mrb[16].mxu1 %vm425_vm0, %v402_v29 }
  0x39   : > { %2932 = vmatmul.mubr.msk.f32.gmra.mrb[16].mxu0 %vm425_vm0, %v402_v29  ;;  %2872 = vmatprep.mubr.msk.f32.mxu1 %vm425_vm0, %v403_v30 }
  0x3a   : > { %2942 = vmatprep.mubr.msk.f32.mxu0 %vm425_vm0, %v403_v30 }
  0x3c   : > { %2873 = vmatmul.mubr.msk.f32.vlgmr.msra.gmra.mrb[18].mxu1 %vm425_vm0, %v404_v31 }
  0x3d   : > { %2943 = vmatmul.mubr.msk.f32.vlgmr.msra.gmra.mrb[0].mxu0 %vm425_vm0, %v404_v31  ;;  %2875 = vmatprep.mubr.msk.f32.mxu1 %vm425_vm0, %v405_v32 }
  0x3e   : > { %2945 = vmatprep.mubr.msk.f32.mxu0 %vm425_vm0, %v405_v32  ;;  %3160 = vmatpush3.bf16.msra.mxu0 %v3442_v50 }
  0x3f   : > { %3162 = vmatprep.subr.bf16.mxu0 %v3452_v53  ;;  %3144 = vmatpush3.bf16.msra.mxu1 %v3141_v56 }
  0x40   : > { %2876 = vmatmul.mubr.msk.f32.gmra.mrb[20].mxu1 %vm425_vm0, %v406_v33  ;;  %3146 = vmatprep.subr.bf16.mxu1 %v3468_v59 }
  0x41   : > { %2946 = vmatmul.mubr.msk.f32.gmra.mrb[2].mxu0 %vm425_vm0, %v406_v33  ;;  %2878 = vmatprep.mubr.msk.f32.mxu1 %vm425_vm0, %v407_v34 }
  0x42   : > { %2948 = vmatprep.mubr.msk.f32.mxu0 %vm425_vm0, %v407_v34  ;;  %3164 = vmatpush3.bf16.msra.mxu0 %v3452_v53 }
  0x43   : > { %3166 = vmatprep.subr.bf16.mxu0 %v3141_v56  ;;  %3148 = vmatpush3.bf16.msra.mxu1 %v3468_v59 }
  0x44   : > { %2879 = vmatmul.mubr.msk.f32.gmra.mrb[22].mxu1 %vm425_vm0, %v408_v35  ;;  %3150 = vmatprep.subr.bf16.mxu1 %v3442_v50 }
  0x45   : > { %2949 = vmatmul.mubr.msk.f32.gmra.mrb[4].mxu0 %vm425_vm0, %v408_v35  ;;  %2881 = vmatprep.mubr.msk.f32.mxu1 %vm425_vm0, %v409_v36 }
  0x46   : > { %2951 = vmatprep.mubr.msk.f32.mxu0 %vm425_vm0, %v409_v36 }
  0x48   : > { %2882 = vmatmul.mubr.msk.f32.gmra.mrb[24].mxu1 %vm425_vm0, %v410_v37 }
  0x49   : > { %2952 = vmatmul.mubr.msk.f32.gmra.mrb[6].mxu0 %vm425_vm0, %v410_v37  ;;  %2884 = vmatprep.mubr.msk.f32.mxu1 %vm425_vm0, %v411_v38 }
  0x4a   : > { %2954 = vmatprep.mubr.msk.f32.mxu0 %vm425_vm0, %v411_v38 }
  0x4c   : > { %2885 = vmatmul.mubr.msk.f32.gmra.mrb[26].mxu1 %vm425_vm0, %v412_v39 }
  0x4d   : > { %2955 = vmatmul.mubr.msk.f32.gmra.mrb[8].mxu0 %vm425_vm0, %v412_v39  ;;  %2887 = vmatprep.mubr.msk.f32.mxu1 %vm425_vm0, %v413_v40 }
  0x4e   : > { %2957 = vmatprep.mubr.msk.f32.mxu0 %vm425_vm0, %v413_v40 }
  0x50   : > { %2888 = vmatmul.mubr.msk.f32.gmra.mrb[28].mxu1 %vm425_vm0, %v414_v41 }
  0x51   : > { %2958 = vmatmul.mubr.msk.f32.gmra.mrb[10].mxu0 %vm425_vm0, %v414_v41  ;;  %2890 = vmatprep.mubr.msk.f32.mxu1 %vm425_vm0, %v415_v42 }
  0x52   : > { %2960 = vmatprep.mubr.msk.f32.mxu0 %vm425_vm0, %v415_v42 }
  0x54   : > { %2891 = vmatmul.mubr.msk.f32.gmra.mrb[30].mxu1 %vm425_vm0, %v416_v43 }
  0x55   : > { %2961 = vmatmul.mubr.msk.f32.gmra.mrb[12].mxu0 %vm425_vm0, %v416_v43  ;;  %2893 = vmatprep.mubr.msk.f32.mxu1 %vm425_vm0, %v417_v44 }
  0x56   : > { %2963 = vmatprep.mubr.msk.f32.mxu0 %vm425_vm0, %v417_v44 }
  0x58   : > { %2894 = vmatmul.mubr.msk.f32.gmra.mrb[32].mxu1 %vm425_vm0, %v418_v45 }
  0x59   : > { %2964 = vmatmul.mubr.msk.f32.gmra.mrb[14].mxu0 %vm425_vm0, %v418_v45  ;;  %2896 = vmatprep.mubr.msk.f32.mxu1 %vm425_vm0, %v419_v46 }
  0x5a   : > { %2966 = vmatprep.mubr.msk.f32.mxu0 %vm425_vm0, %v419_v46 }
  0x5c   : > { %2897 = vmatmul.mubr.msk.f32.gmra.mrb[34].mxu1 %vm425_vm0, %v420_v47 }
  0x5d   : > { %2967 = vmatmul.mubr.msk.f32.gmra.mrb[16].mxu0 %vm425_vm0, %v420_v47 }
  0xeb   : > { %v2839_v60 = vpop.f32.mrb[0].mxu1 }
  0xec   : > { %v546_v61 = vpop.f32.mrb[1].mxu1 }
  0xef   : > { %v2842_v62 = vpop.f32.mrb[2].mxu1 }
  0xf0   : > { %v556_v63 = vpop.f32.mrb[3].mxu1 }
  0xf3   : > { %v2845_v0 = vpop.f32.mrb[4].mxu1 }
  0xf4   : > { %v566_v1 = vpop.f32.mrb[5].mxu1 }
  0xf7   : > { %v3473_v2 = vpop.f32.mrb[6].mxu1 }
  0xf8   : > { %v3475_v3 = vpop.f32.mrb[7].mxu1 }
  0xfb   : > { %v3477_v4 = vpop.f32.mrb[8].mxu1 }
  0xfc   : > { %v3479_v5 = vpop.f32.mrb[9].mxu1 }
  0xff   : > { %v3481_v6 = vpop.f32.mrb[10].mxu1 }
 0x100   : > { %v3483_v7 = vpop.f32.mrb[11].mxu1 }
 0x103   : > { %v3485_v8 = vpop.f32.mrb[12].mxu1 }
 0x104   : > { %v3487_v9 = vpop.f32.mrb[13].mxu1 }
 0x107   : > { %v3489_v10 = vpop.f32.mrb[14].mxu1 }
 0x108   : > { %v3491_v11 = vpop.f32.mrb[15].mxu1 }
 0x10b   : > { %v3493_v12 = vpop.f32.mrb[16].mxu1 }
 0x10c   : > { %v3495_v13 = vpop.f32.mrb[17].mxu1 }
 0x10f   : > { %v2874_v14 = vpop.f32.mrb[18].mxu1 }
 0x110   : > { %v849_v16 = vsub.f32 %v2839_v60, %v2874_v14  ;;  %v759_v17 = vpop.f32.mrb[19].mxu1  ;;  %v3502_v18 = vpop.f32.mrb[0].mxu0 }
 0x111   : > { %v848_v19 = vsub.f32 %v546_v61, %v759_v17  ;;  %v3504_v20 = vpop.f32.mrb[1].mxu0 }
 0x112   : > { %v874_v21 = vadd.f32 %v3500_v15, %v849_v16 }
 0x113   : > { %v873_v22 = vadd.f32 %v3500_v15, %v848_v19  ;;  %v2877_v23 = vpop.f32.mrb[20].mxu1 }
 0x114   : > { %v851_v24 = vsub.f32 %v2842_v62, %v2877_v23  ;;  %v769_v25 = vpop.f32.mrb[21].mxu1  ;;  %v3508_v26 = vpop.f32.mrb[2].mxu0  ;;  %v892_v30 = vmax.f32 %v874_v21, 0.0 }
 0x115   : > { %v891_v27 = vmax.f32 %v873_v22, 0.0  ;;  %v850_v28 = vsub.f32 %v556_v63, %v769_v25  ;;  %v3510_v29 = vpop.f32.mrb[3].mxu0 }
 0x116   : > { %v876_v31 = vadd.f32 %v3500_v15, %v851_v24 }
 0x117   : > { %v875_v32 = vadd.f32 %v3500_v15, %v850_v28  ;;  %v2880_v33 = vpop.f32.mrb[22].mxu1  ;;  %2977 = vmatprep.mubr.msk.f32.mxu1 %vm425_vm0, %v891_v27  ;;  %3047 = vmatprep.mubr.msk.f32.mxu0 %vm425_vm0, %v891_v27 }
 0x118   : > { %v853_v34 = vsub.f32 %v2845_v0, %v2880_v33  ;;  %v779_v35 = vpop.f32.mrb[23].mxu1  ;;  %2978 = vmatmul.mubr.msk.f32.vlgmr.msra.gmra.mrb[36].mxu1 %vm425_vm0, %v892_v30  ;;  %3048 = vmatmul.mubr.msk.f32.vlgmr.msra.gmra.mrb[18].mxu0 %vm425_vm0, %v892_v30  ;;  %v3518_v36 = vpop.f32.mrb[4].mxu0  ;;  %v894_v40 = vmax.f32 %v876_v31, 0.0 }
 0x119   : > { %v893_v37 = vmax.f32 %v875_v32, 0.0  ;;  %v852_v38 = vsub.f32 %v566_v1, %v779_v35  ;;  %3168 = vmatpush3.bf16.msra.mxu0 %v3141_v56  ;;  %v3520_v39 = vpop.f32.mrb[5].mxu0  ;;  %3152 = vmatpush3.bf16.msra.mxu1 %v3442_v50 }
 0x11a   : > { %v878_v41 = vadd.f32 %v3500_v15, %v853_v34  ;;  %3170 = vmatprep.subr.bf16.mxu0 %v3468_v59  ;;  %3154 = vmatprep.subr.bf16.mxu1 %v3452_v53 }
 0x11b   : > { %v877_v42 = vadd.f32 %v3500_v15, %v852_v38  ;;  %v2883_v43 = vpop.f32.mrb[24].mxu1  ;;  %2980 = vmatprep.mubr.msk.f32.mxu1 %vm425_vm0, %v893_v37  ;;  %3050 = vmatprep.mubr.msk.f32.mxu0 %vm425_vm0, %v893_v37 }
 0x11c   : > { %v855_v44 = vsub.f32 %v3473_v2, %v2883_v43  ;;  %v789_v45 = vpop.f32.mrb[25].mxu1  ;;  %2981 = vmatmul.mubr.msk.f32.gmra.mrb[38].mxu1 %vm425_vm0, %v894_v40  ;;  %3051 = vmatmul.mubr.msk.f32.gmra.mrb[20].mxu0 %vm425_vm0, %v894_v40  ;;  %v3532_v46 = vpop.f32.mrb[6].mxu0  ;;  %v896_v50 = vmax.f32 %v878_v41, 0.0 }
 0x11d   : > { %v895_v47 = vmax.f32 %v877_v42, 0.0  ;;  %v854_v48 = vsub.f32 %v3475_v3, %v789_v45  ;;  %v3535_v49 = vpop.f32.mrb[7].mxu0  ;;  %3172 = vmatpush3.bf16.msra.mxu0 %v3468_v59  ;;  %3156 = vmatpush3.bf16.msra.mxu1 %v3452_v53 }
 0x11e   : > { %v880_v51 = vadd.f32 %v3500_v15, %v855_v44 }
 0x11f   : > { %v879_v52 = vadd.f32 %v3500_v15, %v854_v48  ;;  %v2886_v54 = vpop.f32.mrb[26].mxu1  ;;  %2983 = vmatprep.mubr.msk.f32.mxu1 %vm425_vm0, %v895_v47  ;;  %3053 = vmatprep.mubr.msk.f32.mxu0 %vm425_vm0, %v895_v47 }
 0x120   : > { %v857_v55 = vsub.f32 %v3477_v4, %v2886_v54  ;;  %v799_v56 = vpop.f32.mrb[27].mxu1  ;;  %2984 = vmatmul.mubr.msk.f32.gmra.mrb[40].mxu1 %vm425_vm0, %v896_v50  ;;  %3054 = vmatmul.mubr.msk.f32.gmra.mrb[22].mxu0 %vm425_vm0, %v896_v50  ;;  %v3546_v57 = vpop.f32.mrb[8].mxu0  ;;  %v898_v60 = vmax.f32 %v880_v51, 0.0 }
 0x121   : > { %v897_v53 = vmax.f32 %v879_v52, 0.0  ;;  %v856_v58 = vsub.f32 %v3479_v5, %v799_v56  ;;  %v3549_v59 = vpop.f32.mrb[9].mxu0 }
 0x122   : > { %v882_v61 = vadd.f32 %v3500_v15, %v857_v55 }
 0x123   : > { %v881_v62 = vadd.f32 %v3500_v15, %v856_v58  ;;  %v2889_v63 = vpop.f32.mrb[28].mxu1  ;;  %2986 = vmatprep.mubr.msk.f32.mxu1 %vm425_vm0, %v897_v53  ;;  %3056 = vmatprep.mubr.msk.f32.mxu0 %vm425_vm0, %v897_v53 }
 0x124   : > { %v859_v0 = vsub.f32 %v3481_v6, %v2889_v63  ;;  %v809_v1 = vpop.f32.mrb[29].mxu1  ;;  %2987 = vmatmul.mubr.msk.f32.gmra.mrb[42].mxu1 %vm425_vm0, %v898_v60  ;;  %3057 = vmatmul.mubr.msk.f32.gmra.mrb[24].mxu0 %vm425_vm0, %v898_v60  ;;  %v3558_v2 = vpop.f32.mrb[10].mxu0  ;;  %v900_v14 = vmax.f32 %v882_v61, 0.0 }
 0x125   : > { %v899_v3 = vmax.f32 %v881_v62, 0.0  ;;  %v858_v4 = vsub.f32 %v3483_v7, %v809_v1  ;;  %v3561_v5 = vpop.f32.mrb[11].mxu0 }
 0x126   : > { %v884_v16 = vadd.f32 %v3500_v15, %v859_v0 }
 0x127   : > { %v883_v17 = vadd.f32 %v3500_v15, %v858_v4  ;;  %v2892_v19 = vpop.f32.mrb[30].mxu1  ;;  %2989 = vmatprep.mubr.msk.f32.mxu1 %vm425_vm0, %v899_v3  ;;  %3059 = vmatprep.mubr.msk.f32.mxu0 %vm425_vm0, %v899_v3 }
 0x128   : > { %v861_v6 = vsub.f32 %v3485_v8, %v2892_v19  ;;  %v819_v21 = vpop.f32.mrb[31].mxu1  ;;  %2990 = vmatmul.mubr.msk.f32.gmra.mrb[44].mxu1 %vm425_vm0, %v900_v14  ;;  %3060 = vmatmul.mubr.msk.f32.gmra.mrb[26].mxu0 %vm425_vm0, %v900_v14  ;;  %v3570_v7 = vpop.f32.mrb[12].mxu0  ;;  %v902_v25 = vmax.f32 %v884_v16, 0.0 }
 0x129   : > { %v901_v22 = vmax.f32 %v883_v17, 0.0  ;;  %v860_v23 = vsub.f32 %v3487_v9, %v819_v21  ;;  %v3573_v24 = vpop.f32.mrb[13].mxu0 }
 0x12a   : > { %v886_v27 = vadd.f32 %v3500_v15, %v861_v6 }
 0x12b   : > { %v885_v28 = vadd.f32 %v3500_v15, %v860_v23  ;;  %v2895_v30 = vpop.f32.mrb[32].mxu1  ;;  %2992 = vmatprep.mubr.msk.f32.mxu1 %vm425_vm0, %v901_v22  ;;  %3062 = vmatprep.mubr.msk.f32.mxu0 %vm425_vm0, %v901_v22 }
 0x12c   : > { %v863_v8 = vsub.f32 %v3489_v10, %v2895_v30  ;;  %v829_v31 = vpop.f32.mrb[33].mxu1  ;;  %2993 = vmatmul.mubr.msk.f32.gmra.mrb[46].mxu1 %vm425_vm0, %v902_v25  ;;  %3063 = vmatmul.mubr.msk.f32.gmra.mrb[28].mxu0 %vm425_vm0, %v902_v25  ;;  %v3582_v9 = vpop.f32.mrb[14].mxu0  ;;  %v904_v35 = vmax.f32 %v886_v27, 0.0  ;;  %v3594_v10 = vld [vmem:[%s4204_s5] ss:$0 sm:$0xff] }
 0x12d   : > { %v903_v32 = vmax.f32 %v885_v28, 0.0  ;;  %v862_v33 = vsub.f32 %v3491_v11, %v829_v31  ;;  %v3585_v34 = vpop.f32.mrb[15].mxu0  ;;  %v1226_v50 = vadd.f32 %v3594_v10, %v3504_v20  ;;  %v1228_v55 = vadd.f32 %v3594_v10, %v3510_v29 }
 0x12e   : > { %v888_v37 = vadd.f32 %v3500_v15, %v863_v8  ;;  %v1230_v29 = vadd.f32 %v3594_v10, %v3520_v39  ;;  %v1231_v53 = vadd.f32 %v3518_v36, %v3594_v10  ;;  %v1233_v60 = vadd.f32 %v3532_v46, %v3594_v10 }
 0x12f   : > { %v887_v38 = vadd.f32 %v3500_v15, %v862_v33  ;;  %v2898_v40 = vpop.f32.mrb[34].mxu1  ;;  %2995 = vmatprep.mubr.msk.f32.mxu1 %vm425_vm0, %v903_v32  ;;  %3065 = vmatprep.mubr.msk.f32.mxu0 %vm425_vm0, %v903_v32  ;;  %v1244_v54 = vmax.f32 %v1226_v50, 0.0  ;;  %v1246_v20 = vmax.f32 %v1228_v55, 0.0  ;;  %v1234_v36 = vadd.f32 %v3594_v10, %v3549_v59 }
 0x130   : > { %v865_v41 = vsub.f32 %v3493_v12, %v2898_v40  ;;  %v839_v11 = vpop.f32.mrb[35].mxu1  ;;  %2996 = vmatmul.mubr.msk.f32.gmra.mrb[48].mxu1 %vm425_vm0, %v904_v35  ;;  %3066 = vmatmul.mubr.msk.f32.gmra.mrb[30].mxu0 %vm425_vm0, %v904_v35  ;;  %v3599_v42 = vpop.f32.mrb[16].mxu0  ;;  %v906_v47 = vmax.f32 %v888_v37, 0.0  ;;  %v1248_v58 = vmax.f32 %v1230_v29, 0.0  ;;  %v1249_v39 = vmax.f32 %v1231_v53, 0.0 }
 0x131   : > { %v905_v43 = vmax.f32 %v887_v38, 0.0  ;;  %v864_v44 = vsub.f32 %v3495_v13, %v839_v11  ;;  %v3602_v45 = vpop.f32.mrb[17].mxu0  ;;  %v1227_v13 = vadd.f32 %v3502_v18, %v3594_v10  ;;  %v1229_v18 = vadd.f32 %v3508_v26, %v3594_v10  ;;  %v3715_v11 = vld [vmem:[%s4208_s9] ss:$0 sm:$0xff] }
 0x132   : > { %v890_v48 = vadd.f32 %v3500_v15, %v865_v41  ;;  %v1232_v26 = vadd.f32 %v3594_v10, %v3535_v49  ;;  %v1251_v49 = vmax.f32 %v1233_v60, 0.0  ;;  %v1235_v62 = vadd.f32 %v3546_v57, %v3594_v10 }
 0x133   : > { %v889_v12 = vadd.f32 %v3500_v15, %v864_v44  ;;  %2998 = vmatprep.mubr.msk.f32.mxu1 %vm425_vm0, %v905_v43  ;;  %3068 = vmatprep.mubr.msk.f32.mxu0 %vm425_vm0, %v905_v43  ;;  %v1245_v15 = vmax.f32 %v1227_v13, 0.0  ;;  %v1247_v56 = vmax.f32 %v1229_v18, 0.0  ;;  %v1252_v63 = vmax.f32 %v1234_v36, 0.0 }
 0x134   : > { %2999 = vmatmul.mubr.msk.f32.gmra.mrb[50].mxu1 %vm425_vm0, %v906_v47  ;;  %3069 = vmatmul.mubr.msk.f32.gmra.mrb[32].mxu0 %vm425_vm0, %v906_v47  ;;  %v908_v52 = vmax.f32 %v890_v48, 0.0  ;;  %v1250_v61 = vmax.f32 %v1232_v26, 0.0  ;;  %v1236_v46 = vadd.f32 %v3594_v10, %v3561_v5  ;;  %v1253_v59 = vmax.f32 %v1235_v62, 0.0 }
 0x135   : > { %v907_v51 = vmax.f32 %v889_v12, 0.0  ;;  %v1237_v0 = vadd.f32 %v3558_v2, %v3594_v10  ;;  %v1238_v57 = vadd.f32 %v3594_v10, %v3573_v24  ;;  %v1239_v4 = vadd.f32 %v3570_v7, %v3594_v10 }
 0x136   : > { %v1254_v1 = vmax.f32 %v1236_v46, 0.0  ;;  %v1240_v2 = vadd.f32 %v3594_v10, %v3585_v34  ;;  %v1241_v16 = vadd.f32 %v3582_v9, %v3594_v10  ;;  %v1242_v19 = vadd.f32 %v3594_v10, %v3602_v45  ;;  %v3720_v45 = vld [vmem:[%s4207_s8] ss:$0 sm:$0xff] }
 0x137   : > { %3001 = vmatprep.mubr.msk.f32.mxu1 %vm425_vm0, %v907_v51  ;;  %3071 = vmatprep.mubr.msk.f32.mxu0 %vm425_vm0, %v907_v51  ;;  %v1255_v3 = vmax.f32 %v1237_v0, 0.0  ;;  %v1256_v5 = vmax.f32 %v1238_v57, 0.0  ;;  %v1257_v14 = vmax.f32 %v1239_v4, 0.0  ;;  %v1243_v21 = vadd.f32 %v3599_v42, %v3594_v10 }
 0x138   : > { %3002 = vmatmul.mubr.msk.f32.gmra.mrb[52].mxu1 %vm425_vm0, %v908_v52  ;;  %3072 = vmatmul.mubr.msk.f32.gmra.mrb[34].mxu0 %vm425_vm0, %v908_v52  ;;  %v1258_v17 = vmax.f32 %v1240_v2, 0.0  ;;  %v1259_v6 = vmax.f32 %v1241_v16, 0.0  ;;  %v1260_v7 = vmax.f32 %v1242_v19, 0.0 }
 0x139   : > { %3012 = vmatprep.mubr.msk.f32.mxu1 %vm425_vm0, %v1244_v54  ;;  %3082 = vmatprep.mubr.msk.f32.mxu0 %vm425_vm0, %v1244_v54  ;;  %v1261_v22 = vmax.f32 %v1243_v21, 0.0 }
 0x13c   : > { %3013 = vmatmul.mubr.msk.f32.vlgmr.msra.gmra.mrb[54].mxu1 %vm425_vm0, %v1245_v15  ;;  %3083 = vmatmul.mubr.msk.f32.vlgmr.msra.gmra.mrb[18].mxu0 %vm425_vm0, %v1245_v15 }
 0x13d   : > { %3015 = vmatprep.mubr.msk.f32.mxu1 %vm425_vm0, %v1246_v20  ;;  %3085 = vmatprep.mubr.msk.f32.mxu0 %vm425_vm0, %v1246_v20 }
 0x140   : > { %3016 = vmatmul.mubr.msk.f32.gmra.mrb[56].mxu1 %vm425_vm0, %v1247_v56  ;;  %3086 = vmatmul.mubr.msk.f32.gmra.mrb[20].mxu0 %vm425_vm0, %v1247_v56 }
 0x141   : > { %3018 = vmatprep.mubr.msk.f32.mxu1 %vm425_vm0, %v1248_v58  ;;  %3088 = vmatprep.mubr.msk.f32.mxu0 %vm425_vm0, %v1248_v58 }
 0x144   : > { %3019 = vmatmul.mubr.msk.f32.gmra.mrb[58].mxu1 %vm425_vm0, %v1249_v39  ;;  %3089 = vmatmul.mubr.msk.f32.gmra.mrb[22].mxu0 %vm425_vm0, %v1249_v39 }
 0x145   : > { %3021 = vmatprep.mubr.msk.f32.mxu1 %vm425_vm0, %v1250_v61  ;;  %3091 = vmatprep.mubr.msk.f32.mxu0 %vm425_vm0, %v1250_v61 }
 0x148   : > { %3022 = vmatmul.mubr.msk.f32.gmra.mrb[60].mxu1 %vm425_vm0, %v1251_v49  ;;  %3092 = vmatmul.mubr.msk.f32.gmra.mrb[24].mxu0 %vm425_vm0, %v1251_v49 }
 0x149   : > { %3024 = vmatprep.mubr.msk.f32.mxu1 %vm425_vm0, %v1252_v63  ;;  %3094 = vmatprep.mubr.msk.f32.mxu0 %vm425_vm0, %v1252_v63 }
 0x14c   : > { %3025 = vmatmul.mubr.msk.f32.gmra.mrb[62].mxu1 %vm425_vm0, %v1253_v59  ;;  %3095 = vmatmul.mubr.msk.f32.gmra.mrb[26].mxu0 %vm425_vm0, %v1253_v59 }
 0x14d   : > { %3027 = vmatprep.mubr.msk.f32.mxu1 %vm425_vm0, %v1254_v1  ;;  %3097 = vmatprep.mubr.msk.f32.mxu0 %vm425_vm0, %v1254_v1 }
 0x150   : > { %3028 = vmatmul.mubr.msk.f32.gmra.mrb[64].mxu1 %vm425_vm0, %v1255_v3  ;;  %3098 = vmatmul.mubr.msk.f32.gmra.mrb[28].mxu0 %vm425_vm0, %v1255_v3 }
 0x151   : > { %3030 = vmatprep.mubr.msk.f32.mxu1 %vm425_vm0, %v1256_v5  ;;  %3100 = vmatprep.mubr.msk.f32.mxu0 %vm425_vm0, %v1256_v5 }
 0x154   : > { %3031 = vmatmul.mubr.msk.f32.gmra.mrb[66].mxu1 %vm425_vm0, %v1257_v14  ;;  %3101 = vmatmul.mubr.msk.f32.gmra.mrb[30].mxu0 %vm425_vm0, %v1257_v14 }
 0x155   : > { %3033 = vmatprep.mubr.msk.f32.mxu1 %vm425_vm0, %v1258_v17  ;;  %3103 = vmatprep.mubr.msk.f32.mxu0 %vm425_vm0, %v1258_v17 }
 0x158   : > { %3034 = vmatmul.mubr.msk.f32.gmra.mrb[68].mxu1 %vm425_vm0, %v1259_v6  ;;  %3104 = vmatmul.mubr.msk.f32.gmra.mrb[32].mxu0 %vm425_vm0, %v1259_v6 }
 0x159   : > { %3036 = vmatprep.mubr.msk.f32.mxu1 %vm425_vm0, %v1260_v7  ;;  %3106 = vmatprep.mubr.msk.f32.mxu0 %vm425_vm0, %v1260_v7 }
 0x15c   : > { %3037 = vmatmul.mubr.msk.f32.gmra.mrb[70].mxu1 %vm425_vm0, %v1261_v22  ;;  %3107 = vmatmul.mubr.msk.f32.gmra.mrb[34].mxu0 %vm425_vm0, %v1261_v22 }
 0x1eb   : > { %v2979_v23 = vpop.f32.mrb[36].mxu1 }
 0x1ec   : > { %v1386_v24 = vpop.f32.mrb[37].mxu1 }
 0x1ef   : > { %v2982_v25 = vpop.f32.mrb[38].mxu1 }
 0x1f0   : > { %v1396_v27 = vpop.f32.mrb[39].mxu1 }
 0x1f3   : > { %v2985_v28 = vpop.f32.mrb[40].mxu1 }
 0x1f4   : > { %v3686_v30 = vpop.f32.mrb[41].mxu1 }
 0x1f7   : > { %v3688_v8 = vpop.f32.mrb[42].mxu1 }
 0x1f8   : > { %v3690_v31 = vpop.f32.mrb[43].mxu1 }
 0x1fb   : > { %v3692_v9 = vpop.f32.mrb[44].mxu1 }
 0x1fc   : > { %v3694_v32 = vpop.f32.mrb[45].mxu1 }
 0x1ff   : > { %v3696_v33 = vpop.f32.mrb[46].mxu1 }
 0x200   : > { %v3698_v34 = vpop.f32.mrb[47].mxu1 }
 0x203   : > { %v3700_v35 = vpop.f32.mrb[48].mxu1 }
 0x204   : > { %v3702_v37 = vpop.f32.mrb[49].mxu1 }
 0x207   : > { %v3704_v38 = vpop.f32.mrb[50].mxu1 }
 0x208   : > { %v3706_v40 = vpop.f32.mrb[51].mxu1 }
 0x20b   : > { %v3708_v10 = vpop.f32.mrb[52].mxu1 }
 0x20c   : > { %v3710_v41 = vpop.f32.mrb[53].mxu1 }
 0x20f   : > { %v3014_v42 = vpop.f32.mrb[54].mxu1  ;;  %v3084_v43 = vpop.f32.mrb[18].mxu0 }
 0x210   : > { %v1689_v44 = vsub.f32 %v2979_v23, %v3014_v42  ;;  %v2049_v47 = vadd.f32 %v3084_v43, %v3715_v11  ;;  %v1599_v48 = vpop.f32.mrb[55].mxu1  ;;  %v1952_v50 = vpop.f32.mrb[19].mxu0 }
 0x211   : > { %v1688_v12 = vsub.f32 %v1386_v24, %v1599_v48  ;;  %v3725_v18 = vadd.f32 %v3715_v11, %v1952_v50 }
 0x212   : > { %v1714_v51 = vadd.f32 %v3720_v45, %v1689_v44  ;;  %v2247_v54 = vadd.f32 0.01, %v2049_v47  ;;  %v2634_v15 = vadd.f32 -0.01, %v2049_v47  ;;  %vm2229_vm1 = vcmp.lt.f32.partialorder %v2049_v47, -0.01 }
 0x213   : > { %v3017_v13 = vpop.f32.mrb[56].mxu1  ;;  %v3087_v52 = vpop.f32.mrb[20].mxu0  ;;  %vm2193_vm2 = vcmp.gt.f32.partialorder %v2049_v47, 0.01  ;;  %v3728_v53 = vadd.f32 %v3720_v45, %v1688_v12  ;;  %vm2192_vm4 = vcmp.gt.f32.partialorder %v3725_v18, 0.01 }
 0x214   : > { %v1691_v55 = vsub.f32 %v2982_v25, %v3017_v13  ;;  %v1609_v20 = vpop.f32.mrb[57].mxu1  ;;  %v1962_v29 = vpop.f32.mrb[21].mxu0  ;;  %v2121_v56 = vadd.f32 0.01, %v1714_v51  ;;  %v2265_v26 = vsel %vm2229_vm1, %v2247_v54, 0.0  ;;  %v2051_v14 = vadd.f32 %v3087_v52, %v3715_v11 }
 0x215   : > { %v1690_v58 = vsub.f32 %v1396_v27, %v1609_v20  ;;  %vm2103_vm3 = vcmp.lt.f32.partialorder %v1714_v51, -0.01  ;;  %v2283_v36 = vsel %vm2193_vm2, %v2634_v15, %v2265_v26  ;;  %v2616_v46 = vadd.f32 -0.01, %v1714_v51 }
 0x216   : > { %v3731_v61 = vadd.f32 %v3720_v45, %v1691_v55  ;;  %2320 = vrot.lane.b32.xlu0 %v2283_v36, %s3226_s26  ;;  %vm2067_vm5 = vcmp.gt.f32.partialorder %v1714_v51, 0.01  ;;  %v2139_v1 = vsel %vm2103_vm3, %v2121_v56, 0.0  ;;  %v3740_v57 = vadd.f32 -0.01, %v3728_v53 }
 0x217   : > { %v3020_v39 = vpop.f32.mrb[58].mxu1  ;;  %v3090_v60 = vpop.f32.mrb[22].mxu0  ;;  %v3735_v59 = vadd.f32 %v3720_v45, %v1690_v58  ;;  %vm2102_vm6 = vcmp.lt.f32.partialorder %v3728_v53, -0.01  ;;  %v2120_v5 = vadd.f32 0.01, %v3728_v53  ;;  %v2050_v21 = vadd.f32 %v3715_v11, %v1962_v29 }
 0x218   : > { %v1619_v49 = vpop.f32.mrb[59].mxu1  ;;  %v1693_v62 = vsub.f32 %v2985_v28, %v3020_v39  ;;  %v1972_v63 = vpop.f32.mrb[23].mxu0  ;;  %v3754_v2 = vadd.f32 -0.01, %v3731_v61  ;;  %vm2105_vm7 = vcmp.lt.f32.partialorder %v3731_v61, -0.01  ;;  %v2157_v22 = vsel %vm2067_vm5, %v2616_v46, %v2139_v1 }
 0x219   : > { %v1692_v0 = vsub.f32 %v3686_v30, %v1619_v49  ;;  %v2123_v16 = vadd.f32 0.01, %v3731_v61  ;;  %v2633_v17 = vadd.f32 -0.01, %v3725_v18  ;;  %v3762_v6 = vadd.f32 -0.01, %v3735_v59 }
 0x21a   : > { %v3743_v3 = vadd.f32 %v3720_v45, %v1693_v62  ;;  %vm2104_vm8 = vcmp.lt.f32.partialorder %v3735_v59, -0.01  ;;  %v2122_v23 = vadd.f32 0.01, %v3735_v59  ;;  %vm2228_vm9 = vcmp.lt.f32.partialorder %v3725_v18, -0.01 }
 0x21b   : > { %v3023_v4 = vpop.f32.mrb[60].mxu1  ;;  %v3093_v7 = vpop.f32.mrb[24].mxu0  ;;  %v3772_v25 = vadd.f32 %v3720_v45, %v1692_v0  ;;  %2175 = vst.msk [vmem:[%s3749_s29 + $0x8] sm:$0xff] %vm425_vm0, %v2157_v22  ;;  %v3779_v27 = vsel %vm2102_vm6, %v2120_v5, 0.0  ;;  %v3783_v28 = vadd.f32 %v3090_v60, %v3715_v11  ;;  %v2246_v30 = vadd.f32 0.01, %v3725_v18 }
 0x21c   : > { %v1695_v19 = vsub.f32 %v3688_v8, %v3023_v4  ;;  %v3769_v24 = vadd.f32 -0.01, %v3743_v3  ;;  %vm2107_vm10 = vcmp.lt.f32.partialorder %v3743_v3, -0.01  ;;  %v1629_v8 = vpop.f32.mrb[61].mxu1  ;;  %v3788_v42 = vsel %vm2105_vm7, %v2123_v16, 0.0 }
 0x21d   : > { %v2636_v43 = vadd.f32 -0.01, %v2051_v14  ;;  %vm2231_vm11 = vcmp.lt.f32.partialorder %v2051_v14, -0.01  ;;  %v1694_v44 = vsub.f32 %v3690_v31, %v1629_v8  ;;  %v1982_v47 = vpop.f32.mrb[25].mxu0  ;;  %v2264_v50 = vsel %vm2228_vm9, %v2246_v30, 0.0 }
 0x21e   : > { %v2125_v48 = vadd.f32 0.01, %v3743_v3  ;;  %v2249_v12 = vadd.f32 0.01, %v2051_v14  ;;  %v3793_v51 = vadd.f32 %v3720_v45, %v1695_v19  ;;  %v3797_v52 = vsel %vm2104_vm8, %v2122_v23, 0.0 }
 0x21f   : > { %v3026_v13 = vpop.f32.mrb[62].mxu1  ;;  %v3800_v54 = vadd.f32 -0.01, %v3772_v25  ;;  %vm2106_vm12 = vcmp.lt.f32.partialorder %v3772_v25, -0.01  ;;  %v2282_v31 = vsel %vm2192_vm4, %v2633_v17, %v2264_v50  ;;  %v2052_v55 = vadd.f32 %v3715_v11, %v1972_v63  ;;  %v3807_v29 = vpop.f32.mrb[26].mxu0 }
 0x220   : > { %2318 = vrot.lane.b32.xlu0 %v2282_v31, %s3226_s26  ;;  %vm2195_vm13 = vcmp.gt.f32.partialorder %v2051_v14, 0.01  ;;  %v2267_v15 = vsel %vm2231_vm11, %v2249_v12, 0.0  ;;  %v2635_v20 = vadd.f32 -0.01, %v2050_v21  ;;  %v3810_v58 = vadd.f32 %v3720_v45, %v1694_v44  ;;  %v1639_v39 = vpop.f32.mrb[63].mxu1 }
 0x221   : > { %v2285_v56 = vsel %vm2195_vm13, %v2636_v43, %v2267_v15  ;;  %vm2230_vm14 = vcmp.lt.f32.partialorder %v2050_v21, -0.01  ;;  %v2248_v26 = vadd.f32 0.01, %v2050_v21  ;;  %v3814_v18 = vsel %vm2107_vm10, %v2125_v48, 0.0  ;;  %v1992_v46 = vpop.f32.mrb[27].mxu0 }
 0x222   : > { %v2124_v60 = vadd.f32 0.01, %v3772_v25  ;;  %2324 = vrot.lane.b32.xlu1 %v2285_v56, %s3226_s26  ;;  %vm2109_vm15 = vcmp.lt.f32.partialorder %v3793_v51, -0.01  ;;  %v1697_v36 = vsub.f32 %v3692_v9, %v3026_v13  ;;  %v2127_v49 = vadd.f32 0.01, %v3793_v51 }
 0x223   : > { %v3822_v62 = vadd.f32 %v3093_v7, %v3715_v11  ;;  %vm2194_vm1 = vcmp.gt.f32.partialorder %v2050_v21, 0.01  ;;  %v2266_v63 = vsel %vm2230_vm14, %v2248_v26, 0.0  ;;  %v2054_v0 = vadd.f32 %v3715_v11, %v1982_v47  ;;  %v3029_v17 = vpop.f32.mrb[64].mxu1  ;;  %v3099_v19 = vpop.f32.mrb[28].mxu0 }
 0x224   : > { %v2637_v1 = vadd.f32 -0.01, %v2052_v55  ;;  %vm2232_vm2 = vcmp.lt.f32.partialorder %v2052_v55, -0.01  ;;  %v2250_v4 = vadd.f32 0.01, %v2052_v55  ;;  %v2284_v14 = vsel %vm2194_vm1, %v2635_v20, %v2266_v63 }
 0x225   : > { %v2126_v5 = vadd.f32 0.01, %v3810_v58  ;;  %v3827_v16 = vadd.f32 %v3720_v45, %v1697_v36  ;;  %v1696_v9 = vsub.f32 %v3694_v32, %v1639_v39  ;;  %vm2108_vm3 = vcmp.lt.f32.partialorder %v3810_v58, -0.01  ;;  %v1649_v22 = vpop.f32.mrb[65].mxu1  ;;  %v2002_v36 = vpop.f32.mrb[29].mxu0 }
 0x226   : > { %2322 = vrot.lane.b32.xlu1 %v2284_v14, %s3226_s26  ;;  %vm2196_vm4 = vcmp.gt.f32.partialorder %v2052_v55, 0.01  ;;  %v2268_v21 = vsel %vm2232_vm2, %v2250_v4, 0.0  ;;  %v1699_v7 = vsub.f32 %v3696_v33, %v3029_v17  ;;  %v3835_v23 = vsel %vm2106_vm12, %v2124_v60, 0.0 }
 0x227   : > { %v3838_v30 = vadd.f32 -0.01, %v3793_v51  ;;  %v2286_v8 = vsel %vm2196_vm4, %v2637_v1, %v2268_v21  ;;  %v2638_v32 = vadd.f32 -0.01, %v3783_v28  ;;  %v3842_v43 = vadd.f32 -0.01, %v3810_v58 }
 0x228   : > { %2326 = vrot.lane.b32.xlu0 %v2286_v8, %s3226_s26  ;;  %v3846_v44 = vadd.f32 %v3720_v45, %v1696_v9  ;;  %vm2233_vm5 = vcmp.lt.f32.partialorder %v3783_v28, -0.01  ;;  %v2251_v33 = vadd.f32 0.01, %v3783_v28  ;;  %v3852_v47 = vsel %vm2109_vm15, %v2127_v49, 0.0  ;;  %v3032_v49 = vpop.f32.mrb[66].mxu1 }
 0x229   : > { %v3856_v48 = vsel %vm2108_vm3, %v2126_v5, 0.0  ;;  %v3859_v50 = vadd.f32 -0.01, %v3827_v16  ;;  %vm2197_vm6 = vcmp.gt.f32.partialorder %v3783_v28, 0.01  ;;  %v3863_v31 = vadd.f32 %v3720_v45, %v1699_v7  ;;  %v3102_v14 = vpop.f32.mrb[30].mxu0 }
 0x22a   : > { %v2269_v12 = vsel %vm2233_vm5, %v2251_v33, 0.0  ;;  %v2639_v13 = vadd.f32 -0.01, %v2054_v0  ;;  %vm2234_vm7 = vcmp.lt.f32.partialorder %v2054_v0, -0.01  ;;  %v2056_v26 = vadd.f32 %v3715_v11, %v1992_v46  ;;  %v2012_v46 = vpop.f32.mrb[31].mxu0 }
 0x22b   : > { %vm2111_vm8 = vcmp.lt.f32.partialorder %v3827_v16, -0.01  ;;  %v2129_v55 = vadd.f32 0.01, %v3827_v16  ;;  %v2287_v15 = vsel %vm2197_vm6, %v2638_v32, %v2269_v12  ;;  %v2252_v20 = vadd.f32 0.01, %v2054_v0 }
 0x22c   : > { %v3868_v56 = vadd.f32 -0.01, %v3846_v44  ;;  %vm2110_vm9 = vcmp.lt.f32.partialorder %v3846_v44, -0.01  ;;  %2328 = vrot.lane.b32.xlu1 %v2287_v15, %s3226_s26  ;;  %vm2198_vm10 = vcmp.gt.f32.partialorder %v2054_v0, 0.01  ;;  %v1698_v60 = vsub.f32 %v3698_v34, %v1649_v22 }
 0x22d   : > { %v2128_v28 = vadd.f32 0.01, %v3846_v44  ;;  %v2270_v39 = vsel %vm2234_vm7, %v2252_v20, 0.0  ;;  %v2057_v63 = vadd.f32 %v3807_v29, %v3715_v11  ;;  %v3878_v4 = vadd.f32 -0.01, %v3863_v31  ;;  %v1659_v0 = vpop.f32.mrb[67].mxu1 }
 0x22e   : > { %v2288_v1 = vsel %vm2198_vm10, %v2639_v13, %v2270_v39  ;;  %v2640_v5 = vadd.f32 -0.01, %v3822_v62  ;;  %v3883_v9 = vsel %vm2111_vm8, %v2129_v55, 0.0  ;;  %v3887_v34 = vadd.f32 %v3720_v45, %v1698_v60  ;;  %v3035_v55 = vpop.f32.mrb[68].mxu1  ;;  %v3105_v20 = vpop.f32.mrb[32].mxu0 }
 0x22f   : > { %2330 = vrot.lane.b32.xlu0 %v2288_v1, %s3226_s26  ;;  %vm2235_vm11 = vcmp.lt.f32.partialorder %v3822_v62, -0.01  ;;  %v2253_v29 = vadd.f32 0.01, %v3822_v62  ;;  %vm2113_vm12 = vcmp.lt.f32.partialorder %v3863_v31, -0.01  ;;  %v3894_v21 = vadd.f32 %v3099_v19, %v3715_v11 }
 0x230   : > { %v2131_v17 = vadd.f32 0.01, %v3863_v31  ;;  %v1701_v7 = vsub.f32 %v3700_v35, %v3032_v49  ;;  %v3899_v22 = vsel %vm2110_vm9, %v2128_v28, 0.0  ;;  %v2058_v8 = vadd.f32 %v3715_v11, %v2002_v36  ;;  %v1669_v28 = vpop.f32.mrb[69].mxu1 }
 0x231   : > { %v2641_v32 = vadd.f32 -0.01, %v2056_v26  ;;  %vm2236_vm13 = vcmp.lt.f32.partialorder %v2056_v26, -0.01  ;;  %vm2199_vm14 = vcmp.gt.f32.partialorder %v3822_v62, 0.01  ;;  %v1700_v35 = vsub.f32 %v3702_v37, %v1659_v0 }
 0x232   : > { %v2271_v33 = vsel %vm2235_vm11, %v2253_v29, 0.0  ;;  %v2254_v12 = vadd.f32 0.01, %v2056_v26  ;;  %v3904_v13 = vadd.f32 %v3720_v45, %v1701_v7  ;;  %v2130_v19 = vadd.f32 0.01, %v3887_v34  ;;  %v3038_v0 = vpop.f32.mrb[70].mxu1 }
 0x233   : > { %v2289_v15 = vsel %vm2199_vm14, %v2640_v5, %v2271_v33  ;;  %vm2200_vm15 = vcmp.gt.f32.partialorder %v2056_v26, 0.01  ;;  %v3910_v39 = vsel %vm2113_vm12, %v2131_v17, 0.0  ;;  %v3913_v62 = vadd.f32 -0.01, %v3887_v34  ;;  %v2022_v5 = vpop.f32.mrb[33].mxu0 }
 0x234   : > { %vm2112_vm1 = vcmp.lt.f32.partialorder %v3887_v34, -0.01  ;;  %2332 = vrot.lane.b32.xlu1 %v2289_v15, %s3226_s26  ;;  %v2272_v60 = vsel %vm2236_vm13, %v2254_v12, 0.0  ;;  %v2133_v49 = vadd.f32 0.01, %v3904_v13  ;;  %v3920_v37 = vadd.f32 %v3102_v14, %v3715_v11  ;;  %v3108_v14 = vpop.f32.mrb[34].mxu0 }
 0x235   : > { %v2290_v36 = vsel %vm2200_vm15, %v2641_v32, %v2272_v60  ;;  %v3923_v1 = vadd.f32 %v3720_v45, %v1700_v35  ;;  %v2642_v29 = vadd.f32 -0.01, %v2057_v63  ;;  %vm2237_vm2 = vcmp.lt.f32.partialorder %v2057_v63, -0.01  ;;  %v1679_v35 = vpop.f32.mrb[71].mxu1 }
 0x236   : > { %2334 = vrot.lane.b32.xlu0 %v2290_v36, %s3226_s26  ;;  %v2255_v17 = vadd.f32 0.01, %v2057_v63  ;;  %v1703_v7 = vsub.f32 %v3704_v38, %v3035_v55  ;;  %v3927_v26 = vsel %vm2112_vm1, %v2130_v19, 0.0  ;;  %vm2115_vm3 = vcmp.lt.f32.partialorder %v3904_v13, -0.01 }
 0x237   : > { %v2060_v32 = vadd.f32 %v3715_v11, %v2012_v46  ;;  %vm2201_vm4 = vcmp.gt.f32.partialorder %v2057_v63, 0.01  ;;  %vm2114_vm5 = vcmp.lt.f32.partialorder %v3923_v1, -0.01  ;;  %v2132_v33 = vadd.f32 0.01, %v3923_v1 }
 0x238   : > { %v2273_v12 = vsel %vm2237_vm2, %v2255_v17, 0.0  ;;  %v3934_v15 = vadd.f32 %v3720_v45, %v1703_v7  ;;  %vm2066_vm6 = vcmp.gt.f32.partialorder %v3728_v53, 0.01  ;;  %v3938_v38 = vadd.f32 -0.01, %v3904_v13  ;;  %v2032_v17 = vpop.f32.mrb[35].mxu0 }
 0x239   : > { %v2291_v55 = vsel %vm2201_vm4, %v2642_v29, %v2273_v12  ;;  %v2643_v19 = vadd.f32 -0.01, %v2058_v8  ;;  %vm2238_vm7 = vcmp.lt.f32.partialorder %v2058_v8, -0.01  ;;  %v3940_v46 = vsel %vm2115_vm3, %v2133_v49, 0.0 }
 0x23a   : > { %4210 = vst [vmem:[#allocation2_spill] sm:$0xff] %v3938_v38  ;;  %v3943_v63 = vadd.f32 -0.01, %v3923_v1  ;;  %2336 = vrot.lane.b32.xlu1 %v2291_v55, %s3226_s26  ;;  %v2256_v60 = vadd.f32 0.01, %v2058_v8  ;;  %v1702_v36 = vsub.f32 %v3706_v40, %v1669_v28  ;;  %v3949_v7 = vsel %vm2114_vm5, %v2132_v33, 0.0 }
 0x23b   : > { %vm2202_vm8 = vcmp.gt.f32.partialorder %v2058_v8, 0.01  ;;  %v2135_v29 = vadd.f32 0.01, %v3934_v15  ;;  %v3953_v12 = vadd.f32 %v3105_v20, %v3715_v11  ;;  %vm2069_vm9 = vcmp.gt.f32.partialorder %v3731_v61, 0.01 }
 0x23c   : > { %v2274_v49 = vsel %vm2238_vm7, %v2256_v60, 0.0  ;;  %vm2117_vm10 = vcmp.lt.f32.partialorder %v3934_v15, -0.01  ;;  %v3958_v55 = vadd.f32 %v3720_v45, %v1702_v36  ;;  %v2644_v40 = vadd.f32 -0.01, %v3894_v21 }
 0x23d   : > { %v2292_v28 = vsel %vm2202_vm8, %v2643_v19, %v2274_v49  ;;  %v3962_v33 = vadd.f32 -0.01, %v3934_v15  ;;  %vm2239_vm11 = vcmp.lt.f32.partialorder %v3894_v21, -0.01  ;;  %v2257_v8 = vadd.f32 0.01, %v3894_v21 }
 0x23e   : > { %2338 = vrot.lane.b32.xlu0 %v2292_v28, %s3226_s26  ;;  %v3968_v20 = vadd.f32 -0.01, %v3958_v55  ;;  %v3971_v60 = vadd.f32 %v3715_v11, %v2022_v5  ;;  %vm2203_vm12 = vcmp.gt.f32.partialorder %v3894_v21, 0.01  ;;  %v1705_v36 = vsub.f32 %v3708_v10, %v3038_v0 }
 0x23f   : > { %4211 = vst [vmem:[#allocation3_spill] sm:$0xff] %v3962_v33  ;;  %vm2068_vm13 = vcmp.gt.f32.partialorder %v3735_v59, 0.01  ;;  %v3976_v19 = vsel %vm2117_vm10, %v2135_v29, 0.0  ;;  %vm2116_vm14 = vcmp.lt.f32.partialorder %v3958_v55, -0.01  ;;  %v3985_v10 = vadd.f32 %v3108_v14, %v3715_v11 }
 0x240   : > { %4212 = vst [vmem:[#allocation4_spill] sm:$0xff] %v3968_v20  ;;  %v2134_v49 = vadd.f32 0.01, %v3958_v55  ;;  %v2275_v33 = vsel %vm2239_vm11, %v2257_v8, 0.0  ;;  %v2645_v38 = vadd.f32 -0.01, %v2060_v32  ;;  %v3982_v21 = vadd.f32 %v3720_v45, %v1705_v36 }
 0x241   : > { %v2293_v28 = vsel %vm2203_vm12, %v2644_v40, %v2275_v33  ;;  %vm2240_vm15 = vcmp.lt.f32.partialorder %v2060_v32, -0.01  ;;  %v2258_v20 = vadd.f32 0.01, %v2060_v32  ;;  %vm2204_vm1 = vcmp.gt.f32.partialorder %v2060_v32, 0.01 }
 0x242   : > { %2340 = vrot.lane.b32.xlu1 %v2293_v28, %s3226_s26  ;;  %v1704_v5 = vsub.f32 %v3710_v41, %v1679_v35  ;;  %vm2070_vm2 = vcmp.gt.f32.partialorder %v3772_v25, 0.01  ;;  %v3989_v0 = vsel %vm2116_vm14, %v2134_v49, 0.0  ;;  %v3992_v40 = vadd.f32 %v3715_v11, %v2032_v17 }
 0x243   : > { %v2276_v29 = vsel %vm2240_vm15, %v2258_v20, 0.0  ;;  %v2156_v32 = vsel %vm2066_vm6, %v3740_v57, %v3779_v27  ;;  %vm2119_vm3 = vcmp.lt.f32.partialorder %v3982_v21, -0.01  ;;  %vm2205_vm4 = vcmp.gt.f32.partialorder %v3920_v37, 0.01 }
 0x244   : > { %v2294_v33 = vsel %vm2204_vm1, %v2645_v38, %v2276_v29  ;;  %v2646_v41 = vadd.f32 -0.01, %v3920_v37  ;;  %2174 = vst.msk [vmem:[%s3749_s29] sm:$0xff] %vm425_vm0, %v2156_v32  ;;  %vm2071_vm5 = vcmp.gt.f32.partialorder %v3743_v3, 0.01  ;;  %v4009_v53 = vadd.f32 %v3720_v45, %v1704_v5 }
 0x245   : > { %vm2073_vm7 = vcmp.gt.f32.partialorder %v3793_v51, 0.01  ;;  %vm2072_vm8 = vcmp.gt.f32.partialorder %v3810_v58, 0.01  ;;  %2342 = vrot.lane.b32.xlu0 %v2294_v33, %s3226_s26  ;;  %v2137_v11 = vadd.f32 0.01, %v3982_v21  ;;  %v2159_v45 = vsel %vm2069_vm9, %v3754_v2, %v3788_v42 }
 0x246   : > { %vm2241_vm6 = vcmp.lt.f32.partialorder %v3920_v37, -0.01  ;;  %v2259_v57 = vadd.f32 0.01, %v3920_v37  ;;  %v4017_v27 = vadd.f32 -0.01, %v3982_v21  ;;  %v2158_v20 = vsel %vm2068_vm13, %v3762_v6, %v3797_v52 }
 0x247   : > { %vm2206_vm14 = vcmp.gt.f32.partialorder %v3971_v60, 0.01  ;;  %v2647_v14 = vadd.f32 -0.01, %v3971_v60  ;;  %v4030_v35 = vsel %vm2119_vm3, %v2137_v11, 0.0  ;;  %2177 = vst.msk [vmem:[%s3749_s29 + $0x18] sm:$0xff] %vm425_vm0, %v2159_v45  ;;  %v2161_v25 = vsel %vm2071_vm5, %v3769_v24, %v3814_v18 }
 0x248   : > { %v2631_v38 = vadd.f32 -0.01, %v4009_v53  ;;  %v2277_v17 = vsel %vm2241_vm6, %v2259_v57, 0.0  ;;  %vm2242_vm12 = vcmp.lt.f32.partialorder %v3971_v60, -0.01  ;;  %2176 = vst.msk [vmem:[%s3749_s29 + $0x10] sm:$0xff] %vm425_vm0, %v2158_v20 }
 0x249   : > { %vm2081_vm11 = vcmp.gt.f32.partialorder %v3934_v15, 0.01  ;;  %vm2080_vm9 = vcmp.gt.f32.partialorder %v3958_v55, 0.01  ;;  %vm2082_vm10 = vcmp.gt.f32.partialorder %v4009_v53, 0.01  ;;  %v2295_v2 = vsel %vm2205_vm4, %v2646_v41, %v2277_v17 }
 0x24a   : > { %vm2118_vm15 = vcmp.lt.f32.partialorder %v4009_v53, -0.01  ;;  %v2136_v61 = vadd.f32 0.01, %v4009_v53  ;;  %v2260_v42 = vadd.f32 0.01, %v3971_v60  ;;  %2344 = vrot.lane.b32.xlu1 %v2295_v2, %s3226_s26  ;;  %v2160_v60 = vsel %vm2070_vm2, %v3800_v54, %v3835_v23 }
 0x24b   : > { %vm2207_vm3 = vcmp.gt.f32.partialorder %v3953_v12, 0.01  ;;  %v2648_v8 = vadd.f32 -0.01, %v3953_v12  ;;  %vm2243_vm6 = vcmp.lt.f32.partialorder %v3953_v12, -0.01  ;;  %v2162_v54 = vsel %vm2072_vm8, %v3842_v43, %v3856_v48 }
 0x24c   : > { %v2154_v36 = vsel %vm2118_vm15, %v2136_v61, 0.0  ;;  %v2278_v37 = vsel %vm2242_vm12, %v2260_v42, 0.0  ;;  %v2261_v49 = vadd.f32 0.01, %v3953_v12  ;;  %vm2208_vm4 = vcmp.gt.f32.partialorder %v3992_v40, 0.01 }
 0x24d   : > { %v2296_v28 = vsel %vm2206_vm14, %v2647_v14, %v2278_v37  ;;  %v2649_v5 = vadd.f32 -0.01, %v3992_v40  ;;  %vm2244_vm1 = vcmp.lt.f32.partialorder %v3992_v40, -0.01  ;;  %v2262_v59 = vadd.f32 0.01, %v3992_v40 }
 0x24e   : > { %2346 = vrot.lane.b32.xlu0 %v2296_v28, %s3226_s26  ;;  %v2279_v6 = vsel %vm2243_vm6, %v2261_v49, 0.0  ;;  %vm2209_vm13 = vcmp.gt.f32.partialorder %v3985_v10, 0.01  ;;  %v2650_v52 = vadd.f32 -0.01, %v3985_v10  ;;  %2178 = vst.msk [vmem:[%s3749_s29 + $0x20] sm:$0xff] %vm425_vm0, %v2160_v60  ;;  %v2163_v23 = vsel %vm2073_vm7, %v3838_v30, %v3852_v47 }
 0x24f   : > { %v2297_v29 = vsel %vm2207_vm3, %v2648_v8, %v2279_v6  ;;  %v2280_v32 = vsel %vm2244_vm1, %v2262_v59, 0.0  ;;  %vm2245_vm12 = vcmp.lt.f32.partialorder %v3985_v10, -0.01  ;;  %v2263_v33 = vadd.f32 0.01, %v3985_v10  ;;  %2179 = vst.msk [vmem:[%s3749_s29 + $0x28] sm:$0xff] %vm425_vm0, %v2161_v25 }
 0x250   : > { %2348 = vrot.lane.b32.xlu1 %v2297_v29, %s3226_s26  ;;  %v2298_v41 = vsel %vm2208_vm4, %v2649_v5, %v2280_v32  ;;  %2180 = vst.msk [vmem:[%s3749_s29 + $0x30] sm:$0xff] %vm425_vm0, %v2162_v54  ;;  %2181 = vst.msk [vmem:[%s3749_s29 + $0x38] sm:$0xff] %vm425_vm0, %v2163_v23  ;;  %vm4213_vm2 = vcmp.gt.f32.partialorder %v3846_v44, 0.01  ;;  %vm4214_vm5 = vcmp.gt.f32.partialorder %v3827_v16, 0.01 }
 0x251   : > { %v2281_v12 = vsel %vm2245_vm12, %v2263_v33, 0.0  ;;  %v2164_v3 = vsel %vm4213_vm2, %v3868_v56, %v3899_v22  ;;  %v2165_v24 = vsel %vm4214_vm5, %v3859_v50, %v3883_v9  ;;  %vm4215_vm7 = vcmp.gt.f32.partialorder %v3887_v34, 0.01  ;;  %v4218_v30 = vld [vmem:[#allocation2_spill] sm:$0xff]  ;;  %v4220_v44 = vld [vmem:[#allocation4_spill] sm:$0xff]  ;;  %v4221_v48 = vld [vmem:[#allocation3_spill] sm:$0xff] }
 0x252   : > { %v2166_v51 = vsel %vm4215_vm7, %v3913_v62, %v3927_v26  ;;  %2350 = vrot.lane.b32.xlu0 %v2298_v41, %s3226_s26  ;;  %v2299_v58 = vsel %vm2209_vm13, %v2650_v52, %v2281_v12  ;;  %2182 = vst.msk [vmem:[%s3749_s29 + $0x40] sm:$0xff] %vm425_vm0, %v2164_v3  ;;  %2183 = vst.msk [vmem:[%s3749_s29 + $0x48] sm:$0xff] %vm425_vm0, %v2165_v24  ;;  %vm4216_vm8 = vcmp.gt.f32.partialorder %v3863_v31, 0.01  ;;  %vm4217_vm14 = vcmp.gt.f32.partialorder %v3923_v1, 0.01 }
 0x253   : > { %2184 = vst.msk [vmem:[%s3749_s29 + $0x50] sm:$0xff] %vm425_vm0, %v2166_v51  ;;  %v2167_v18 = vsel %vm4216_vm8, %v3878_v4, %v3910_v39  ;;  %v2168_v16 = vsel %vm4217_vm14, %v3943_v63, %v3949_v7  ;;  %vm4219_vm15 = vcmp.gt.f32.partialorder %v3904_v13, 0.01  ;;  %v2170_v47 = vsel %vm2080_vm9, %v4220_v44, %v3989_v0 }
 0x254   : > { %v2169_v43 = vsel %vm4219_vm15, %v4218_v30, %v3940_v46  ;;  %2185 = vst.msk [vmem:[%s3749_s29 + $0x58] sm:$0xff] %vm425_vm0, %v2167_v18  ;;  %2186 = vst.msk [vmem:[%s3749_s29 + $0x60] sm:$0xff] %vm425_vm0, %v2168_v16  ;;  %v2171_v50 = vsel %vm2081_vm11, %v4221_v48, %v3976_v19  ;;  %v2172_v31 = vsel %vm2082_vm10, %v2631_v38, %v2154_v36  ;;  %vm4222_vm1 = vcmp.gt.f32.partialorder %v3982_v21, 0.01 }
 0x255   : > { %2187 = vst.msk [vmem:[%s3749_s29 + $0x68] sm:$0xff] %vm425_vm0, %v2169_v43  ;;  %v2173_v56 = vsel %vm4222_vm1, %v4017_v27, %v4030_v35  ;;  %2352 = vrot.lane.b32.xlu1 %v2299_v58, %s3226_s26  ;;  %2188 = vst.msk [vmem:[%s3749_s29 + $0x70] sm:$0xff] %vm425_vm0, %v2170_v47  ;;  %vm2372_vm11 = vcmask 523520  }
 0x256   : > { %2189 = vst.msk [vmem:[%s3749_s29 + $0x78] sm:$0xff] %vm425_vm0, %v2171_v50  ;;  %2190 = vst.msk [vmem:[%s3749_s29 + $0x80] sm:$0xff] %vm425_vm0, %v2172_v31 }
 0x257   : > { %2191 = vst.msk [vmem:[%s3749_s29 + $0x88] sm:$0xff] %vm425_vm0, %v2173_v56 }
 0x288   : > { %v2321_v4 = vpop.permute.xlu0 %2320 }
 0x289   : > { %2374 = vst.msk [vmem:[%s3749_s29 + $0x8] sm:$0xff] %vm2372_vm11, %v2321_v4 }
 0x292   : > { %v2319_v9 = vpop.permute.xlu0 %2318 }
 0x293   : > { %2373 = vst.msk [vmem:[%s3749_s29] sm:$0xff] %vm2372_vm11, %v2319_v9 }
 0x294   : > { %v2325_v34 = vpop.permute.xlu1 %2324 }
 0x295   : > { %2376 = vst.msk [vmem:[%s3749_s29 + $0x18] sm:$0xff] %vm2372_vm11, %v2325_v34 }
 0x298   : > { %v2323_v22 = vpop.permute.xlu1 %2322 }
 0x299   : > { %2375 = vst.msk [vmem:[%s3749_s29 + $0x10] sm:$0xff] %vm2372_vm11, %v2323_v22 }
 0x29a   : > { %v2327_v13 = vpop.permute.xlu0 %2326 }
 0x29b   : > { %2377 = vst.msk [vmem:[%s3749_s29 + $0x20] sm:$0xff] %vm2372_vm11, %v2327_v13 }
 0x29e   : > { %v2329_v39 = vpop.permute.xlu1 %2328 }
 0x29f   : > { %2378 = vst.msk [vmem:[%s3749_s29 + $0x28] sm:$0xff] %vm2372_vm11, %v2329_v39 }
 0x2a1   : > { %v2331_v62 = vpop.permute.xlu0 %2330 }
 0x2a2   : > { %2379 = vst.msk [vmem:[%s3749_s29 + $0x30] sm:$0xff] %vm2372_vm11, %v2331_v62 }
 0x2a6   : > { %v2333_v1 = vpop.permute.xlu1 %2332 }
 0x2a7   : > { %2380 = vst.msk [vmem:[%s3749_s29 + $0x38] sm:$0xff] %vm2372_vm11, %v2333_v1 }
 0x2a8   : > { %v2335_v26 = vpop.permute.xlu0 %2334 }
 0x2a9   : > { %2381 = vst.msk [vmem:[%s3749_s29 + $0x40] sm:$0xff] %vm2372_vm11, %v2335_v26 }
 0x2ac   : > { %v2337_v15 = vpop.permute.xlu1 %2336 }
 0x2ad   : > { %2382 = vst.msk [vmem:[%s3749_s29 + $0x48] sm:$0xff] %vm2372_vm11, %v2337_v15 }
 0x2b0   : > { %v2339_v46 = vpop.permute.xlu0 %2338 }
 0x2b1   : > { %2383 = vst.msk [vmem:[%s3749_s29 + $0x50] sm:$0xff] %vm2372_vm11, %v2339_v46 }
 0x2b4   : > { %v2341_v63 = vpop.permute.xlu1 %2340 }
 0x2b5   : > { %2384 = vst.msk [vmem:[%s3749_s29 + $0x58] sm:$0xff] %vm2372_vm11, %v2341_v63 }
 0x2b7   : > { %v2343_v7 = vpop.permute.xlu0 %2342 }
 0x2b8   : > { %2385 = vst.msk [vmem:[%s3749_s29 + $0x60] sm:$0xff] %vm2372_vm11, %v2343_v7 }
 0x2bc   : > { %v2345_v55 = vpop.permute.xlu1 %2344 }
 0x2bd   : > { %2386 = vst.msk [vmem:[%s3749_s29 + $0x68] sm:$0xff] %vm2372_vm11, %v2345_v55 }
 0x2c0   : > { %v2347_v19 = vpop.permute.xlu0 %2346 }
 0x2c1   : > { %2387 = vst.msk [vmem:[%s3749_s29 + $0x70] sm:$0xff] %vm2372_vm11, %v2347_v19 }
 0x2c2   : > { %v2349_v21 = vpop.permute.xlu1 %2348 }
 0x2c3   : > { %2388 = vst.msk [vmem:[%s3749_s29 + $0x78] sm:$0xff] %vm2372_vm11, %v2349_v21 }
 0x2c4   : > { %v2351_v10 = vpop.permute.xlu0 %2350 }
 0x2c5   : > { %2389 = vst.msk [vmem:[%s3749_s29 + $0x80] sm:$0xff] %vm2372_vm11, %v2351_v10 }
 0x2c7   : > { %v2353_v0 = vpop.permute.xlu1 %2352 }
 0x2c8   : > { %2390 = vst.msk [vmem:[%s3749_s29 + $0x88] sm:$0xff] %vm2372_vm11, %v2353_v0 }
 0x2c9 PF: > { %s20_s13 = sadd.s32 1, %s3224_s13  }
 0x2ca   : > { %p17_p4 = scmp.ge.s32.totalorder %s20_s13, 4  }
 0x2cc   :  { %19 = sbr.rel (!%p17_p4) target bundleno = 1 (0x1), region = 93 }

// kernel: block_forward.5
= control target key start
LH: loop header
LB: loop body
LE: loop exit
PB: predicated region body
PF: predicated region fallthrough
CT: control target
= control target key end

     0   :  { %14 = vsyncpa [#allocation3], 0  ;;  %s3566_s0 = inlined_call_operand.vmem [shape: f32[512,32], index: 0, kind: input, shape index: {}]   ;;  %s3567_s1 = inlined_call_operand.vmem [shape: f32[512,32], index: 1, kind: input, shape index: {}]   ;;  %s3568_s2 = inlined_call_operand.vmem [shape: f32[512,32], index: 2, kind: input, shape index: {}]   ;;  %s3569_s3 = inlined_call_operand.vmem [shape: f32[1,32], index: 3, kind: input, shape index: {}]   ;;  %s3570_s4 = inlined_call_operand.vmem [shape: f32[1,32], index: 4, kind: input, shape index: {}]   ;;  %s3571_s5 = inlined_call_operand.vmem [shape: bf16[32,128], index: 5, kind: input, shape index: {}]   ;;  %s3572_s6 = inlined_call_operand.vmem [shape: f32[1,128], index: 6, kind: input, shape index: {}]   ;;  %s3573_s7 = inlined_call_operand.vmem [shape: bf16[128,32], index: 7, kind: input, shape index: {}]   ;;  %s3574_s8 = inlined_call_operand.vmem [shape: f32[1,32], index: 8, kind: input, shape index: {}]   ;;  %s3575_s9 = inlined_call_operand.hbm [shape: f32[512,32], index: 9, kind: output, shape index: {}]  }
   0x1   :  { %16 = vsyncpa [#allocation3 + $0x1], 0  ;;  %s2468_s30 = smov 0   ;;  %s2470_s10 = smov 0  }
   0x2   :  { %s2472_s11 = smov 0   ;;  %s2474_s12 = smov 0  }
   0x3 LB: > { %s2489_s13 = sadd.s32 4294967295, %s2413_s12   ;;  %s1983_s14 = sadd.s32 4294967294, %s2413_s12   ;;  %s2413_s12 = sphi %s2474_s12, %s3641_s12   ;;  %s2409_s11 = sphi %s2472_s11, %s3640_s11   ;;  %s2405_s10 = sphi %s2470_s10, %s3639_s10   ;;  %s2401_s30 = sphi %s2468_s30, %s3638_s30  }
   0x4   : > { %s2493_s15 = sadd.s32 1, %s2413_s12   ;;  %s233_s16 = sadd.s32 1, %s2409_s11 }
   0x5   : > { %s230_s17 = ssub.s32 %s2413_s12, %s2493_s15  ;;  %p243_p0 = scmp.ne.s32.totalorder %s2409_s11, %s2405_s10 }
   0x6   : > { %p231_p1 = scmp.eq.s32.totalorder %s230_s17, 0  ;;  %p244_p2 = scmp.eq.s32.totalorder %s2489_s13, 1 }
   0x7   : > { %p249_p3 = scmp.ne.s32.totalorder %s2405_s10, %s2401_s30  ;;  %p250_p4 = scmp.eq.s32.totalorder %s1983_s14, 1 }
   0x8   : > { %s2504_s18 = scalar_select %p231_p1, %s2409_s11, %s233_s16  }
   0x9   : > { %p2506_p5 = por %p244_p2, %p243_p0  ;;  %p2510_p6 = por %p250_p4, %p249_p3 }
   0xa   : > { %p1986_p7 = scmp.ge.s32.totalorder %s2413_s12, 1  ;;  %p313_p8 = scmp.lt.s32.totalorder %s2413_s12, 3 }
   0xc   : > { %p314_p9 = pnand %p1986_p7, %p313_p8 }
   0xe   : > { %317 = sbr.rel (%p314_p9) target bundleno = 907 (0x38b), region = 56 }
  0x15   : > { %s1988_s21 = sshll.u32 %s2489_s13, 5  ;;  %vm541_vm0 = vcmask 261120   ;;  %s2029_s27 = sshll.u32 %s2489_s13, 12 }
  0x16   : > { %p360_p10 = scmp.lt.s32.totalorder %s1988_s21, 63 }
  0x18   : > { %s3643_s21 = smov (!%p360_p10, %s1988_s21), 63 }
  0x19   : > { %s1989_s22 = sshll.u32 %s3643_s21, 3  ;;  %s2415_s21 = smov [#allocation2]  }
  0x1a   : > { %s2520_s25 = scalar_lea.vmem %s3566_s0, %s1989_s22  ;;  %s2525_s28 = scalar_lea.vmem %s3567_s1, %s1989_s22 }
  0x1b   : > { %s2530_s16 = scalar_lea.vmem %s3568_s2, %s1989_s22  ;;  %v379_v0 = vld [vmem:[%s2520_s25] sm:$0xff]  ;;  %v381_v2 = vld [vmem:[%s2520_s25 + $0x10] sm:$0xff]  ;;  %v380_v8 = vld [vmem:[%s2520_s25 + $0x8] sm:$0xff]  ;;  %s356_s22 = sand.u32 1, %s2405_s10  }
  0x1c   : > { %v411_v1 = vld [vmem:[%s2525_s28] sm:$0xff]  ;;  %v413_v5 = vld [vmem:[%s2525_s28 + $0x10] sm:$0xff]  ;;  %v412_v9 = vld [vmem:[%s2525_s28 + $0x8] sm:$0xff]  ;;  %s3525_s13 = scalar_lea.sflag [#allocation3], %s356_s22  ;;  %s2355_s23 = sshll.u32 %s2415_s21, 4  ;;  %s2356_s23 = int_to_ptr.vmem [resolvable:$false] %s2355_s23 }
  0x1d   : > { %v443_v3 = vadd.f32 %v411_v1, %v379_v0  ;;  %v475_v4 = vld [vmem:[%s2530_s16] sm:$0xff]  ;;  %v477_v6 = vld [vmem:[%s2530_s16 + $0x10] sm:$0xff]  ;;  %v445_v7 = vadd.f32 %v413_v5, %v381_v2  ;;  %v476_v10 = vld [vmem:[%s2530_s16 + $0x8] sm:$0xff]  ;;  %v444_v12 = vadd.f32 %v412_v9, %v380_v8  ;;  %s2357_s24 = scalar_lea.vmem %s2356_s23, 8192 }
  0x1e   : > { %v382_v13 = vld [vmem:[%s2520_s25 + $0x18] sm:$0xff]  ;;  %v383_v18 = vld [vmem:[%s2520_s25 + $0x20] sm:$0xff]  ;;  %v384_v24 = vld [vmem:[%s2520_s25 + $0x28] sm:$0xff] }
  0x1f   : > { %v2541_v11 = vadd.f32 %v475_v4, %v443_v3  ;;  %v414_v14 = vld [vmem:[%s2525_s28 + $0x18] sm:$0xff]  ;;  %v2546_v16 = vadd.f32 %v477_v6, %v445_v7  ;;  %v415_v19 = vld [vmem:[%s2525_s28 + $0x20] sm:$0xff]  ;;  %v2553_v22 = vadd.f32 %v476_v10, %v444_v12  ;;  %v416_v25 = vld [vmem:[%s2525_s28 + $0x28] sm:$0xff] }
  0x20   : > { %v478_v15 = vld [vmem:[%s2530_s16 + $0x18] sm:$0xff]  ;;  %v446_v17 = vadd.f32 %v414_v14, %v382_v13  ;;  %v479_v20 = vld [vmem:[%s2530_s16 + $0x20] sm:$0xff]  ;;  %v447_v23 = vadd.f32 %v415_v19, %v383_v18  ;;  %v480_v26 = vld [vmem:[%s2530_s16 + $0x28] sm:$0xff]  ;;  %v448_v29 = vadd.f32 %v416_v25, %v384_v24 }
  0x21   : > { %v542_v21 = vsel %vm541_vm0, %v2541_v11, 0.0  ;;  %v548_v27 = vsel %vm541_vm0, %v2546_v16, 0.0  ;;  %v385_v30 = vld [vmem:[%s2520_s25 + $0x30] sm:$0xff]  ;;  %v545_v32 = vsel %vm541_vm0, %v2553_v22, 0.0  ;;  %v386_v35 = vld [vmem:[%s2520_s25 + $0x38] sm:$0xff]  ;;  %v387_v41 = vld [vmem:[%s2520_s25 + $0x40] sm:$0xff] }
  0x22   : > { %543 = vadd.xlane.f32.xlu0 %v542_v21  ;;  %v2560_v28 = vadd.f32 %v478_v15, %v446_v17  ;;  %v417_v31 = vld [vmem:[%s2525_s28 + $0x30] sm:$0xff]  ;;  %549 = vadd.xlane.f32.xlu1 %v548_v27  ;;  %v2566_v33 = vadd.f32 %v479_v20, %v447_v23  ;;  %v418_v36 = vld [vmem:[%s2525_s28 + $0x38] sm:$0xff]  ;;  %v2572_v38 = vadd.f32 %v480_v26, %v448_v29  ;;  %v419_v42 = vld [vmem:[%s2525_s28 + $0x40] sm:$0xff] }
  0x23   : > { %v449_v34 = vadd.f32 %v417_v31, %v385_v30  ;;  %v481_v39 = vld [vmem:[%s2530_s16 + $0x30] sm:$0xff]  ;;  %v450_v40 = vadd.f32 %v418_v36, %v386_v35  ;;  %v482_v43 = vld [vmem:[%s2530_s16 + $0x38] sm:$0xff]  ;;  %v388_v44 = vld [vmem:[%s2520_s25 + $0x48] sm:$0xff]  ;;  %v451_v48 = vadd.f32 %v419_v42, %v387_v41 }
  0x24   : > { %v551_v37 = vsel %vm541_vm0, %v2560_v28, 0.0  ;;  %v420_v45 = vld [vmem:[%s2525_s28 + $0x48] sm:$0xff]  ;;  %v554_v46 = vsel %vm541_vm0, %v2566_v33, 0.0  ;;  %v557_v49 = vsel %vm541_vm0, %v2572_v38, 0.0  ;;  %v483_v51 = vld [vmem:[%s2530_s16 + $0x40] sm:$0xff]  ;;  %v389_v53 = vld [vmem:[%s2520_s25 + $0x50] sm:$0xff] }
  0x25   : > { %v2582_v47 = vadd.f32 %v481_v39, %v449_v34  ;;  %v2586_v50 = vadd.f32 %v482_v43, %v450_v40  ;;  %v452_v52 = vadd.f32 %v420_v45, %v388_v44  ;;  %v421_v54 = vld [vmem:[%s2525_s28 + $0x50] sm:$0xff]  ;;  %v484_v55 = vld [vmem:[%s2530_s16 + $0x48] sm:$0xff]  ;;  %v390_v56 = vld [vmem:[%s2520_s25 + $0x58] sm:$0xff]  ;;  %v2596_v59 = vadd.f32 %v483_v51, %v451_v48 }
  0x26   : > { %546 = vadd.xlane.f32.xlu0 %v545_v32  ;;  %552 = vadd.xlane.f32.xlu1 %v551_v37  ;;  %v422_v57 = vld [vmem:[%s2525_s28 + $0x58] sm:$0xff]  ;;  %v453_v60 = vadd.f32 %v421_v54, %v389_v53  ;;  %v485_v63 = vld [vmem:[%s2530_s16 + $0x50] sm:$0xff]  ;;  %v391_v1 = vld [vmem:[%s2520_s25 + $0x60] sm:$0xff] }
  0x27   : > { %v560_v58 = vsel %vm541_vm0, %v2582_v47, 0.0  ;;  %v563_v61 = vsel %vm541_vm0, %v2586_v50, 0.0  ;;  %v2600_v62 = vadd.f32 %v484_v55, %v452_v52  ;;  %v454_v0 = vadd.f32 %v422_v57, %v390_v56  ;;  %v423_v2 = vld [vmem:[%s2525_s28 + $0x60] sm:$0xff]  ;;  %v486_v3 = vld [vmem:[%s2530_s16 + $0x58] sm:$0xff]  ;;  %v392_v4 = vld [vmem:[%s2520_s25 + $0x68] sm:$0xff] }
  0x28   : > { %v424_v5 = vld [vmem:[%s2525_s28 + $0x68] sm:$0xff]  ;;  %v566_v6 = vsel %vm541_vm0, %v2596_v59, 0.0  ;;  %v2610_v7 = vadd.f32 %v485_v63, %v453_v60  ;;  %v455_v8 = vadd.f32 %v423_v2, %v391_v1  ;;  %v487_v12 = vld [vmem:[%s2530_s16 + $0x60] sm:$0xff]  ;;  %v393_v14 = vld [vmem:[%s2520_s25 + $0x70] sm:$0xff] }
  0x29   : > { %v569_v9 = vsel %vm541_vm0, %v2600_v62, 0.0  ;;  %v2614_v10 = vadd.f32 %v486_v3, %v454_v0  ;;  %v456_v13 = vadd.f32 %v424_v5, %v392_v4  ;;  %v425_v15 = vld [vmem:[%s2525_s28 + $0x70] sm:$0xff]  ;;  %v488_v17 = vld [vmem:[%s2530_s16 + $0x68] sm:$0xff]  ;;  %v394_v18 = vld [vmem:[%s2520_s25 + $0x78] sm:$0xff] }
  0x2a   : > { %555 = vadd.xlane.f32.xlu0 %v554_v46  ;;  %558 = vadd.xlane.f32.xlu1 %v557_v49  ;;  %v426_v19 = vld [vmem:[%s2525_s28 + $0x78] sm:$0xff]  ;;  %v572_v20 = vsel %vm541_vm0, %v2610_v7, 0.0  ;;  %v2624_v21 = vadd.f32 %v487_v12, %v455_v8  ;;  %v457_v23 = vadd.f32 %v425_v15, %v393_v14  ;;  %v489_v26 = vld [vmem:[%s2530_s16 + $0x70] sm:$0xff]  ;;  %v395_v29 = vld [vmem:[%s2520_s25 + $0x80] sm:$0xff] }
  0x2b   : > { %v575_v24 = vsel %vm541_vm0, %v2614_v10, 0.0  ;;  %v2628_v25 = vadd.f32 %v488_v17, %v456_v13  ;;  %v458_v27 = vadd.f32 %v426_v19, %v394_v18  ;;  %v427_v30 = vld [vmem:[%s2525_s28 + $0x80] sm:$0xff]  ;;  %v490_v31 = vld [vmem:[%s2530_s16 + $0x78] sm:$0xff]  ;;  %v396_v32 = vld [vmem:[%s2520_s25 + $0x88] sm:$0xff] }
  0x2c   : > { %3598 = vst [vmem:[#allocation5_spill] sm:$0xff] %v2624_v21  ;;  %v428_v34 = vld [vmem:[%s2525_s28 + $0x88] sm:$0xff]  ;;  %v578_v35 = vsel %vm541_vm0, %v2624_v21, 0.0  ;;  %v2638_v36 = vadd.f32 %v489_v26, %v457_v23  ;;  %v459_v37 = vadd.f32 %v427_v30, %v395_v29  ;;  %v491_v41 = vld [vmem:[%s2530_s16 + $0x80] sm:$0xff]  ;;  %v397_v43 = vld [vmem:[%s2520_s25 + $0x90] sm:$0xff] }
  0x2d   : > { %3599 = vst [vmem:[#allocation6_spill] sm:$0xff] %v2628_v25  ;;  %v581_v39 = vsel %vm541_vm0, %v2628_v25, 0.0  ;;  %v2642_v40 = vadd.f32 %v490_v31, %v458_v27  ;;  %v460_v42 = vadd.f32 %v428_v34, %v396_v32  ;;  %v429_v44 = vld [vmem:[%s2525_s28 + $0x90] sm:$0xff]  ;;  %v492_v45 = vld [vmem:[%s2530_s16 + $0x88] sm:$0xff]  ;;  %v398_v46 = vld [vmem:[%s2520_s25 + $0x98] sm:$0xff] }
  0x2e   : > { %561 = vadd.xlane.f32.xlu0 %v560_v58  ;;  %564 = vadd.xlane.f32.xlu1 %v563_v61  ;;  %3600 = vst [vmem:[#allocation7_spill] sm:$0xff] %v2638_v36  ;;  %v430_v48 = vld [vmem:[%s2525_s28 + $0x98] sm:$0xff]  ;;  %v584_v49 = vsel %vm541_vm0, %v2638_v36, 0.0  ;;  %v2652_v51 = vadd.f32 %v491_v41, %v459_v37  ;;  %v461_v52 = vadd.f32 %v429_v44, %v397_v43  ;;  %v493_v53 = vld [vmem:[%s2530_s16 + $0x90] sm:$0xff]  ;;  %v399_v55 = vld [vmem:[%s2520_s25 + $0xa0] sm:$0xff] }
  0x2f   : > { %3601 = vst [vmem:[#allocation8_spill] sm:$0xff] %v2642_v40  ;;  %v494_v54 = vld [vmem:[%s2530_s16 + $0x98] sm:$0xff]  ;;  %v587_v56 = vsel %vm541_vm0, %v2642_v40, 0.0  ;;  %v2659_v57 = vadd.f32 %v492_v45, %v460_v42  ;;  %v462_v58 = vadd.f32 %v430_v48, %v398_v46  ;;  %v431_v60 = vld [vmem:[%s2525_s28 + $0xa0] sm:$0xff]  ;;  %v400_v61 = vld [vmem:[%s2520_s25 + $0xa8] sm:$0xff] }
  0x30   : > { %3602 = vst [vmem:[#allocation9_spill] sm:$0xff] %v2652_v51  ;;  %v432_v63 = vld [vmem:[%s2525_s28 + $0xa8] sm:$0xff]  ;;  %v590_v0 = vsel %vm541_vm0, %v2652_v51, 0.0  ;;  %v2666_v1 = vadd.f32 %v493_v53, %v461_v52  ;;  %v463_v2 = vadd.f32 %v431_v60, %v399_v55  ;;  %v495_v5 = vld [vmem:[%s2530_s16 + $0xa0] sm:$0xff]  ;;  %v401_v8 = vld [vmem:[%s2520_s25 + $0xb0] sm:$0xff] }
  0x31   : > { %3603 = vst [vmem:[#allocation10_spill] sm:$0xff] %v2659_v57  ;;  %v593_v3 = vsel %vm541_vm0, %v2659_v57, 0.0  ;;  %v2670_v4 = vadd.f32 %v494_v54, %v462_v58  ;;  %v496_v12 = vld [vmem:[%s2530_s16 + $0xa8] sm:$0xff]  ;;  %v402_v13 = vld [vmem:[%s2520_s25 + $0xb8] sm:$0xff]  ;;  %v497_v23 = vld [vmem:[%s2530_s16 + $0xb0] sm:$0xff] }
  0x32   : > { %567 = vadd.xlane.f32.xlu0 %v566_v6  ;;  %570 = vadd.xlane.f32.xlu1 %v569_v9  ;;  %3604 = vst [vmem:[#allocation11_spill] sm:$0xff] %v2666_v1  ;;  %v464_v6 = vadd.f32 %v432_v63, %v400_v61  ;;  %v433_v9 = vld [vmem:[%s2525_s28 + $0xb0] sm:$0xff]  ;;  %v434_v14 = vld [vmem:[%s2525_s28 + $0xb8] sm:$0xff]  ;;  %v596_v15 = vsel %vm541_vm0, %v2666_v1, 0.0  ;;  %v2680_v17 = vadd.f32 %v495_v5, %v463_v2  ;;  %v403_v26 = vld [vmem:[%s2520_s25 + $0xc0] sm:$0xff] }
  0x33   : > { %3605 = vst [vmem:[#allocation12_spill] sm:$0xff] %v2670_v4  ;;  %v465_v18 = vadd.f32 %v433_v9, %v401_v8  ;;  %v599_v19 = vsel %vm541_vm0, %v2670_v4, 0.0  ;;  %v435_v27 = vld [vmem:[%s2525_s28 + $0xc0] sm:$0xff]  ;;  %v498_v29 = vld [vmem:[%s2530_s16 + $0xb8] sm:$0xff]  ;;  %v404_v30 = vld [vmem:[%s2520_s25 + $0xc8] sm:$0xff] }
  0x34   : > { %3606 = vst [vmem:[#allocation13_spill] sm:$0xff] %v2680_v17  ;;  %v436_v31 = vld [vmem:[%s2525_s28 + $0xc8] sm:$0xff]  ;;  %v602_v32 = vsel %vm541_vm0, %v2680_v17, 0.0  ;;  %v499_v41 = vld [vmem:[%s2530_s16 + $0xc0] sm:$0xff]  ;;  %v405_v43 = vld [vmem:[%s2520_s25 + $0xd0] sm:$0xff] }
  0x35   : > { %v2694_v34 = vadd.f32 %v497_v23, %v465_v18  ;;  %v468_v42 = vadd.f32 %v436_v31, %v404_v30  ;;  %v437_v44 = vld [vmem:[%s2525_s28 + $0xd0] sm:$0xff]  ;;  %v500_v45 = vld [vmem:[%s2530_s16 + $0xc8] sm:$0xff]  ;;  %v406_v46 = vld [vmem:[%s2520_s25 + $0xd8] sm:$0xff] }
  0x36   : > { %573 = vadd.xlane.f32.xlu0 %v572_v20  ;;  %576 = vadd.xlane.f32.xlu1 %v575_v24  ;;  %v2684_v20 = vadd.f32 %v496_v12, %v464_v6  ;;  %v466_v24 = vadd.f32 %v434_v14, %v402_v13  ;;  %v438_v48 = vld [vmem:[%s2525_s28 + $0xd8] sm:$0xff]  ;;  %v469_v53 = vadd.f32 %v437_v44, %v405_v43  ;;  %v407_v60 = vld [vmem:[%s2520_s25 + $0xe0] sm:$0xff]  ;;  %v440_v2 = vld [vmem:[%s2525_s28 + $0xe8] sm:$0xff] }
  0x37   : > { %3608 = vst [vmem:[#allocation15_spill] sm:$0xff] %v2694_v34  ;;  %v2712_v55 = vadd.f32 %v500_v45, %v468_v42  ;;  %v470_v58 = vadd.f32 %v438_v48, %v406_v46  ;;  %v439_v61 = vld [vmem:[%s2525_s28 + $0xe0] sm:$0xff]  ;;  %v502_v63 = vld [vmem:[%s2530_s16 + $0xd8] sm:$0xff]  ;;  %v409_v14 = vld [vmem:[%s2520_s25 + $0xf0] sm:$0xff] }
  0x38   : > { %3607 = vst [vmem:[#allocation14_spill] sm:$0xff] %v2684_v20  ;;  %v605_v37 = vsel %vm541_vm0, %v2684_v20, 0.0  ;;  %v471_v6 = vadd.f32 %v439_v61, %v407_v60  ;;  %v503_v12 = vld [vmem:[%s2530_s16 + $0xe0] sm:$0xff]  ;;  %v504_v18 = vld [vmem:[%s2530_s16 + $0xe8] sm:$0xff]  ;;  %v442_v23 = vld [vmem:[%s2525_s28 + $0xf8] sm:$0xff] }
  0x39   : > { %3611 = vst [vmem:[#allocation18_spill] sm:$0xff] %v2712_v55  ;;  %v617_v8 = vsel %vm541_vm0, %v2712_v55, 0.0  ;;  %v2726_v9 = vadd.f32 %v502_v63, %v470_v58  ;;  %v505_v31 = vld [vmem:[%s2530_s16 + $0xf0] sm:$0xff] }
  0x3a   : > { %579 = vadd.xlane.f32.xlu0 %v578_v35  ;;  %582 = vadd.xlane.f32.xlu1 %v581_v39  ;;  %v467_v35 = vadd.f32 %v435_v27, %v403_v26  ;;  %v2698_v39 = vadd.f32 %v498_v29, %v466_v24  ;;  %v2736_v26 = vadd.f32 %v503_v12, %v471_v6 }
  0x3b   : > { %3613 = vst [vmem:[#allocation20_spill] sm:$0xff] %v2726_v9  ;;  %v623_v29 = vsel %vm541_vm0, %v2726_v9, 0.0 }
  0x3c   : > { %3609 = vst [vmem:[#allocation16_spill] sm:$0xff] %v2698_v39  ;;  %v2708_v52 = vadd.f32 %v499_v41, %v467_v35  ;;  %v611_v54 = vsel %vm541_vm0, %v2698_v39, 0.0  ;;  %3614 = vst [vmem:[#allocation21_spill] sm:$0xff] %v2736_v26  ;;  %v506_v35 = vld [vmem:[%s2530_s16 + $0xf8] sm:$0xff] }
  0x3e   : > { %585 = vadd.xlane.f32.xlu0 %v584_v49  ;;  %588 = vadd.xlane.f32.xlu1 %v587_v56  ;;  %v608_v49 = vsel %vm541_vm0, %v2694_v34, 0.0  ;;  %3610 = vst [vmem:[#allocation17_spill] sm:$0xff] %v2708_v52  ;;  %v501_v56 = vld [vmem:[%s2530_s16 + $0xd0] sm:$0xff]  ;;  %s3512_s16 = scalar_lea.hbm %s3575_s9, %s2029_s27 }
  0x3f   : > { %v2722_v5 = vadd.f32 %v501_v56, %v469_v53 }
  0x41   : > { %3612 = vst [vmem:[#allocation19_spill] sm:$0xff] %v2722_v5  ;;  %v620_v24 = vsel %vm541_vm0, %v2722_v5, 0.0 }
  0x42   : > { %591 = vadd.xlane.f32.xlu0 %v590_v0  ;;  %594 = vadd.xlane.f32.xlu1 %v593_v3  ;;  %v408_v0 = vld [vmem:[%s2520_s25 + $0xe8] sm:$0xff]  ;;  %v614_v3 = vsel %vm541_vm0, %v2708_v52, 0.0 }
  0x43   : > { %v472_v13 = vadd.f32 %v440_v2, %v408_v0 }
  0x45   : > { %v2740_v30 = vadd.f32 %v504_v18, %v472_v13 }
  0x46   : > { %597 = vadd.xlane.f32.xlu0 %v596_v15  ;;  %600 = vadd.xlane.f32.xlu1 %v599_v19  ;;  %v441_v15 = vld [vmem:[%s2525_s28 + $0xf0] sm:$0xff]  ;;  %v410_v19 = vld [vmem:[%s2520_s25 + $0xf8] sm:$0xff]  ;;  %s1987_s25 = sshll.u32 %s356_s22, 8 }
  0x47   : > { %v473_v27 = vadd.f32 %v441_v15, %v409_v14  ;;  %3615 = vst [vmem:[#allocation22_spill] sm:$0xff] %v2740_v30  ;;  %v629_v42 = vsel %vm541_vm0, %v2740_v30, 0.0  ;;  %s3390_s26 = scalar_lea.vmem [#allocation2], %s1987_s25 }
  0x48   : > { %s1897_s28 = sshll.u32 %s3390_s26, 4  ;;  %s3514_s28 = int_to_ptr.vmem [resolvable:$true] %s1897_s28 }
  0x49   : > { %v2746_v41 = vadd.f32 %v505_v31, %v473_v27  ;;  %s2351_s17 = scalar_lea.vmem %s3514_s28, 4096  ;;  %p2358_p0 = scmp.lt.s32.totalorder %s3514_s28, %s2356_s23 }
  0x4a   : > { %603 = vadd.xlane.f32.xlu0 %v602_v32  ;;  %606 = vadd.xlane.f32.xlu1 %v605_v37  ;;  %v474_v32 = vadd.f32 %v442_v23, %v410_v19  ;;  %v626_v37 = vsel %vm541_vm0, %v2736_v26, 0.0  ;;  %p2352_p11 = scmp.ne.s32.totalorder %s3514_s28, %s2351_s17  ;;  %p2359_p1 = scmp.lt.s32.totalorder %s2357_s24, %s2351_s17 }
  0x4b   : > { %3616 = vst [vmem:[#allocation23_spill] sm:$0xff] %v2746_v41  ;;  %v632_v44 = vsel %vm541_vm0, %v2746_v41, 0.0 }
  0x4c   : > { %v2750_v43 = vadd.f32 %v506_v35, %v474_v32  ;;  %p2353_p12 = pnand %p2352_p11, %p2506_p5  ;;  %p2360_p2 = por %p2359_p1, %p2358_p0 }
  0x4e   : > { %609 = vadd.xlane.f32.xlu0 %v608_v49  ;;  %612 = vadd.xlane.f32.xlu1 %v611_v54  ;;  %3617 = vst [vmem:[#allocation24_spill] sm:$0xff] %v2750_v43  ;;  %v635_v45 = vsel %vm541_vm0, %v2750_v43, 0.0  ;;  %p2354_p13 = pneg %p2353_p12 }
  0x50   : > { %p2361_p3 = pnand %p2360_p2, %p2354_p13 }
  0x52   : > { %615 = vadd.xlane.f32.xlu0 %v614_v3  ;;  %618 = vadd.xlane.f32.xlu1 %v617_v8 }
  0x56   : > { %621 = vadd.xlane.f32.xlu0 %v620_v24  ;;  %624 = vadd.xlane.f32.xlu1 %v623_v29 }
  0x5a   : > { %627 = vadd.xlane.f32.xlu0 %v626_v37  ;;  %630 = vadd.xlane.f32.xlu1 %v629_v42 }
  0x5e   : > { %633 = vadd.xlane.f32.xlu0 %v632_v44  ;;  %636 = vadd.xlane.f32.xlu1 %v635_v45 }
  0xaf   : > { %v544_v46 = vpop.xlane.xlu0 %543  ;;  %v550_v49 = vpop.xlane.xlu1 %549 }
  0xb0   : > { %v639_v48 = vmul.f32 0.03125, %v544_v46  ;;  %v641_v53 = vmul.f32 0.03125, %v550_v49 }
  0xb2   : > { %v2757_v54 = vsub.f32 %v2541_v11, %v639_v48  ;;  %v2760_v56 = vsub.f32 %v2546_v16, %v641_v53 }
  0xb3   : > { %v547_v58 = vpop.xlane.xlu0 %546  ;;  %v553_v61 = vpop.xlane.xlu1 %552 }
  0xb4   : > { %v640_v60 = vmul.f32 0.03125, %v547_v58  ;;  %v703_v63 = vmul.f32 %v2757_v54, %v2757_v54  ;;  %v642_v0 = vmul.f32 0.03125, %v553_v61  ;;  %v705_v2 = vmul.f32 %v2760_v56, %v2760_v56 }
  0xb6   : > { %v2767_v3 = vsub.f32 %v2553_v22, %v640_v60  ;;  %v735_v6 = vsel %vm541_vm0, %v703_v63, 0.0  ;;  %v2771_v8 = vsub.f32 %v2560_v28, %v642_v0  ;;  %v741_v15 = vsel %vm541_vm0, %v705_v2, 0.0 }
  0xb7   : > { %736 = vadd.xlane.f32.xlu0 %v735_v6  ;;  %v556_v12 = vpop.xlane.xlu0 %555  ;;  %v559_v14 = vpop.xlane.xlu1 %558 }
  0xb8   : > { %v643_v13 = vmul.f32 0.03125, %v556_v12  ;;  %v704_v18 = vmul.f32 %v2767_v3, %v2767_v3  ;;  %v644_v19 = vmul.f32 0.03125, %v559_v14  ;;  %v706_v23 = vmul.f32 %v2771_v8, %v2771_v8 }
  0xba   : > { %v2779_v24 = vsub.f32 %v2566_v33, %v643_v13  ;;  %v738_v27 = vsel %vm541_vm0, %v704_v18, 0.0  ;;  %v2783_v29 = vsub.f32 %v2572_v38, %v644_v19  ;;  %v744_v37 = vsel %vm541_vm0, %v706_v23, 0.0 }
  0xbb   : > { %742 = vadd.xlane.f32.xlu0 %v741_v15  ;;  %739 = vadd.xlane.f32.xlu1 %v738_v27  ;;  %v562_v31 = vpop.xlane.xlu0 %561  ;;  %v565_v35 = vpop.xlane.xlu1 %564 }
  0xbc   : > { %v645_v32 = vmul.f32 0.03125, %v562_v31  ;;  %v707_v42 = vmul.f32 %v2779_v24, %v2779_v24  ;;  %v646_v44 = vmul.f32 0.03125, %v565_v35  ;;  %v708_v45 = vmul.f32 %v2783_v29, %v2783_v29 }
  0xbe   : > { %v2791_v46 = vsub.f32 %v2582_v47, %v645_v32  ;;  %v747_v48 = vsel %vm541_vm0, %v707_v42, 0.0  ;;  %v2795_v49 = vsub.f32 %v2586_v50, %v646_v44  ;;  %v750_v61 = vsel %vm541_vm0, %v708_v45, 0.0 }
  0xbf   : > { %745 = vadd.xlane.f32.xlu1 %v744_v37  ;;  %748 = vadd.xlane.f32.xlu0 %v747_v48  ;;  %v568_v53 = vpop.xlane.xlu0 %567  ;;  %v571_v60 = vpop.xlane.xlu1 %570 }
  0xc0   : > { %v647_v58 = vmul.f32 0.03125, %v568_v53  ;;  %v709_v63 = vmul.f32 %v2791_v46, %v2791_v46  ;;  %v648_v0 = vmul.f32 0.03125, %v571_v60  ;;  %v710_v2 = vmul.f32 %v2795_v49, %v2795_v49 }
  0xc2   : > { %v2803_v6 = vsub.f32 %v2596_v59, %v647_v58  ;;  %v753_v12 = vsel %vm541_vm0, %v709_v63, 0.0  ;;  %v2807_v13 = vsub.f32 %v2600_v62, %v648_v0  ;;  %v756_v19 = vsel %vm541_vm0, %v710_v2, 0.0 }
  0xc3   : > { %751 = vadd.xlane.f32.xlu1 %v750_v61  ;;  %754 = vadd.xlane.f32.xlu0 %v753_v12  ;;  %v574_v14 = vpop.xlane.xlu0 %573  ;;  %v577_v18 = vpop.xlane.xlu1 %576 }
  0xc4   : > { %v649_v15 = vmul.f32 0.03125, %v574_v14  ;;  %v711_v23 = vmul.f32 %v2803_v6, %v2803_v6  ;;  %v650_v27 = vmul.f32 0.03125, %v577_v18  ;;  %v712_v31 = vmul.f32 %v2807_v13, %v2807_v13 }
  0xc6   : > { %v2815_v32 = vsub.f32 %v2610_v7, %v649_v15  ;;  %v759_v35 = vsel %vm541_vm0, %v711_v23, 0.0  ;;  %v2819_v37 = vsub.f32 %v2614_v10, %v650_v27  ;;  %v762_v48 = vsel %vm541_vm0, %v712_v31, 0.0 }
  0xc7   : > { %757 = vadd.xlane.f32.xlu1 %v756_v19  ;;  %760 = vadd.xlane.f32.xlu0 %v759_v35  ;;  %v580_v42 = vpop.xlane.xlu0 %579  ;;  %v583_v45 = vpop.xlane.xlu1 %582 }
  0xc8   : > { %v651_v44 = vmul.f32 0.03125, %v580_v42  ;;  %v713_v53 = vmul.f32 %v2815_v32, %v2815_v32  ;;  %v652_v58 = vmul.f32 0.03125, %v583_v45  ;;  %v714_v60 = vmul.f32 %v2819_v37, %v2819_v37 }
  0xca   : > { %v2827_v61 = vsub.f32 %v2624_v21, %v651_v44  ;;  %v765_v63 = vsel %vm541_vm0, %v713_v53, 0.0  ;;  %v2831_v0 = vsub.f32 %v2628_v25, %v652_v58  ;;  %v768_v15 = vsel %vm541_vm0, %v714_v60, 0.0 }
  0xcb   : > { %763 = vadd.xlane.f32.xlu1 %v762_v48  ;;  %766 = vadd.xlane.f32.xlu0 %v765_v63  ;;  %v586_v2 = vpop.xlane.xlu0 %585  ;;  %v589_v14 = vpop.xlane.xlu1 %588 }
  0xcc   : > { %v653_v12 = vmul.f32 0.03125, %v586_v2  ;;  %v715_v18 = vmul.f32 %v2827_v61, %v2827_v61  ;;  %v654_v19 = vmul.f32 0.03125, %v589_v14  ;;  %v716_v23 = vmul.f32 %v2831_v0, %v2831_v0 }
  0xce   : > { %v2839_v27 = vsub.f32 %v2638_v36, %v653_v12  ;;  %v771_v31 = vsel %vm541_vm0, %v715_v18, 0.0  ;;  %v2843_v35 = vsub.f32 %v2642_v40, %v654_v19  ;;  %v774_v48 = vsel %vm541_vm0, %v716_v23, 0.0 }
  0xcf   : > { %769 = vadd.xlane.f32.xlu1 %v768_v15  ;;  %772 = vadd.xlane.f32.xlu0 %v771_v31  ;;  %v592_v42 = vpop.xlane.xlu0 %591  ;;  %v595_v45 = vpop.xlane.xlu1 %594 }
  0xd0   : > { %v655_v44 = vmul.f32 0.03125, %v592_v42  ;;  %v717_v53 = vmul.f32 %v2839_v27, %v2839_v27  ;;  %v656_v58 = vmul.f32 0.03125, %v595_v45  ;;  %v718_v60 = vmul.f32 %v2843_v35, %v2843_v35 }
  0xd2   : > { %v2851_v63 = vsub.f32 %v2652_v51, %v655_v44  ;;  %v777_v2 = vsel %vm541_vm0, %v717_v53, 0.0  ;;  %v2855_v12 = vsub.f32 %v2659_v57, %v656_v58  ;;  %v780_v19 = vsel %vm541_vm0, %v718_v60, 0.0 }
  0xd3   : > { %775 = vadd.xlane.f32.xlu1 %v774_v48  ;;  %778 = vadd.xlane.f32.xlu0 %v777_v2  ;;  %v598_v14 = vpop.xlane.xlu0 %597  ;;  %v601_v18 = vpop.xlane.xlu1 %600 }
  0xd4   : > { %v657_v15 = vmul.f32 0.03125, %v598_v14  ;;  %v719_v23 = vmul.f32 %v2851_v63, %v2851_v63  ;;  %v658_v31 = vmul.f32 0.03125, %v601_v18  ;;  %v720_v42 = vmul.f32 %v2855_v12, %v2855_v12 }
  0xd6   : > { %v2863_v44 = vsub.f32 %v2666_v1, %v657_v15  ;;  %v783_v45 = vsel %vm541_vm0, %v719_v23, 0.0  ;;  %v2867_v48 = vsub.f32 %v2670_v4, %v658_v31  ;;  %v786_v2 = vsel %vm541_vm0, %v720_v42, 0.0  ;;  %v2213_v42 = vld [vmem:[%s3571_s5] sm:$0xff]  }
  0xd7   : > { %781 = vadd.xlane.f32.xlu1 %v780_v19  ;;  %784 = vadd.xlane.f32.xlu0 %v783_v45  ;;  %v604_v53 = vpop.xlane.xlu0 %603  ;;  %v607_v60 = vpop.xlane.xlu1 %606 }
  0xd8   : > { %v659_v58 = vmul.f32 0.03125, %v604_v53  ;;  %v721_v14 = vmul.f32 %v2863_v44, %v2863_v44  ;;  %v660_v18 = vmul.f32 0.03125, %v607_v60  ;;  %v722_v15 = vmul.f32 %v2867_v48, %v2867_v48  ;;  %2072 = vmatprep.subr.bf16.mxu0 %v2213_v42 }
  0xd9   : > { %2073 = vmatpush3.bf16.msra.mxu0 %v2213_v42 }
  0xda   : > { %v2875_v57 = vsub.f32 %v2680_v17, %v659_v58  ;;  %v789_v23 = vsel %vm541_vm0, %v721_v14, 0.0  ;;  %v2879_v19 = vsub.f32 %v2684_v20, %v660_v18  ;;  %v792_v60 = vsel %vm541_vm0, %v722_v15, 0.0 }
  0xdb   : > { %787 = vadd.xlane.f32.xlu1 %v786_v2  ;;  %790 = vadd.xlane.f32.xlu0 %v789_v23  ;;  %v610_v31 = vpop.xlane.xlu0 %609  ;;  %v613_v53 = vpop.xlane.xlu1 %612 }
  0xdc   : > { %v661_v45 = vmul.f32 0.03125, %v610_v31  ;;  %v723_v58 = vmul.f32 %v2875_v57, %v2875_v57  ;;  %v662_v17 = vmul.f32 0.03125, %v613_v53  ;;  %v724_v14 = vmul.f32 %v2879_v19, %v2879_v19  ;;  %v2214_v31 = vld [vmem:[%s3571_s5 + $0x8] sm:$0xff]  }
  0xdd   : > { %2074 = vmatprep.subr.bf16.mxu0 %v2214_v31 }
  0xde   : > { %v2890_v2 = vsub.f32 %v2694_v34, %v661_v45  ;;  %v795_v18 = vsel %vm541_vm0, %v723_v58, 0.0  ;;  %v2894_v23 = vsub.f32 %v2698_v39, %v662_v17  ;;  %v798_v4 = vsel %vm541_vm0, %v724_v14, 0.0  ;;  %2075 = vmatpush3.bf16.msra.mxu0 %v2214_v31 }
  0xdf   : > { %793 = vadd.xlane.f32.xlu1 %v792_v60  ;;  %796 = vadd.xlane.f32.xlu0 %v795_v18  ;;  %v616_v15 = vpop.xlane.xlu0 %615  ;;  %v619_v20 = vpop.xlane.xlu1 %618 }
  0xe0   : > { %v663_v53 = vmul.f32 0.03125, %v616_v15  ;;  %v725_v45 = vmul.f32 %v2890_v2, %v2890_v2  ;;  %v664_v34 = vmul.f32 0.03125, %v619_v20  ;;  %v726_v42 = vmul.f32 %v2894_v23, %v2894_v23 }
  0xe2   : > { %v2905_v17 = vsub.f32 %v2708_v52, %v663_v53  ;;  %v801_v60 = vsel %vm541_vm0, %v725_v45, 0.0  ;;  %v2909_v58 = vsub.f32 %v2712_v55, %v664_v34  ;;  %v804_v20 = vsel %vm541_vm0, %v726_v42, 0.0 }
  0xe3   : > { %799 = vadd.xlane.f32.xlu1 %v798_v4  ;;  %802 = vadd.xlane.f32.xlu0 %v801_v60  ;;  %v622_v14 = vpop.xlane.xlu0 %621  ;;  %v625_v15 = vpop.xlane.xlu1 %624 }
  0xe4   : > { %v665_v18 = vmul.f32 0.03125, %v622_v14  ;;  %v727_v39 = vmul.f32 %v2905_v17, %v2905_v17  ;;  %v666_v51 = vmul.f32 0.03125, %v625_v15  ;;  %v728_v53 = vmul.f32 %v2909_v58, %v2909_v58 }
  0xe6   : > { %v2917_v45 = vsub.f32 %v2722_v5, %v665_v18  ;;  %v807_v34 = vsel %vm541_vm0, %v727_v39, 0.0  ;;  %v2921_v4 = vsub.f32 %v2726_v9, %v666_v51  ;;  %v810_v14 = vsel %vm541_vm0, %v728_v53, 0.0 }
  0xe7   : > { %805 = vadd.xlane.f32.xlu1 %v804_v20  ;;  %808 = vadd.xlane.f32.xlu0 %v807_v34  ;;  %v628_v31 = vpop.xlane.xlu0 %627  ;;  %v631_v42 = vpop.xlane.xlu1 %630 }
  0xe8   : > { %v667_v60 = vmul.f32 0.03125, %v628_v31  ;;  %v729_v15 = vmul.f32 %v2917_v45, %v2917_v45  ;;  %v668_v55 = vmul.f32 0.03125, %v631_v42  ;;  %v730_v18 = vmul.f32 %v2921_v4, %v2921_v4 }
  0xea   : > { %v2929_v52 = vsub.f32 %v2736_v26, %v667_v60  ;;  %v813_v51 = vsel %vm541_vm0, %v729_v15, 0.0  ;;  %v2933_v39 = vsub.f32 %v2740_v30, %v668_v55  ;;  %v816_v31 = vsel %vm541_vm0, %v730_v18, 0.0 }
  0xeb   : > { %811 = vadd.xlane.f32.xlu1 %v810_v14  ;;  %814 = vadd.xlane.f32.xlu0 %v813_v51  ;;  %v634_v20 = vpop.xlane.xlu0 %633  ;;  %v637_v53 = vpop.xlane.xlu1 %636 }
  0xec   : > { %v669_v34 = vmul.f32 0.03125, %v634_v20  ;;  %v731_v42 = vmul.f32 %v2929_v52, %v2929_v52  ;;  %v670_v9 = vmul.f32 0.03125, %v637_v53  ;;  %v732_v60 = vmul.f32 %v2933_v39, %v2933_v39 }
  0xee   : > { %v2941_v26 = vsub.f32 %v2746_v41, %v669_v34  ;;  %v819_v55 = vsel %vm541_vm0, %v731_v42, 0.0  ;;  %v2945_v14 = vsub.f32 %v2750_v43, %v670_v9  ;;  %v822_v15 = vsel %vm541_vm0, %v732_v60, 0.0 }
  0xef   : > { %817 = vadd.xlane.f32.xlu1 %v816_v31  ;;  %820 = vadd.xlane.f32.xlu0 %v819_v55 }
  0xf0   : > { %v733_v18 = vmul.f32 %v2941_v26, %v2941_v26  ;;  %v734_v51 = vmul.f32 %v2945_v14, %v2945_v14 }
  0xf2   : > { %v825_v20 = vsel %vm541_vm0, %v733_v18, 0.0  ;;  %v828_v34 = vsel %vm541_vm0, %v734_v51, 0.0 }
  0xf3   : > { %823 = vadd.xlane.f32.xlu1 %v822_v15  ;;  %826 = vadd.xlane.f32.xlu0 %v825_v20 }
  0xf7   : > { %829 = vadd.xlane.f32.xlu1 %v828_v34 }
 0x144   : > { %v737_v53 = vpop.xlane.xlu0 %736 }
 0x145   : > { %v831_v9 = vmul.f32 0.03125, %v737_v53 }
 0x147   : > { %v863_v42 = vadd.f32 1e-05, %v831_v9 }
 0x148   : > { %v740_v31 = vpop.xlane.xlu1 %739  ;;  %v743_v55 = vpop.xlane.xlu0 %742 }
 0x149   : > { %2223 = vrsqrt.f32 %v863_v42  ;;  %v832_v60 = vmul.f32 0.03125, %v740_v31  ;;  %v833_v30 = vmul.f32 0.03125, %v743_v55 }
 0x14b   : > { %v864_v43 = vadd.f32 1e-05, %v832_v60  ;;  %v865_v41 = vadd.f32 1e-05, %v833_v30 }
 0x14c   : > { %v746_v5 = vpop.xlane.xlu1 %745  ;;  %v749_v1 = vpop.xlane.xlu0 %748 }
 0x14d   : > { %2225 = vrsqrt.f32 %v864_v43  ;;  %v834_v25 = vmul.f32 0.03125, %v746_v5  ;;  %v835_v18 = vmul.f32 0.03125, %v749_v1 }
 0x14e   : > { %2227 = vrsqrt.f32 %v865_v41 }
 0x14f   : > { %v866_v15 = vadd.f32 1e-05, %v834_v25  ;;  %v867_v20 = vadd.f32 1e-05, %v835_v18  ;;  %v2958_v25 = vld [vmem:[%s3569_s3] ss:$0 sm:$0xff] }
 0x150   : > { %v752_v51 = vpop.xlane.xlu1 %751  ;;  %v755_v34 = vpop.xlane.xlu0 %754 }
 0x151   : > { %2229 = vrsqrt.f32 %v866_v15  ;;  %v836_v53 = vmul.f32 0.03125, %v752_v51  ;;  %v837_v9 = vmul.f32 0.03125, %v755_v34 }
 0x152   : > { %2231 = vrsqrt.f32 %v867_v20 }
 0x153   : > { %v2224_v40 = vpop.eup %2223  ;;  %v868_v42 = vadd.f32 1e-05, %v836_v53  ;;  %v869_v31 = vadd.f32 1e-05, %v837_v9 }
 0x154   : > { %v758_v55 = vpop.xlane.xlu1 %757  ;;  %v761_v60 = vpop.xlane.xlu0 %760  ;;  %v927_v30 = vmul.f32 %v2224_v40, %v2757_v54 }
 0x155   : > { %2233 = vrsqrt.f32 %v868_v42  ;;  %v838_v43 = vmul.f32 0.03125, %v758_v55  ;;  %v839_v5 = vmul.f32 0.03125, %v761_v60  ;;  %v2966_v42 = vld [vmem:[%s3570_s4] ss:$0 sm:$0xff] }
 0x156   : > { %2235 = vrsqrt.f32 %v869_v31  ;;  %v965_v53 = vmul.f32 %v2958_v25, %v927_v30 }
 0x157   : > { %v2226_v1 = vpop.eup %2225  ;;  %v870_v41 = vadd.f32 1e-05, %v838_v43  ;;  %v871_v18 = vadd.f32 1e-05, %v839_v5 }
 0x158   : > { %v2228_v15 = vpop.eup %2227  ;;  %v764_v20 = vpop.xlane.xlu1 %763  ;;  %v928_v34 = vmul.f32 %v2226_v1, %v2767_v3 }
 0x159   : > { %v767_v51 = vpop.xlane.xlu0 %766  ;;  %v929_v40 = vmul.f32 %v2228_v15, %v2760_v56  ;;  %2237 = vrsqrt.f32 %v870_v41  ;;  %v840_v54 = vmul.f32 0.03125, %v764_v20  ;;  %v1003_v56 = vadd.f32 %v2966_v42, %v965_v53 }
 0x15a   : > { %v841_v9 = vmul.f32 0.03125, %v767_v51  ;;  %2239 = vrsqrt.f32 %v871_v18  ;;  %v966_v31 = vmul.f32 %v2958_v25, %v928_v34 }
 0x15b   : > { %v2230_v55 = vpop.eup %2229  ;;  %v872_v60 = vadd.f32 1e-05, %v840_v54  ;;  %v967_v15 = vmul.f32 %v2958_v25, %v929_v40 }
 0x15c   : > { %v873_v43 = vadd.f32 1e-05, %v841_v9  ;;  %v2232_v5 = vpop.eup %2231  ;;  %v930_v3 = vmul.f32 %v2230_v55, %v2771_v8  ;;  %v770_v30 = vpop.xlane.xlu1 %769  ;;  %v1004_v41 = vadd.f32 %v2966_v42, %v966_v31 }
 0x15d   : > { %v773_v1 = vpop.xlane.xlu0 %772  ;;  %v931_v20 = vmul.f32 %v2232_v5, %v2779_v24  ;;  %2241 = vrsqrt.f32 %v872_v60  ;;  %v842_v18 = vmul.f32 0.03125, %v770_v30  ;;  %v1005_v40 = vadd.f32 %v2966_v42, %v967_v15 }
 0x15e   : > { %v843_v51 = vmul.f32 0.03125, %v773_v1  ;;  %2243 = vrsqrt.f32 %v873_v43  ;;  %v1035_v34 = vpack.c.bf16 %v1004_v41, %v1003_v56  ;;  %v968_v54 = vmul.f32 %v2958_v25, %v930_v3 }
 0x15f   : > { %v2234_v9 = vpop.eup %2233  ;;  %v874_v21 = vadd.f32 1e-05, %v842_v18  ;;  %v969_v60 = vmul.f32 %v2958_v25, %v931_v20 }
 0x160   : > { %v875_v8 = vadd.f32 1e-05, %v843_v51  ;;  %v2236_v55 = vpop.eup %2235  ;;  %v932_v36 = vmul.f32 %v2234_v9, %v2783_v29  ;;  %v776_v53 = vpop.xlane.xlu1 %775  ;;  %2076 = vmatprep.mubr.msk.bf16.mxu0 %vm541_vm0, %v1035_v34  ;;  %v1006_v24 = vadd.f32 %v2966_v42, %v968_v54 }
 0x161   : > { %v779_v31 = vpop.xlane.xlu0 %778  ;;  %v933_v43 = vmul.f32 %v2236_v55, %v2791_v46  ;;  %2245 = vrsqrt.f32 %v874_v21  ;;  %v844_v5 = vmul.f32 0.03125, %v776_v53  ;;  %v1007_v20 = vadd.f32 %v2966_v42, %v969_v60 }
 0x162   : > { %v845_v3 = vmul.f32 0.03125, %v779_v31  ;;  %2247 = vrsqrt.f32 %v875_v8  ;;  %v1036_v30 = vpack.c.bf16 %v1006_v24, %v1005_v40  ;;  %v970_v1 = vmul.f32 %v2958_v25, %v932_v36 }
 0x163   : > { %v2238_v29 = vpop.eup %2237  ;;  %v876_v56 = vadd.f32 1e-05, %v844_v5  ;;  %v971_v46 = vmul.f32 %v2958_v25, %v933_v43 }
 0x164   : > { %v877_v41 = vadd.f32 1e-05, %v845_v3  ;;  %v2240_v18 = vpop.eup %2239  ;;  %v934_v51 = vmul.f32 %v2238_v29, %v2795_v49  ;;  %v782_v15 = vpop.xlane.xlu1 %781  ;;  %2077 = vmatmul.mubr.msk.bf16.vlgmr.msra.gmra.mrb[0].mxu0 %vm541_vm0, %v1036_v30  ;;  %v1008_v21 = vadd.f32 %v2966_v42, %v970_v1 }
 0x165   : > { %v785_v34 = vpop.xlane.xlu0 %784  ;;  %v935_v54 = vmul.f32 %v2240_v18, %v2803_v6  ;;  %2249 = vrsqrt.f32 %v876_v56  ;;  %v846_v36 = vmul.f32 0.03125, %v782_v15  ;;  %v1009_v43 = vadd.f32 %v2966_v42, %v971_v46 }
 0x166   : > { %v847_v9 = vmul.f32 0.03125, %v785_v34  ;;  %2251 = vrsqrt.f32 %v877_v41  ;;  %v1037_v8 = vpack.c.bf16 %v1008_v21, %v1007_v20  ;;  %v972_v55 = vmul.f32 %v2958_v25, %v934_v51 }
 0x167   : > { %v2242_v49 = vpop.eup %2241  ;;  %v878_v53 = vadd.f32 1e-05, %v846_v36  ;;  %v973_v3 = vmul.f32 %v2958_v25, %v935_v54 }
 0x168   : > { %v879_v31 = vadd.f32 1e-05, %v847_v9  ;;  %v2244_v40 = vpop.eup %2243  ;;  %v936_v24 = vmul.f32 %v2242_v49, %v2807_v13  ;;  %v788_v60 = vpop.xlane.xlu1 %787  ;;  %2080 = vmatprep.mubr.msk.bf16.mxu0 %vm541_vm0, %v1037_v8  ;;  %v1010_v6 = vadd.f32 %v2966_v42, %v972_v55 }
 0x169   : > { %v791_v5 = vpop.xlane.xlu0 %790  ;;  %v937_v30 = vmul.f32 %v2244_v40, %v2815_v32  ;;  %2253 = vrsqrt.f32 %v878_v53  ;;  %v848_v1 = vmul.f32 0.03125, %v788_v60  ;;  %v1011_v46 = vadd.f32 %v2966_v42, %v973_v3 }
 0x16a   : > { %v849_v29 = vmul.f32 0.03125, %v791_v5  ;;  %2255 = vrsqrt.f32 %v879_v31  ;;  %v1038_v56 = vpack.c.bf16 %v1010_v6, %v1009_v43  ;;  %v974_v41 = vmul.f32 %v2958_v25, %v936_v24 }
 0x16b   : > { %v2246_v13 = vpop.eup %2245  ;;  %v880_v18 = vadd.f32 1e-05, %v848_v1  ;;  %v975_v54 = vmul.f32 %v2958_v25, %v937_v30 }
 0x16c   : > { %v881_v51 = vadd.f32 1e-05, %v849_v29  ;;  %v2248_v15 = vpop.eup %2247  ;;  %v938_v34 = vmul.f32 %v2246_v13, %v2819_v37  ;;  %v794_v20 = vpop.xlane.xlu1 %793  ;;  %2081 = vmatmul.mubr.msk.bf16.gmra.mrb[4].mxu0 %vm541_vm0, %v1038_v56  ;;  %v1012_v32 = vadd.f32 %v2966_v42, %v974_v41 }
 0x16d   : > { %v797_v21 = vpop.xlane.xlu0 %796  ;;  %v939_v36 = vmul.f32 %v2248_v15, %v2827_v61  ;;  %2257 = vrsqrt.f32 %v880_v18  ;;  %v850_v9 = vmul.f32 0.03125, %v794_v20  ;;  %v1013_v43 = vadd.f32 %v2966_v42, %v975_v54 }
 0x16e   : > { %v851_v8 = vmul.f32 0.03125, %v797_v21  ;;  %2259 = vrsqrt.f32 %v881_v51  ;;  %v1039_v55 = vpack.c.bf16 %v1012_v32, %v1011_v46  ;;  %v976_v49 = vmul.f32 %v2958_v25, %v938_v34 }
 0x16f   : > { %v2250_v37 = vpop.eup %2249  ;;  %v882_v53 = vadd.f32 1e-05, %v850_v9  ;;  %v977_v6 = vmul.f32 %v2958_v25, %v939_v36 }
 0x170   : > { %v883_v31 = vadd.f32 1e-05, %v851_v8  ;;  %v2252_v40 = vpop.eup %2251  ;;  %v940_v24 = vmul.f32 %v2250_v37, %v2831_v0  ;;  %v800_v60 = vpop.xlane.xlu1 %799  ;;  %2084 = vmatprep.mubr.msk.bf16.mxu0 %vm541_vm0, %v1039_v55  ;;  %v1014_v61 = vadd.f32 %v2966_v42, %v976_v49 }
 0x171   : > { %v803_v5 = vpop.xlane.xlu0 %802  ;;  %v941_v3 = vmul.f32 %v2252_v40, %v2839_v27  ;;  %2261 = vrsqrt.f32 %v882_v53  ;;  %v852_v30 = vmul.f32 0.03125, %v800_v60  ;;  %v1015_v20 = vadd.f32 %v2966_v42, %v977_v6 }
 0x172   : > { %v853_v1 = vmul.f32 0.03125, %v803_v5  ;;  %2263 = vrsqrt.f32 %v883_v31  ;;  %v1040_v29 = vpack.c.bf16 %v1014_v61, %v1013_v43  ;;  %v978_v56 = vmul.f32 %v2958_v25, %v940_v24 }
 0x173   : > { %v2254_v0 = vpop.eup %2253  ;;  %v884_v41 = vadd.f32 1e-05, %v852_v30  ;;  %v979_v21 = vmul.f32 %v2958_v25, %v941_v3 }
 0x174   : > { %v885_v13 = vadd.f32 1e-05, %v853_v1  ;;  %v2256_v18 = vpop.eup %2255  ;;  %v942_v51 = vmul.f32 %v2254_v0, %v2843_v35  ;;  %v806_v15 = vpop.xlane.xlu1 %805  ;;  %2085 = vmatmul.mubr.msk.bf16.gmra.mrb[8].mxu0 %vm541_vm0, %v1040_v29  ;;  %v1016_v27 = vadd.f32 %v2966_v42, %v978_v56 }
 0x175   : > { %v809_v34 = vpop.xlane.xlu0 %808  ;;  %v943_v46 = vmul.f32 %v2256_v18, %v2851_v63  ;;  %2265 = vrsqrt.f32 %v884_v41  ;;  %v854_v32 = vmul.f32 0.03125, %v806_v15  ;;  %v1017_v40 = vadd.f32 %v2966_v42, %v979_v21 }
 0x176   : > { %v855_v54 = vmul.f32 0.03125, %v809_v34  ;;  %2267 = vrsqrt.f32 %v885_v13  ;;  %v1041_v36 = vpack.c.bf16 %v1016_v27, %v1015_v20  ;;  %v980_v9 = vmul.f32 %v2958_v25, %v942_v51 }
 0x177   : > { %v2258_v35 = vpop.eup %2257  ;;  %v886_v8 = vadd.f32 1e-05, %v854_v32  ;;  %v981_v24 = vmul.f32 %v2958_v25, %v943_v46 }
 0x178   : > { %v887_v55 = vadd.f32 1e-05, %v855_v54  ;;  %v2260_v49 = vpop.eup %2259  ;;  %v944_v37 = vmul.f32 %v2258_v35, %v2855_v12  ;;  %v812_v53 = vpop.xlane.xlu1 %811  ;;  %2088 = vmatprep.mubr.msk.bf16.mxu0 %vm541_vm0, %v1041_v36  ;;  %v1018_v63 = vadd.f32 %v2966_v42, %v980_v9 }
 0x179   : > { %v815_v31 = vpop.xlane.xlu0 %814  ;;  %v945_v60 = vmul.f32 %v2260_v49, %v2863_v44  ;;  %2269 = vrsqrt.f32 %v886_v8  ;;  %v856_v5 = vmul.f32 0.03125, %v812_v53  ;;  %v1019_v41 = vadd.f32 %v2966_v42, %v981_v24 }
 0x17a   : > { %v857_v43 = vmul.f32 0.03125, %v815_v31  ;;  %2271 = vrsqrt.f32 %v887_v55  ;;  %v1042_v61 = vpack.c.bf16 %v1018_v63, %v1017_v40  ;;  %v982_v6 = vmul.f32 %v2958_v25, %v944_v37 }
 0x17b   : > { %v2262_v12 = vpop.eup %2261  ;;  %v888_v3 = vadd.f32 1e-05, %v856_v5  ;;  %v983_v13 = vmul.f32 %v2958_v25, %v945_v60 }
 0x17c   : > { %v889_v30 = vadd.f32 1e-05, %v857_v43  ;;  %v2264_v1 = vpop.eup %2263  ;;  %v946_v29 = vmul.f32 %v2262_v12, %v2867_v48  ;;  %v818_v56 = vpop.xlane.xlu1 %817  ;;  %2089 = vmatmul.mubr.msk.bf16.gmra.mrb[12].mxu0 %vm541_vm0, %v1042_v61  ;;  %v1020_v44 = vadd.f32 %v2966_v42, %v982_v6 }
 0x17d   : > { %v821_v0 = vpop.xlane.xlu0 %820  ;;  %v947_v18 = vmul.f32 %v2264_v1, %v2875_v57  ;;  %2273 = vrsqrt.f32 %v888_v3  ;;  %v858_v51 = vmul.f32 0.03125, %v818_v56  ;;  %v1021_v9 = vadd.f32 %v2966_v42, %v983_v13 }
 0x17e   : > { %v859_v15 = vmul.f32 0.03125, %v821_v0  ;;  %2275 = vrsqrt.f32 %v889_v30  ;;  %v1043_v34 = vpack.c.bf16 %v1020_v44, %v1019_v41  ;;  %v984_v20 = vmul.f32 %v2958_v25, %v946_v29 }
 0x17f   : > { %v2266_v48 = vpop.eup %2265  ;;  %v890_v27 = vadd.f32 1e-05, %v858_v51  ;;  %v985_v35 = vmul.f32 %v2958_v25, %v947_v18 }
 0x180   : > { %v891_v21 = vadd.f32 1e-05, %v859_v15  ;;  %v2268_v46 = vpop.eup %2267  ;;  %v948_v32 = vmul.f32 %v2266_v48, %v2879_v19  ;;  %v824_v54 = vpop.xlane.xlu1 %823  ;;  %2092 = vmatprep.mubr.msk.bf16.mxu0 %vm541_vm0, %v1043_v34  ;;  %v1022_v57 = vadd.f32 %v2966_v42, %v984_v20 }
 0x181   : > { %v827_v36 = vpop.xlane.xlu0 %826  ;;  %v949_v8 = vmul.f32 %v2268_v46, %v2890_v2  ;;  %2277 = vrsqrt.f32 %v890_v27  ;;  %v860_v55 = vmul.f32 0.03125, %v824_v54  ;;  %v1023_v5 = vadd.f32 %v2966_v42, %v985_v35 }
 0x182   : > { %v861_v49 = vmul.f32 0.03125, %v827_v36  ;;  %2279 = vrsqrt.f32 %v891_v21  ;;  %v1044_v37 = vpack.c.bf16 %v1022_v57, %v1021_v9  ;;  %v986_v53 = vmul.f32 %v2958_v25, %v948_v32 }
 0x183   : > { %v2270_v19 = vpop.eup %2269  ;;  %v892_v31 = vadd.f32 1e-05, %v860_v55  ;;  %v987_v43 = vmul.f32 %v2958_v25, %v949_v8 }
 0x184   : > { %v893_v40 = vadd.f32 1e-05, %v861_v49  ;;  %v2272_v63 = vpop.eup %2271  ;;  %v950_v24 = vmul.f32 %v2270_v19, %v2894_v23  ;;  %v830_v60 = vpop.xlane.xlu1 %829  ;;  %2093 = vmatmul.mubr.msk.bf16.gmra.mrb[16].mxu0 %vm541_vm0, %v1044_v37  ;;  %v1024_v2 = vadd.f32 %v2966_v42, %v986_v53 }
 0x185   : > { %v951_v61 = vmul.f32 %v2272_v63, %v2905_v17  ;;  %2281 = vrsqrt.f32 %v892_v31  ;;  %v862_v6 = vmul.f32 0.03125, %v830_v60  ;;  %v1025_v56 = vadd.f32 %v2966_v42, %v987_v43  ;;  %v2219_v63 = vld [vmem:[%s3573_s7 + $0x20] sm:$0xff]   ;;  %v2221_v60 = vld [vmem:[%s3573_s7 + $0x30] sm:$0xff]  }
 0x186   : > { %2283 = vrsqrt.f32 %v893_v40  ;;  %v1045_v12 = vpack.c.bf16 %v1024_v2, %v1023_v5  ;;  %v988_v3 = vmul.f32 %v2958_v25, %v950_v24  ;;  %v2218_v40 = vld [vmem:[%s3573_s7 + $0x18] sm:$0xff]   ;;  %v2220_v24 = vld [vmem:[%s3573_s7 + $0x28] sm:$0xff]   ;;  %v3103_v2 = vld [vmem:[%s3572_s6] ss:$0 sm:$0xff] }
 0x187   : > { %v2274_v30 = vpop.eup %2273  ;;  %v894_v1 = vadd.f32 1e-05, %v862_v6  ;;  %v989_v41 = vmul.f32 %v2958_v25, %v951_v61  ;;  %v2222_v5 = vld [vmem:[%s3573_s7 + $0x38] sm:$0xff]  }
 0x188   : > { %v2276_v23 = vpop.eup %2275  ;;  %v952_v29 = vmul.f32 %v2274_v30, %v2909_v58  ;;  %2096 = vmatprep.mubr.msk.bf16.mxu0 %vm541_vm0, %v1045_v12  ;;  %v1026_v0 = vadd.f32 %v2966_v42, %v988_v3 }
 0x189   : > { %v953_v17 = vmul.f32 %v2276_v23, %v2917_v45  ;;  %2285 = vrsqrt.f32 %v894_v1  ;;  %v1027_v58 = vadd.f32 %v2966_v42, %v989_v41 }
 0x18a   : > { %v1046_v44 = vpack.c.bf16 %v1026_v0, %v1025_v56  ;;  %v990_v13 = vmul.f32 %v2958_v25, %v952_v29 }
 0x18b   : > { %v2278_v18 = vpop.eup %2277  ;;  %v991_v20 = vmul.f32 %v2958_v25, %v953_v17 }
 0x18c   : > { %v2280_v51 = vpop.eup %2279  ;;  %v954_v15 = vmul.f32 %v2278_v18, %v2921_v4  ;;  %2097 = vmatmul.mubr.msk.bf16.gmra.mrb[20].mxu0 %vm541_vm0, %v1046_v44  ;;  %v1028_v34 = vadd.f32 %v2966_v42, %v990_v13 }
 0x18d   : > { %v955_v48 = vmul.f32 %v2280_v51, %v2929_v52  ;;  %v1029_v4 = vadd.f32 %v2966_v42, %v991_v20 }
 0x18e   : > { %v1047_v27 = vpack.c.bf16 %v1028_v34, %v1027_v58  ;;  %v992_v45 = vmul.f32 %v2958_v25, %v954_v15 }
 0x18f   : > { %v2282_v21 = vpop.eup %2281  ;;  %v993_v36 = vmul.f32 %v2958_v25, %v955_v48 }
 0x190   : > { %v2284_v46 = vpop.eup %2283  ;;  %v956_v32 = vmul.f32 %v2282_v21, %v2933_v39  ;;  %2100 = vmatprep.mubr.msk.bf16.mxu0 %vm541_vm0, %v1047_v27  ;;  %v1030_v54 = vadd.f32 %v2966_v42, %v992_v45 }
 0x191   : > { %v957_v9 = vmul.f32 %v2284_v46, %v2941_v26  ;;  %v1031_v39 = vadd.f32 %v2966_v42, %v993_v36 }
 0x192   : > { %v1048_v57 = vpack.c.bf16 %v1030_v54, %v1029_v4  ;;  %v994_v52 = vmul.f32 %v2958_v25, %v956_v32 }
 0x193   : > { %v2286_v35 = vpop.eup %2285  ;;  %v995_v49 = vmul.f32 %v2958_v25, %v957_v9 }
 0x194   : > { %v958_v8 = vmul.f32 %v2286_v35, %v2945_v14  ;;  %2101 = vmatmul.mubr.msk.bf16.gmra.mrb[24].mxu0 %vm541_vm0, %v1048_v57  ;;  %v1032_v55 = vadd.f32 %v2966_v42, %v994_v52  ;;  %v2215_v14 = vld [vmem:[%s3573_s7] sm:$0xff]  }
 0x195   : > { %v1033_v26 = vadd.f32 %v2966_v42, %v995_v49  ;;  %2108 = vmatprep.subr.bf16.mxu0 %v2215_v14  ;;  %2156 = vmatprep.subr.bf16.mxu1 %v2215_v14 }
 0x196   : > { %v1049_v37 = vpack.c.bf16 %v1032_v55, %v1031_v39  ;;  %v996_v53 = vmul.f32 %v2958_v25, %v958_v8  ;;  %2109 = vmatpush3.bf16.msra.mxu0 %v2215_v14  ;;  %2164 = vmatpush3.bf16.msra.mxu1 %v2215_v14  ;;  %v2216_v25 = vld [vmem:[%s3573_s7 + $0x8] sm:$0xff]  }
 0x197   : > { %2110 = vmatprep.subr.bf16.mxu0 %v2216_v25  ;;  %2157 = vmatprep.subr.bf16.mxu1 %v2216_v25 }
 0x198   : > { %2104 = vmatprep.mubr.msk.bf16.mxu0 %vm541_vm0, %v1049_v37  ;;  %v1034_v19 = vadd.f32 %v2966_v42, %v996_v53  ;;  %v2217_v42 = vld [vmem:[%s3573_s7 + $0x10] sm:$0xff]  }
 0x19a   : > { %v1050_v31 = vpack.c.bf16 %v1034_v19, %v1033_v26  ;;  %2111 = vmatpush3.bf16.msra.mxu0 %v2216_v25  ;;  %2165 = vmatpush3.bf16.msra.mxu1 %v2216_v25 }
 0x19b   : > { %2112 = vmatprep.subr.bf16.mxu0 %v2217_v42  ;;  %2158 = vmatprep.subr.bf16.mxu1 %v2217_v42 }
 0x19c   : > { %2105 = vmatmul.mubr.msk.bf16.gmra.mrb[28].mxu0 %vm541_vm0, %v1050_v31 }
 0x19e   : > { %2113 = vmatpush3.bf16.msra.mxu0 %v2217_v42  ;;  %2166 = vmatpush3.bf16.msra.mxu1 %v2217_v42 }
 0x19f   : > { %2114 = vmatprep.subr.bf16.mxu0 %v2218_v40  ;;  %2159 = vmatprep.subr.bf16.mxu1 %v2218_v40 }
 0x1a2   : > { %2115 = vmatpush3.bf16.msra.mxu0 %v2218_v40  ;;  %2167 = vmatpush3.bf16.msra.mxu1 %v2218_v40 }
 0x1a3   : > { %2116 = vmatprep.subr.bf16.mxu0 %v2219_v63  ;;  %2160 = vmatprep.subr.bf16.mxu1 %v2219_v63 }
 0x1a6   : > { %2117 = vmatpush3.bf16.msra.mxu0 %v2219_v63  ;;  %2168 = vmatpush3.bf16.msra.mxu1 %v2219_v63 }
 0x1a7   : > { %2118 = vmatprep.subr.bf16.mxu0 %v2220_v24  ;;  %2161 = vmatprep.subr.bf16.mxu1 %v2220_v24 }
 0x1aa   : > { %2119 = vmatpush3.bf16.msra.mxu0 %v2220_v24  ;;  %2169 = vmatpush3.bf16.msra.mxu1 %v2220_v24 }
 0x1ab   : > { %2120 = vmatprep.subr.bf16.mxu0 %v2221_v60  ;;  %2162 = vmatprep.subr.bf16.mxu1 %v2221_v60 }
 0x1ae   : > { %2121 = vmatpush3.bf16.msra.mxu0 %v2221_v60  ;;  %2170 = vmatpush3.bf16.msra.mxu1 %v2221_v60 }
 0x1af   : > { %2122 = vmatprep.subr.bf16.mxu0 %v2222_v5  ;;  %2163 = vmatprep.subr.bf16.mxu1 %v2222_v5 }
 0x1b2   : > { %2123 = vmatpush3.bf16.msra.mxu0 %v2222_v5  ;;  %2171 = vmatpush3.bf16.msra.mxu1 %v2222_v5 }
 0x237   : > { %v2078_v43 = vpop.f32.mrb[0].mxu0 }
 0x238   : > { %v3106_v61 = vadd.f32 %v2078_v43, %v3103_v2  ;;  %v1156_v6 = vpop.f32.mrb[1].mxu0 }
 0x239   : > { %v3109_v12 = vadd.f32 %v3103_v2, %v1156_v6  ;;  %v2079_v3 = vpop.f32.mrb[2].mxu0 }
 0x23a   : > { %v1317_v30 = vmul.f32 0.044715, %v3106_v61  ;;  %v3113_v1 = vadd.f32 %v2079_v3, %v3103_v2  ;;  %v1159_v23 = vpop.f32.mrb[3].mxu0 }
 0x23b   : > { %v1315_v29 = vmul.f32 0.044715, %v3109_v12  ;;  %v3117_v56 = vadd.f32 %v3103_v2, %v1159_v23 }
 0x23c   : > { %v1349_v0 = vmul.f32 %v1317_v30, %v3106_v61  ;;  %v1318_v41 = vmul.f32 0.044715, %v3113_v1 }
 0x23d   : > { %v1347_v17 = vmul.f32 %v1315_v29, %v3109_v12  ;;  %v1316_v44 = vmul.f32 0.044715, %v3117_v56 }
 0x23e   : > { %v1381_v13 = vmul.f32 %v1349_v0, %v3106_v61  ;;  %v1350_v18 = vmul.f32 %v1318_v41, %v3113_v1 }
 0x23f   : > { %v1379_v51 = vmul.f32 %v1347_v17, %v3109_v12  ;;  %v1348_v15 = vmul.f32 %v1316_v44, %v3117_v56  ;;  %v2082_v58 = vpop.f32.mrb[4].mxu0 }
 0x240   : > { %v1413_v34 = vadd.f32 %v1381_v13, %v3106_v61  ;;  %v1382_v20 = vmul.f32 %v1350_v18, %v3113_v1  ;;  %v3130_v48 = vadd.f32 %v2082_v58, %v3103_v2  ;;  %v1172_v27 = vpop.f32.mrb[5].mxu0 }
 0x241   : > { %v1380_v45 = vmul.f32 %v1348_v15, %v3117_v56  ;;  %v3134_v21 = vadd.f32 %v3103_v2, %v1172_v27  ;;  %v2083_v46 = vpop.f32.mrb[6].mxu0  ;;  %v1411_v32 = vadd.f32 %v1379_v51, %v3109_v12  ;;  %v1285_v27 = vmul.f32 0.5, %v3106_v61 }
 0x242   : > { %v1445_v4 = vmul.f32 0.7978846, %v1413_v34  ;;  %v1414_v54 = vadd.f32 %v1382_v20, %v3113_v1  ;;  %v1321_v36 = vmul.f32 0.044715, %v3130_v48  ;;  %v3140_v9 = vadd.f32 %v2083_v46, %v3103_v2  ;;  %v1175_v57 = vpop.f32.mrb[7].mxu0 }
 0x243   : > { %v1319_v52 = vmul.f32 0.044715, %v3134_v21  ;;  %v3144_v35 = vadd.f32 %v3103_v2, %v1175_v57  ;;  %v1412_v8 = vadd.f32 %v1380_v45, %v3117_v56  ;;  %v1443_v39 = vmul.f32 0.7978846, %v1411_v32 }
 0x244   : > { %2287 = vtanh.f32 %v1445_v4  ;;  %v1446_v55 = vmul.f32 0.7978846, %v1414_v54  ;;  %v1353_v49 = vmul.f32 %v1321_v36, %v3130_v48  ;;  %v1322_v37 = vmul.f32 0.044715, %v3140_v9 }
 0x245   : > { %v1320_v53 = vmul.f32 0.044715, %v3144_v35  ;;  %v1444_v26 = vmul.f32 0.7978846, %v1412_v8  ;;  %2289 = vtanh.f32 %v1443_v39  ;;  %v1351_v25 = vmul.f32 %v1319_v52, %v3134_v21 }
 0x246   : > { %2291 = vtanh.f32 %v1446_v55  ;;  %v1385_v19 = vmul.f32 %v1353_v49, %v3130_v48  ;;  %v1354_v31 = vmul.f32 %v1322_v37, %v3140_v9  ;;  %v1283_v45 = vmul.f32 0.5, %v3109_v12 }
 0x247   : > { %v2086_v14 = vpop.f32.mrb[8].mxu0  ;;  %2293 = vtanh.f32 %v1444_v26  ;;  %v1352_v42 = vmul.f32 %v1320_v53, %v3144_v35  ;;  %v1383_v43 = vmul.f32 %v1351_v25, %v3134_v21  ;;  %v1286_v52 = vmul.f32 0.5, %v3113_v1 }
 0x248   : > { %v1386_v40 = vmul.f32 %v1354_v31, %v3140_v9  ;;  %v1188_v63 = vpop.f32.mrb[9].mxu0  ;;  %v1417_v24 = vadd.f32 %v1385_v19, %v3130_v48  ;;  %v3162_v3 = vadd.f32 %v2086_v14, %v3103_v2  ;;  %v1284_v1 = vmul.f32 0.5, %v3117_v56 }
 0x249   : > { %v3157_v60 = vadd.f32 %v3103_v2, %v1188_v63  ;;  %v2087_v5 = vpop.f32.mrb[10].mxu0  ;;  %v1384_v6 = vmul.f32 %v1352_v42, %v3144_v35  ;;  %v1415_v17 = vadd.f32 %v1383_v43, %v3134_v21  ;;  %v1287_v25 = vmul.f32 0.5, %v3134_v21 }
 0x24a   : > { %v1191_v30 = vpop.f32.mrb[11].mxu0  ;;  %v1418_v23 = vadd.f32 %v1386_v40, %v3140_v9  ;;  %v1449_v29 = vmul.f32 0.7978846, %v1417_v24  ;;  %v3172_v13 = vadd.f32 %v2087_v5, %v3103_v2  ;;  %v1325_v32 = vmul.f32 0.044715, %v3162_v3 }
 0x24b   : > { %v1323_v0 = vmul.f32 0.044715, %v3157_v60  ;;  %v3167_v41 = vadd.f32 %v3103_v2, %v1191_v30  ;;  %v1416_v44 = vadd.f32 %v1384_v6, %v3144_v35  ;;  %v1447_v58 = vmul.f32 0.7978846, %v1415_v17 }
 0x24c   : > { %v1450_v18 = vmul.f32 0.7978846, %v1418_v23  ;;  %2295 = vtanh.f32 %v1449_v29  ;;  %v1326_v12 = vmul.f32 0.044715, %v3172_v13  ;;  %v1357_v42 = vmul.f32 %v1325_v32, %v3162_v3 }
 0x24d   : > { %v1355_v51 = vmul.f32 %v1323_v0, %v3157_v60  ;;  %v1324_v15 = vmul.f32 0.044715, %v3167_v41  ;;  %v1448_v34 = vmul.f32 0.7978846, %v1416_v44 }
 0x24e   : > { %v2288_v20 = vpop.eup %2287  ;;  %2297 = vtanh.f32 %v1450_v18  ;;  %v1358_v23 = vmul.f32 %v1326_v12, %v3172_v13  ;;  %v1288_v18 = vmul.f32 0.5, %v3144_v35 }
 0x24f   : > { %v2290_v46 = vpop.eup %2289  ;;  %v1356_v4 = vmul.f32 %v1324_v15, %v3167_v41  ;;  %v2090_v54 = vpop.f32.mrb[12].mxu0  ;;  %v1509_v36 = vadd.f32 1.0, %v2288_v20  ;;  %2299 = vtanh.f32 %v1447_v58  ;;  %v1387_v8 = vmul.f32 %v1355_v51, %v3157_v60 }
 0x250   : > { %v2292_v57 = vpop.eup %2291  ;;  %v1204_v39 = vpop.f32.mrb[13].mxu0  ;;  %v1507_v55 = vadd.f32 1.0, %v2290_v46  ;;  %2301 = vtanh.f32 %v1448_v34  ;;  %v3188_v19 = vadd.f32 %v2090_v54, %v3103_v2  ;;  %v1289_v34 = vmul.f32 0.5, %v3130_v48 }
 0x251   : > { %v2294_v61 = vpop.eup %2293  ;;  %v1388_v49 = vmul.f32 %v1356_v4, %v3167_v41  ;;  %v3185_v37 = vadd.f32 %v3103_v2, %v1204_v39  ;;  %v2091_v53 = vpop.f32.mrb[14].mxu0  ;;  %v1510_v26 = vadd.f32 1.0, %v2292_v57  ;;  %v1541_v63 = vmul.f32 %v1509_v36, %v1285_v27 }
 0x252   : > { %v1207_v31 = vpop.f32.mrb[15].mxu0  ;;  %v1508_v14 = vadd.f32 1.0, %v2294_v61  ;;  %v1539_v43 = vmul.f32 %v1507_v55, %v1283_v45  ;;  %v1419_v30 = vadd.f32 %v1387_v8, %v3157_v60  ;;  %v1329_v17 = vmul.f32 0.044715, %v3188_v19 }
 0x253   : > { %v3194_v40 = vadd.f32 %v3103_v2, %v1207_v31  ;;  %v1542_v24 = vmul.f32 %v1510_v26, %v1286_v52  ;;  %v1327_v5 = vmul.f32 0.044715, %v3185_v37  ;;  %v1420_v21 = vadd.f32 %v1388_v49, %v3167_v41 }
 0x254   : > { %v1540_v6 = vmul.f32 %v1508_v14, %v1284_v1  ;;  %v1451_v51 = vmul.f32 0.7978846, %v1419_v30  ;;  %v3204_v15 = vadd.f32 %v2091_v53, %v3103_v2  ;;  %v1389_v36 = vmul.f32 %v1357_v42, %v3162_v3 }
 0x255   : > { %v1328_v56 = vmul.f32 0.044715, %v3194_v40  ;;  %v1572_v29 = vpack.c.bf16 %v1542_v24, %v1541_v63  ;;  %v1452_v27 = vmul.f32 0.7978846, %v1420_v21  ;;  %v1359_v46 = vmul.f32 %v1327_v5, %v3185_v37 }
 0x256   : > { %v2296_v0 = vpop.eup %2295  ;;  %v1571_v44 = vpack.c.bf16 %v1540_v6, %v1539_v43  ;;  %2303 = vtanh.f32 %v1451_v51  ;;  %v1390_v57 = vmul.f32 %v1358_v23, %v3172_v13  ;;  %v1290_v48 = vmul.f32 0.5, %v3140_v9 }
 0x257   : > { %v2094_v58 = vpop.f32.mrb[16].mxu0  ;;  %v1513_v20 = vadd.f32 1.0, %v2296_v0  ;;  %v1360_v32 = vmul.f32 %v1328_v56, %v3194_v40  ;;  %v1361_v55 = vmul.f32 %v1329_v17, %v3188_v19  ;;  %2305 = vtanh.f32 %v1452_v27 }
 0x258   : > { %v2298_v45 = vpop.eup %2297  ;;  %v3210_v4 = vadd.f32 %v2094_v58, %v3103_v2  ;;  %v1220_v54 = vpop.f32.mrb[17].mxu0  ;;  %2124 = vmatprep.mubr.bf16.mxu0 %v1571_v44  ;;  %v1330_v53 = vmul.f32 0.044715, %v3204_v15  ;;  %v1391_v14 = vmul.f32 %v1359_v46, %v3185_v37  ;;  %v1291_v63 = vmul.f32 0.5, %v3157_v60 }
 0x259   : > { %v2300_v35 = vpop.eup %2299  ;;  %v2095_v52 = vpop.f32.mrb[18].mxu0  ;;  %2125 = vmatmul.mubr.bf16.vlgmr.msra.gmra.mrb[32].mxu0 %v1572_v29  ;;  %v1514_v8 = vadd.f32 1.0, %v2298_v45  ;;  %v3217_v61 = vadd.f32 %v3103_v2, %v1220_v54  ;;  %v1545_v31 = vmul.f32 %v1513_v20, %v1289_v34  ;;  %v1392_v42 = vmul.f32 %v1360_v32, %v3194_v40 }
 0x25a   : > { %v2302_v39 = vpop.eup %2301  ;;  %v1223_v12 = vpop.f32.mrb[19].mxu0  ;;  %v1511_v49 = vadd.f32 1.0, %v2300_v35  ;;  %v1333_v9 = vmul.f32 0.044715, %v3210_v4  ;;  %v3229_v23 = vadd.f32 %v2095_v52, %v3103_v2  ;;  %v1421_v56 = vadd.f32 %v1389_v36, %v3162_v3 }
 0x25b   : > { %v1512_v26 = vadd.f32 1.0, %v2302_v39  ;;  %v1546_v1 = vmul.f32 %v1514_v8, %v1290_v48  ;;  %v3225_v24 = vadd.f32 %v3103_v2, %v1223_v12  ;;  %v1331_v30 = vmul.f32 0.044715, %v3217_v61 }
 0x25c   : > { %v1543_v5 = vmul.f32 %v1511_v49, %v1287_v25  ;;  %v1422_v29 = vadd.f32 %v1390_v57, %v3172_v13  ;;  %v1393_v21 = vmul.f32 %v1361_v55, %v3188_v19  ;;  %v1362_v0 = vmul.f32 %v1330_v53, %v3204_v15 }
 0x25d   : > { %v1544_v43 = vmul.f32 %v1512_v26, %v1288_v18  ;;  %v1574_v6 = vpack.c.bf16 %v1546_v1, %v1545_v31  ;;  %v1292_v44 = vmul.f32 0.5, %v3167_v41  ;;  %v3240_v51 = vmul.f32 0.5, %v3162_v3 }
 0x25e   : > { %v1453_v58 = vmul.f32 0.7978846, %v1421_v56  ;;  %v1454_v34 = vmul.f32 0.7978846, %v1422_v29  ;;  %v1365_v20 = vmul.f32 %v1333_v9, %v3210_v4  ;;  %v1332_v27 = vmul.f32 0.044715, %v3225_v24 }
 0x25f   : > { %v2098_v60 = vpop.f32.mrb[20].mxu0  ;;  %v1573_v17 = vpack.c.bf16 %v1544_v43, %v1543_v5  ;;  %v1423_v41 = vadd.f32 %v1391_v14, %v3185_v37  ;;  %v1363_v54 = vmul.f32 %v1331_v30, %v3217_v61  ;;  %v1334_v35 = vmul.f32 0.044715, %v3229_v23 }
 0x260   : > { %v3237_v25 = vadd.f32 %v2098_v60, %v3103_v2  ;;  %v1236_v18 = vpop.f32.mrb[21].mxu0  ;;  %v2304_v32 = vpop.eup %2303  ;;  %2307 = vtanh.f32 %v1453_v58  ;;  %v1424_v36 = vadd.f32 %v1392_v42, %v3194_v40  ;;  %v1294_v48 = vmul.f32 0.5, %v3172_v13 }
 0x261   : > { %v3245_v45 = vadd.f32 %v3103_v2, %v1236_v18  ;;  %2128 = vmatprep.mubr.bf16.mxu1 %v1573_v17  ;;  %v2099_v46 = vpop.f32.mrb[22].mxu0  ;;  %v1515_v52 = vadd.f32 1.0, %v2304_v32  ;;  %2309 = vtanh.f32 %v1454_v34  ;;  %v2306_v8 = vpop.eup %2305  ;;  %v1394_v39 = vmul.f32 %v1362_v0, %v3204_v15 }
 0x262   : > { %2129 = vmatmul.mubr.bf16.vlgmr.msra.gmra.mrb[0].mxu1 %v1574_v6  ;;  %v1239_v3 = vpop.f32.mrb[23].mxu0  ;;  %v3252_v57 = vadd.f32 %v2099_v46, %v3103_v2  ;;  %v1337_v55 = vmul.f32 0.044715, %v3237_v25  ;;  %v1455_v12 = vmul.f32 0.7978846, %v1423_v41  ;;  %v3258_v53 = vmul.f32 %v1365_v20, %v3210_v4 }
 0x263   : > { %v1456_v49 = vmul.f32 0.7978846, %v1424_v36  ;;  %v1364_v26 = vmul.f32 %v1332_v27, %v3225_v24  ;;  %v1335_v31 = vmul.f32 0.044715, %v3245_v45  ;;  %v1516_v1 = vadd.f32 1.0, %v2306_v8 }
 0x264   : > { %v1395_v14 = vmul.f32 %v1363_v54, %v3217_v61  ;;  %v1366_v13 = vmul.f32 %v1334_v35, %v3229_v23  ;;  %v3265_v42 = vadd.f32 %v3103_v2, %v1239_v3  ;;  %2311 = vtanh.f32 %v1455_v12 }
 0x265   : > { %v1338_v9 = vmul.f32 0.044715, %v3252_v57  ;;  %v1547_v43 = vmul.f32 %v1515_v52, %v1291_v63  ;;  %v1548_v6 = vmul.f32 %v1516_v1, %v1292_v44  ;;  %2313 = vtanh.f32 %v1456_v49 }
 0x266   : > { %v1369_v30 = vmul.f32 %v1337_v55, %v3237_v25  ;;  %v1295_v0 = vmul.f32 0.5, %v3185_v37  ;;  %v1425_v60 = vadd.f32 %v1393_v21, %v3188_v19  ;;  %v1396_v17 = vmul.f32 %v1364_v26, %v3225_v24 }
 0x267   : > { %v2102_v5 = vpop.f32.mrb[24].mxu0  ;;  %v1367_v18 = vmul.f32 %v1335_v31, %v3245_v45  ;;  %v1575_v58 = vpack.c.bf16 %v1548_v6, %v1547_v43  ;;  %v1426_v63 = vadd.f32 %v1394_v39, %v3204_v15  ;;  %v1336_v44 = vmul.f32 0.044715, %v3265_v42 }
 0x268   : > { %v3270_v56 = vadd.f32 %v2102_v5, %v3103_v2  ;;  %v1252_v29 = vpop.f32.mrb[25].mxu0  ;;  %v1457_v37 = vmul.f32 0.7978846, %v1425_v60  ;;  %v1398_v21 = vmul.f32 %v1366_v13, %v3229_v23  ;;  %v1370_v41 = vmul.f32 %v1338_v9, %v3252_v57 }
 0x269   : > { %v2103_v34 = vpop.f32.mrb[26].mxu0  ;;  %v3279_v20 = vadd.f32 %v3103_v2, %v1252_v29  ;;  %2132 = vmatprep.mubr.bf16.mxu1 %v1575_v58  ;;  %v1296_v32 = vmul.f32 0.5, %v3194_v40  ;;  %v1458_v54 = vmul.f32 0.7978846, %v1426_v63  ;;  %v3288_v3 = vmul.f32 %v1369_v30, %v3237_v25 }
 0x26a   : > { %v3282_v27 = vadd.f32 %v2103_v34, %v3103_v2  ;;  %v1255_v46 = vpop.f32.mrb[27].mxu0  ;;  %v2308_v35 = vpop.eup %2307  ;;  %v3291_v36 = vmul.f32 0.5, %v3188_v19  ;;  %2315 = vtanh.f32 %v1457_v37  ;;  %v1427_v52 = vadd.f32 %v1395_v14, %v3217_v61 }
 0x26b   : > { %v2310_v8 = vpop.eup %2309  ;;  %v3295_v39 = vmul.f32 %v1367_v18, %v3245_v45  ;;  %v1341_v55 = vmul.f32 0.044715, %v3270_v56  ;;  %v1517_v12 = vadd.f32 1.0, %v2308_v35  ;;  %2317 = vtanh.f32 %v1458_v54 }
 0x26c   : > { %v1368_v40 = vmul.f32 %v1336_v44, %v3265_v42  ;;  %v1339_v49 = vmul.f32 0.044715, %v3279_v20  ;;  %v1518_v26 = vadd.f32 1.0, %v2310_v8  ;;  %v1428_v31 = vadd.f32 %v1396_v17, %v3225_v24 }
 0x26d   : > { %v1402_v19 = vmul.f32 %v1370_v41, %v3252_v57  ;;  %v1342_v1 = vmul.f32 0.044715, %v3282_v27  ;;  %v3304_v14 = vadd.f32 %v3103_v2, %v1255_v46  ;;  %v1459_v9 = vmul.f32 0.7978846, %v1427_v52 }
 0x26e   : > { %v2312_v5 = vpop.eup %2311  ;;  %v1549_v43 = vmul.f32 %v1517_v12, %v3240_v51  ;;  %v1550_v6 = vmul.f32 %v1518_v26, %v1294_v48  ;;  %v1460_v60 = vmul.f32 0.7978846, %v1428_v31  ;;  %v1373_v17 = vmul.f32 %v1341_v55, %v3270_v56 }
 0x26f   : > { %v2106_v13 = vpop.f32.mrb[28].mxu0  ;;  %v2314_v18 = vpop.eup %2313  ;;  %v1519_v34 = vadd.f32 1.0, %v2312_v5  ;;  %2319 = vtanh.f32 %v1459_v9  ;;  %v1371_v44 = vmul.f32 %v1339_v49, %v3279_v20  ;;  %v1340_v41 = vmul.f32 0.044715, %v3304_v14 }
 0x270   : > { %v3308_v30 = vadd.f32 %v2106_v13, %v3103_v2  ;;  %v1268_v29 = vpop.f32.mrb[29].mxu0  ;;  %v1576_v46 = vpack.c.bf16 %v1550_v6, %v1549_v43  ;;  %v1520_v37 = vadd.f32 1.0, %v2314_v18  ;;  %v1298_v54 = vmul.f32 0.5, %v3204_v15 }
 0x271   : > { %v3312_v58 = vadd.f32 %v3103_v2, %v1268_v29  ;;  %v2107_v63 = vpop.f32.mrb[30].mxu0  ;;  %2321 = vtanh.f32 %v1460_v60  ;;  %v1400_v52 = vmul.f32 %v1368_v40, %v3265_v42  ;;  %v1374_v8 = vmul.f32 %v1342_v1, %v3282_v27 }
 0x272   : > { %v3316_v51 = vadd.f32 %v2107_v63, %v3103_v2  ;;  %v1271_v48 = vpop.f32.mrb[31].mxu0  ;;  %2133 = vmatmul.mubr.bf16.gmra.mrb[4].mxu1 %v1576_v46  ;;  %v1551_v55 = vmul.f32 %v1519_v34, %v1295_v0  ;;  %v1552_v12 = vmul.f32 %v1520_v37, %v1296_v32  ;;  %v1299_v26 = vmul.f32 0.5, %v3217_v61 }
 0x273   : > { %v3321_v35 = vadd.f32 %v3103_v2, %v1271_v48  ;;  %v1343_v49 = vmul.f32 0.044715, %v3312_v58  ;;  %v1300_v31 = vmul.f32 0.5, %v3225_v24  ;;  %v1429_v15 = vadd.f32 %v3258_v53, %v3210_v4 }
 0x274   : > { %v2316_v13 = vpop.eup %2315  ;;  %v1405_v2 = vmul.f32 %v1373_v17, %v3270_v56  ;;  %v1403_v9 = vmul.f32 %v1371_v44, %v3279_v20  ;;  %v1577_v40 = vpack.c.bf16 %v1552_v12, %v1551_v55  ;;  %v1430_v1 = vadd.f32 %v1398_v21, %v3229_v23 }
 0x275   : > { %v2318_v5 = vpop.eup %2317  ;;  %v1372_v0 = vmul.f32 %v1340_v41, %v3304_v14  ;;  %v1521_v32 = vadd.f32 1.0, %v2316_v13  ;;  %v1344_v43 = vmul.f32 0.044715, %v3321_v35  ;;  %v1461_v61 = vmul.f32 0.7978846, %v1429_v15 }
 0x276   : > { %v1406_v24 = vmul.f32 %v1374_v8, %v3282_v27  ;;  %v1345_v6 = vmul.f32 0.044715, %v3308_v30  ;;  %2136 = vmatprep.mubr.bf16.mxu1 %v1577_v40  ;;  %v1522_v53 = vadd.f32 1.0, %v2318_v5  ;;  %v1462_v29 = vmul.f32 0.7978846, %v1430_v1 }
 0x277   : > { %v1375_v60 = vmul.f32 %v1343_v49, %v3312_v58  ;;  %v1346_v18 = vmul.f32 0.044715, %v3316_v51  ;;  %v1553_v21 = vmul.f32 %v1521_v32, %v3291_v36  ;;  %2323 = vtanh.f32 %v1461_v61 }
 0x278   : > { %v1554_v17 = vmul.f32 %v1522_v53, %v1298_v54  ;;  %2325 = vtanh.f32 %v1462_v29  ;;  %v1431_v34 = vadd.f32 %v3295_v39, %v3245_v45  ;;  %v1432_v63 = vadd.f32 %v1400_v52, %v3265_v42 }
 0x279   : > { %v2320_v44 = vpop.eup %2319  ;;  %v1404_v46 = vmul.f32 %v1372_v0, %v3304_v14  ;;  %v1376_v37 = vmul.f32 %v1344_v43, %v3321_v35  ;;  %v1433_v48 = vadd.f32 %v3288_v3, %v3237_v25  ;;  %v1434_v41 = vadd.f32 %v1402_v19, %v3252_v57 }
 0x27a   : > { %v1578_v8 = vpack.c.bf16 %v1554_v17, %v1553_v21  ;;  %v1523_v36 = vadd.f32 1.0, %v2320_v44  ;;  %v1463_v55 = vmul.f32 0.7978846, %v1431_v34  ;;  %v1464_v54 = vmul.f32 0.7978846, %v1432_v63 }
 0x27b   : > { %v2322_v12 = vpop.eup %2321  ;;  %v1377_v49 = vmul.f32 %v1345_v6, %v3308_v30  ;;  %v1378_v39 = vmul.f32 %v1346_v18, %v3316_v51  ;;  %v1465_v52 = vmul.f32 0.7978846, %v1433_v48  ;;  %v1466_v15 = vmul.f32 0.7978846, %v1434_v41 }
 0x27c   : > { %v1407_v13 = vmul.f32 %v1375_v60, %v3312_v58  ;;  %2137 = vmatmul.mubr.bf16.gmra.mrb[8].mxu1 %v1578_v8  ;;  %v1524_v40 = vadd.f32 1.0, %v2322_v12  ;;  %2327 = vtanh.f32 %v1463_v55  ;;  %v1435_v3 = vadd.f32 %v1403_v9, %v3279_v20 }
 0x27d   : > { %v1408_v19 = vmul.f32 %v1376_v37, %v3321_v35  ;;  %v1555_v1 = vmul.f32 %v1523_v36, %v1299_v26  ;;  %2329 = vtanh.f32 %v1464_v54  ;;  %v1436_v5 = vadd.f32 %v1404_v46, %v3304_v14 }
 0x27e   : > { %v1556_v0 = vmul.f32 %v1524_v40, %v1300_v31  ;;  %2331 = vtanh.f32 %v1465_v52  ;;  %v1467_v32 = vmul.f32 0.7978846, %v1435_v3  ;;  %v1437_v43 = vadd.f32 %v1405_v2, %v3270_v56 }
 0x27f   : > { %v1409_v61 = vmul.f32 %v1377_v49, %v3308_v30  ;;  %2333 = vtanh.f32 %v1466_v15  ;;  %v1468_v6 = vmul.f32 0.7978846, %v1436_v5  ;;  %v1438_v53 = vadd.f32 %v1406_v24, %v3282_v27 }
 0x280   : > { %v1410_v29 = vmul.f32 %v1378_v39, %v3316_v51  ;;  %v1579_v9 = vpack.c.bf16 %v1556_v0, %v1555_v1  ;;  %2335 = vtanh.f32 %v1467_v32  ;;  %v1469_v60 = vmul.f32 0.7978846, %v1437_v43 }
 0x281   : > { %v2324_v26 = vpop.eup %2323  ;;  %2337 = vtanh.f32 %v1468_v6  ;;  %v1470_v18 = vmul.f32 0.7978846, %v1438_v53  ;;  %v1439_v31 = vadd.f32 %v1407_v13, %v3312_v58  ;;  %v1440_v21 = vadd.f32 %v1408_v19, %v3321_v35 }
 0x282   : > { %v2326_v17 = vpop.eup %2325  ;;  %2140 = vmatprep.mubr.bf16.mxu1 %v1579_v9  ;;  %v1301_v2 = vmul.f32 0.5, %v3210_v4  ;;  %v1302_v34 = vmul.f32 0.5, %v3229_v23  ;;  %v1525_v63 = vadd.f32 1.0, %v2324_v26  ;;  %2339 = vtanh.f32 %v1469_v60 }
 0x283   : > { %v1526_v24 = vadd.f32 1.0, %v2326_v17  ;;  %2341 = vtanh.f32 %v1470_v18  ;;  %v1471_v44 = vmul.f32 0.7978846, %v1439_v31  ;;  %v1472_v46 = vmul.f32 0.7978846, %v1440_v21 }
 0x284   : > { %v1441_v37 = vadd.f32 %v1409_v61, %v3308_v30  ;;  %v1442_v48 = vadd.f32 %v1410_v29, %v3316_v51  ;;  %v1557_v41 = vmul.f32 %v1525_v63, %v1301_v2  ;;  %v1303_v39 = vmul.f32 0.5, %v3245_v45 }
 0x285   : > { %v1558_v8 = vmul.f32 %v1526_v24, %v1302_v34  ;;  %2343 = vtanh.f32 %v1471_v44  ;;  %v1304_v52 = vmul.f32 0.5, %v3265_v42  ;;  %v1305_v40 = vmul.f32 0.5, %v3237_v25 }
 0x286   : > { %v2328_v36 = vpop.eup %2327  ;;  %2345 = vtanh.f32 %v1472_v46  ;;  %v1473_v55 = vmul.f32 0.7978846, %v1441_v37  ;;  %v1474_v54 = vmul.f32 0.7978846, %v1442_v48  ;;  %v1306_v0 = vmul.f32 0.5, %v3252_v57 }
 0x287   : > { %v2330_v4 = vpop.eup %2329  ;;  %v1580_v12 = vpack.c.bf16 %v1558_v8, %v1557_v41  ;;  %v1527_v23 = vadd.f32 1.0, %v2328_v36  ;;  %v1307_v61 = vmul.f32 0.5, %v3279_v20  ;;  %v1308_v45 = vmul.f32 0.5, %v3304_v14 }
 0x288   : > { %v2332_v49 = vpop.eup %2331  ;;  %v1528_v15 = vadd.f32 1.0, %v2330_v4  ;;  %2347 = vtanh.f32 %v1473_v55  ;;  %v1309_v26 = vmul.f32 0.5, %v3270_v56  ;;  %v1310_v18 = vmul.f32 0.5, %v3282_v27 }
 0x289   : > { %v2334_v13 = vpop.eup %2333  ;;  %2141 = vmatmul.mubr.bf16.gmra.mrb[12].mxu1 %v1580_v12  ;;  %v1529_v3 = vadd.f32 1.0, %v2332_v49  ;;  %2349 = vtanh.f32 %v1474_v54  ;;  %v1559_v1 = vmul.f32 %v1527_v23, %v1303_v39  ;;  %v1311_v46 = vmul.f32 0.5, %v3312_v58 }
 0x28a   : > { %v2336_v19 = vpop.eup %2335  ;;  %v1560_v5 = vmul.f32 %v1528_v15, %v1304_v52  ;;  %v1530_v32 = vadd.f32 1.0, %v2334_v13  ;;  %v1312_v37 = vmul.f32 0.5, %v3321_v35  ;;  %v1313_v54 = vmul.f32 0.5, %v3308_v30  ;;  %v3380_v35 = vld [vmem:[%s3574_s8] ss:$0 sm:$0xff] }
 0x28b   : > { %v2338_v43 = vpop.eup %2337  ;;  %v1531_v42 = vadd.f32 1.0, %v2336_v19  ;;  %v1561_v29 = vmul.f32 %v1529_v3, %v1305_v40  ;;  %v1314_v4 = vmul.f32 0.5, %v3316_v51 }
 0x28c   : > { %v2340_v6 = vpop.eup %2339  ;;  %v1581_v53 = vpack.c.bf16 %v1560_v5, %v1559_v1  ;;  %v1562_v9 = vmul.f32 %v1530_v32, %v1306_v0  ;;  %v1532_v60 = vadd.f32 1.0, %v2338_v43 }
 0x28d   : > { %v2342_v25 = vpop.eup %2341  ;;  %v1533_v31 = vadd.f32 1.0, %v2340_v6  ;;  %v1563_v21 = vmul.f32 %v1531_v42, %v1307_v61 }
 0x28e   : > { %2144 = vmatprep.mubr.bf16.mxu1 %v1581_v53  ;;  %v1582_v57 = vpack.c.bf16 %v1562_v9, %v1561_v29  ;;  %v1564_v17 = vmul.f32 %v1532_v60, %v1308_v45  ;;  %v1534_v2 = vadd.f32 1.0, %v2342_v25 }
 0x28f   : > { %v2344_v20 = vpop.eup %2343  ;;  %v1565_v63 = vmul.f32 %v1533_v31, %v1309_v26 }
 0x290   : > { %v2346_v34 = vpop.eup %2345  ;;  %v1583_v14 = vpack.c.bf16 %v1564_v17, %v1563_v21  ;;  %v1566_v24 = vmul.f32 %v1534_v2, %v1310_v18  ;;  %v1535_v44 = vadd.f32 1.0, %v2344_v20 }
 0x291   : > { %2145 = vmatmul.mubr.bf16.gmra.mrb[16].mxu1 %v1582_v57  ;;  %v1536_v56 = vadd.f32 1.0, %v2346_v34 }
 0x292   : > { %v2348_v48 = vpop.eup %2347  ;;  %2148 = vmatprep.mubr.bf16.mxu1 %v1583_v14  ;;  %v1584_v27 = vpack.c.bf16 %v1566_v24, %v1565_v63  ;;  %v1567_v8 = vmul.f32 %v1535_v44, %v1311_v46  ;;  %v3618_v14 = vld [vmem:[#allocation7_spill] sm:$0xff]  ;;  %v3619_v44 = vld [vmem:[#allocation5_spill] sm:$0xff] }
 0x293   : > { %v2350_v41 = vpop.eup %2349  ;;  %v1568_v36 = vmul.f32 %v1536_v56, %v1312_v37  ;;  %v1537_v55 = vadd.f32 1.0, %v2348_v48  ;;  %v3620_v37 = vld [vmem:[#allocation8_spill] sm:$0xff]  ;;  %v3621_v48 = vld [vmem:[#allocation6_spill] sm:$0xff] }
 0x294   : > { %v1538_v12 = vadd.f32 1.0, %v2350_v41 }
 0x295   : > { %v1585_v23 = vpack.c.bf16 %v1568_v36, %v1567_v8  ;;  %v1569_v49 = vmul.f32 %v1537_v55, %v1313_v54 }
 0x296   : > { %v1570_v58 = vmul.f32 %v1538_v12, %v1314_v4  ;;  %v3622_v4 = vld [vmem:[#allocation11_spill] sm:$0xff] }
 0x298   : > { %v1586_v39 = vpack.c.bf16 %v1570_v58, %v1569_v49  ;;  %v3623_v58 = vld [vmem:[#allocation9_spill] sm:$0xff] }
 0x299   : > { %2149 = vmatmul.mubr.bf16.gmra.mrb[20].mxu1 %v1584_v27 }
 0x29a   : > { %2152 = vmatprep.mubr.bf16.mxu1 %v1585_v23 }
 0x2a1   : > { %2153 = vmatmul.mubr.bf16.gmra.mrb[24].mxu1 %v1586_v39 }
 0x32c   : > { %v2126_v52 = vpop.f32.mrb[32].mxu0 }
 0x32d   : > { %v1701_v30 = vadd.f32 %v2126_v52, %v3380_v35  ;;  %v1692_v51 = vpop.f32.mrb[33].mxu0 }
 0x32e   : > { %v1693_v15 = vadd.f32 %v3380_v35, %v1692_v51  ;;  %v2127_v13 = vpop.f32.mrb[34].mxu0 }
 0x32f   : > { %v1821_v40 = vadd.f32 %v1701_v30, %v2546_v16  ;;  %v1704_v3 = vadd.f32 %v2127_v13, %v3380_v35  ;;  %v1695_v19 = vpop.f32.mrb[35].mxu0  ;;  %v3624_v30 = vld [vmem:[#allocation12_spill] sm:$0xff] }
 0x330   : > { %v1819_v1 = vadd.f32 %v1693_v15, %v2541_v11  ;;  %v1696_v5 = vadd.f32 %v3380_v35, %v1695_v19  ;;  %v3625_v15 = vld [vmem:[#allocation10_spill] sm:$0xff] }
 0x331   : > { %1853 = vst.msk [vmem:[%s3390_s26 + $0x10] sm:$0xff] %vm541_vm0, %v1821_v40  ;;  %v1822_v0 = vadd.f32 %v1704_v3, %v2560_v28 }
 0x332   : > { %1851 = vst.msk [vmem:[%s3390_s26] sm:$0xff] %vm541_vm0, %v1819_v1  ;;  %v1820_v16 = vadd.f32 %v1696_v5, %v2553_v22 }
 0x333   : > { %1854 = vst.msk [vmem:[%s3390_s26 + $0x18] sm:$0xff] %vm541_vm0, %v1822_v0  ;;  %v3626_v0 = vld [vmem:[#allocation15_spill] sm:$0xff] }
 0x334   : > { %1852 = vst.msk [vmem:[%s3390_s26 + $0x8] sm:$0xff] %vm541_vm0, %v1820_v16 }
 0x335   : > { %v2130_v11 = vpop.f32.mrb[0].mxu1 }
 0x336   : > { %v1717_v32 = vadd.f32 %v2130_v11, %v3380_v35  ;;  %v1708_v43 = vpop.f32.mrb[1].mxu1 }
 0x337   : > { %v1709_v61 = vadd.f32 %v3380_v35, %v1708_v43  ;;  %v2131_v45 = vpop.f32.mrb[2].mxu1  ;;  %v3627_v43 = vld [vmem:[#allocation13_spill] sm:$0xff] }
 0x338   : > { %v1825_v28 = vadd.f32 %v1717_v32, %v2582_v47  ;;  %v1720_v42 = vadd.f32 %v2131_v45, %v3380_v35  ;;  %v1711_v6 = vpop.f32.mrb[3].mxu1 }
 0x339   : > { %v1823_v22 = vadd.f32 %v1709_v61, %v2566_v33  ;;  %v1712_v53 = vadd.f32 %v3380_v35, %v1711_v6  ;;  %v3629_v6 = vld [vmem:[#allocation14_spill] sm:$0xff] }
 0x33a   : > { %1857 = vst.msk [vmem:[%s3390_s26 + $0x30] sm:$0xff] %vm541_vm0, %v1825_v28  ;;  %v1826_v29 = vadd.f32 %v1720_v42, %v2586_v50  ;;  %v3628_v28 = vld [vmem:[#allocation16_spill] sm:$0xff] }
 0x33b   : > { %1855 = vst.msk [vmem:[%s3390_s26 + $0x20] sm:$0xff] %vm541_vm0, %v1823_v22  ;;  %v1824_v9 = vadd.f32 %v1712_v53, %v2572_v38 }
 0x33c   : > { %1858 = vst.msk [vmem:[%s3390_s26 + $0x38] sm:$0xff] %vm541_vm0, %v1826_v29 }
 0x33d   : > { %1856 = vst.msk [vmem:[%s3390_s26 + $0x28] sm:$0xff] %vm541_vm0, %v1824_v9 }
 0x345   : > { %v2134_v47 = vpop.f32.mrb[4].mxu1 }
 0x346   : > { %v1733_v33 = vadd.f32 %v2134_v47, %v3380_v35  ;;  %v1724_v60 = vpop.f32.mrb[5].mxu1 }
 0x347   : > { %v1725_v25 = vadd.f32 %v3380_v35, %v1724_v60  ;;  %v2135_v26 = vpop.f32.mrb[6].mxu1  ;;  %v3630_v60 = vld [vmem:[#allocation19_spill] sm:$0xff] }
 0x348   : > { %v1829_v50 = vadd.f32 %v1733_v33, %v2610_v7  ;;  %v1736_v18 = vadd.f32 %v2135_v26, %v3380_v35  ;;  %v1727_v31 = vpop.f32.mrb[7].mxu1 }
 0x349   : > { %v1827_v38 = vadd.f32 %v1725_v25, %v2596_v59  ;;  %v1728_v57 = vadd.f32 %v3380_v35, %v1727_v31 }
 0x34a   : > { %1861 = vst.msk [vmem:[%s3390_s26 + $0x50] sm:$0xff] %vm541_vm0, %v1829_v50  ;;  %v1830_v21 = vadd.f32 %v1736_v18, %v2614_v10  ;;  %v3631_v18 = vld [vmem:[#allocation17_spill] sm:$0xff] }
 0x34b   : > { %1859 = vst.msk [vmem:[%s3390_s26 + $0x40] sm:$0xff] %vm541_vm0, %v1827_v38  ;;  %v1828_v17 = vadd.f32 %v1728_v57, %v2600_v62  ;;  %v3632_v57 = vld [vmem:[#allocation20_spill] sm:$0xff] }
 0x34c   : > { %1862 = vst.msk [vmem:[%s3390_s26 + $0x58] sm:$0xff] %vm541_vm0, %v1830_v21 }
 0x34d   : > { %1860 = vst.msk [vmem:[%s3390_s26 + $0x48] sm:$0xff] %vm541_vm0, %v1828_v17  ;;  %v3633_v17 = vld [vmem:[#allocation18_spill] sm:$0xff] }
 0x34f   : > { %v2138_v7 = vpop.f32.mrb[8].mxu1 }
 0x350   : > { %v1749_v59 = vadd.f32 %v2138_v7, %v3380_v35  ;;  %v1740_v2 = vpop.f32.mrb[9].mxu1 }
 0x351   : > { %v1741_v20 = vadd.f32 %v3380_v35, %v1740_v2  ;;  %v2139_v34 = vpop.f32.mrb[10].mxu1 }
 0x352   : > { %v1833_v10 = vadd.f32 %v1749_v59, %v3618_v14  ;;  %v1752_v63 = vadd.f32 %v2139_v34, %v3380_v35  ;;  %v1743_v24 = vpop.f32.mrb[11].mxu1 }
 0x353   : > { %v1831_v62 = vadd.f32 %v1741_v20, %v3619_v44  ;;  %v1744_v46 = vadd.f32 %v3380_v35, %v1743_v24 }
 0x354   : > { %1865 = vst.msk [vmem:[%s3390_s26 + $0x70] sm:$0xff] %vm541_vm0, %v1833_v10  ;;  %v1834_v56 = vadd.f32 %v1752_v63, %v3620_v37  ;;  %v3634_v10 = vld [vmem:[#allocation23_spill] sm:$0xff] }
 0x355   : > { %1863 = vst.msk [vmem:[%s3390_s26 + $0x60] sm:$0xff] %vm541_vm0, %v1831_v62  ;;  %v1832_v27 = vadd.f32 %v1744_v46, %v3621_v48  ;;  %v3635_v62 = vld [vmem:[#allocation21_spill] sm:$0xff] }
 0x356   : > { %1866 = vst.msk [vmem:[%s3390_s26 + $0x78] sm:$0xff] %vm541_vm0, %v1834_v56  ;;  %v3636_v56 = vld [vmem:[#allocation24_spill] sm:$0xff] }
 0x357   : > { %1864 = vst.msk [vmem:[%s3390_s26 + $0x68] sm:$0xff] %vm541_vm0, %v1832_v27  ;;  %v3637_v27 = vld [vmem:[#allocation22_spill] sm:$0xff] }
 0x35c   : > { %v2142_v41 = vpop.f32.mrb[12].mxu1 }
 0x35d   : > { %v1765_v8 = vadd.f32 %v2142_v41, %v3380_v35  ;;  %v1756_v36 = vpop.f32.mrb[13].mxu1 }
 0x35e   : > { %v1757_v55 = vadd.f32 %v3380_v35, %v1756_v36  ;;  %v2143_v54 = vpop.f32.mrb[14].mxu1 }
 0x35f   : > { %v1837_v12 = vadd.f32 %v1765_v8, %v3622_v4  ;;  %v1768_v23 = vadd.f32 %v2143_v54, %v3380_v35  ;;  %v1759_v49 = vpop.f32.mrb[15].mxu1 }
 0x360   : > { %v1835_v39 = vadd.f32 %v1757_v55, %v3623_v58  ;;  %v1760_v52 = vadd.f32 %v3380_v35, %v1759_v49 }
 0x361   : > { %1869 = vst.msk [vmem:[%s3390_s26 + $0x90] sm:$0xff] %vm541_vm0, %v1837_v12  ;;  %v1838_v51 = vadd.f32 %v1768_v23, %v3624_v30 }
 0x362   : > { %1867 = vst.msk [vmem:[%s3390_s26 + $0x80] sm:$0xff] %vm541_vm0, %v1835_v39  ;;  %v1836_v13 = vadd.f32 %v1760_v52, %v3625_v15 }
 0x363   : > { %1870 = vst.msk [vmem:[%s3390_s26 + $0x98] sm:$0xff] %vm541_vm0, %v1838_v51 }
 0x364   : > { %1868 = vst.msk [vmem:[%s3390_s26 + $0x88] sm:$0xff] %vm541_vm0, %v1836_v13  ;;  %v2146_v40 = vpop.f32.mrb[16].mxu1 }
 0x365   : > { %v1781_v3 = vadd.f32 %v2146_v40, %v3380_v35  ;;  %v1772_v19 = vpop.f32.mrb[17].mxu1 }
 0x366   : > { %v1773_v1 = vadd.f32 %v3380_v35, %v1772_v19  ;;  %v2147_v5 = vpop.f32.mrb[18].mxu1 }
 0x367   : > { %v1841_v16 = vadd.f32 %v1781_v3, %v3626_v0  ;;  %v1784_v11 = vadd.f32 %v2147_v5, %v3380_v35  ;;  %v1775_v32 = vpop.f32.mrb[19].mxu1 }
 0x368   : > { %v1839_v61 = vadd.f32 %v1773_v1, %v3627_v43  ;;  %v1776_v45 = vadd.f32 %v3380_v35, %v1775_v32 }
 0x369   : > { %1873 = vst.msk [vmem:[%s3390_s26 + $0xb0] sm:$0xff] %vm541_vm0, %v1841_v16  ;;  %v1842_v42 = vadd.f32 %v1784_v11, %v3628_v28 }
 0x36a   : > { %1871 = vst.msk [vmem:[%s3390_s26 + $0xa0] sm:$0xff] %vm541_vm0, %v1839_v61  ;;  %v1840_v22 = vadd.f32 %v1776_v45, %v3629_v6 }
 0x36b   : > { %1874 = vst.msk [vmem:[%s3390_s26 + $0xb8] sm:$0xff] %vm541_vm0, %v1842_v42 }
 0x36c   : > { %1872 = vst.msk [vmem:[%s3390_s26 + $0xa8] sm:$0xff] %vm541_vm0, %v1840_v22  ;;  %v2150_v53 = vpop.f32.mrb[20].mxu1 }
 0x36d   : > { %v1797_v29 = vadd.f32 %v2150_v53, %v3380_v35  ;;  %v1788_v9 = vpop.f32.mrb[21].mxu1 }
 0x36e   : > { %v1789_v47 = vadd.f32 %v3380_v35, %v1788_v9  ;;  %v2151_v33 = vpop.f32.mrb[22].mxu1 }
 0x36f   : > { %v1845_v25 = vadd.f32 %v1797_v29, %v3630_v60  ;;  %v1800_v26 = vadd.f32 %v2151_v33, %v3380_v35  ;;  %v1791_v50 = vpop.f32.mrb[23].mxu1 }
 0x370   : > { %v1843_v31 = vadd.f32 %v1789_v47, %v3631_v18  ;;  %v1792_v38 = vadd.f32 %v3380_v35, %v1791_v50 }
 0x371   : > { %1877 = vst.msk [vmem:[%s3390_s26 + $0xd0] sm:$0xff] %vm541_vm0, %v1845_v25  ;;  %v1846_v21 = vadd.f32 %v1800_v26, %v3632_v57 }
 0x372   : > { %1875 = vst.msk [vmem:[%s3390_s26 + $0xc0] sm:$0xff] %vm541_vm0, %v1843_v31  ;;  %v1844_v7 = vadd.f32 %v1792_v38, %v3633_v17 }
 0x373   : > { %1878 = vst.msk [vmem:[%s3390_s26 + $0xd8] sm:$0xff] %vm541_vm0, %v1846_v21 }
 0x374   : > { %1876 = vst.msk [vmem:[%s3390_s26 + $0xc8] sm:$0xff] %vm541_vm0, %v1844_v7  ;;  %v2154_v59 = vpop.f32.mrb[24].mxu1 }
 0x375   : > { %v1813_v2 = vadd.f32 %v2154_v59, %v3380_v35  ;;  %v1804_v20 = vpop.f32.mrb[25].mxu1 }
 0x376   : > { %v1805_v34 = vadd.f32 %v3380_v35, %v1804_v20  ;;  %v2155_v14 = vpop.f32.mrb[26].mxu1 }
 0x377   : > { %v1849_v63 = vadd.f32 %v1813_v2, %v3634_v10  ;;  %v1816_v24 = vadd.f32 %v2155_v14, %v3380_v35  ;;  %v1807_v44 = vpop.f32.mrb[27].mxu1 }
 0x378   : > { %v1847_v46 = vadd.f32 %v1805_v34, %v3635_v62  ;;  %v1808_v37 = vadd.f32 %v3380_v35, %v1807_v44 }
 0x379   : > { %1881 = vst.msk [vmem:[%s3390_s26 + $0xf0] sm:$0xff] %vm541_vm0, %v1849_v63  ;;  %v1850_v48 = vadd.f32 %v1816_v24, %v3636_v56 }
 0x37a   : > { %1879 = vst.msk [vmem:[%s3390_s26 + $0xe0] sm:$0xff] %vm541_vm0, %v1847_v46  ;;  %v1848_v41 = vadd.f32 %v1808_v37, %v3637_v27 }
 0x37b   : > { %1882 = vst.msk [vmem:[%s3390_s26 + $0xf8] sm:$0xff] %vm541_vm0, %v1850_v48 }
 0x37c   : > { %1880 = vst.msk [vmem:[%s3390_s26 + $0xe8] sm:$0xff] %vm541_vm0, %v1848_v41 }
 0x37d   : > { %2364 = shalt.err (!%p2361_p3)
}
 0x37e   : > { %s2365_s22 = scalar_lea.hbm %s3512_s16, 4096  ;;  %s2369_s27 = scalar_lea.hbm %s3575_s9, 8192 }
 0x37f   : > { %p2366_p4 = scmp.ne.s32.totalorder %s3512_s16, %s2365_s22  ;;  %p2370_p9 = scmp.lt.u32.totalorder %s3512_s16, %s3575_s9 }
 0x380   : > { %p2371_p10 = scmp.lt.u32.totalorder %s2369_s27, %s2365_s22  ;;  %p2373_p12 = scmp.lt.u32.totalorder %s2365_s22, %s3512_s16 }
 0x381   : > { %p2367_p7 = pnand %p2366_p4, %p2506_p5 }
 0x382   : > { %p2372_p11 = por %p2371_p10, %p2370_p9 }
 0x383   : > { %p2368_p8 = pneg %p2367_p7 }
 0x384   : > { %p2374_p13 = por %p2373_p12, %p2372_p11 }
 0x386   : > { %p2375_p0 = pnand %p2374_p13, %p2368_p8 }
 0x388   : > { %2378 = shalt.err (!%p2375_p0)
}
 0x389   : > { %s2416_s17 = smov 128   ;;  %s2417_s21 = smov 8  }
 0x38a   : > { %2172 = dma.vmem_to_hbm [thread:$0]  (%p2506_p5), %s3514_s28, 4096, %s3512_s16, %s3525_s13, %s2416_s17, %s2416_s17, %s2417_s21  }
 0x38b PF: > { %p2178_p1 = scmp.ge.s32.totalorder %s2413_s12, 2  ;;  %s1912_s23 = sand.u32 1, %s2401_s30  }
 0x38c   : > { %s1913_s24 = scalar_lea.sflag [#allocation3], %s1912_s23 }
 0x38d   : > { %p2175_p2 = pnand %p2178_p1, %p2510_p6 }
 0x38f   : > { %2396 = dma.done.wait (!%p2175_p2), %s1913_s24, 4096  }
 0x390   : > { %2398 = vsyncadd (!%p2175_p2), %s1913_s24, 4294963200  ;;  %p19_p3 = scmp.ge.s32.totalorder %s2493_s15, 4   ;;  %s3638_s30 = smov %s2405_s10 }
 0x391   : > { %s3639_s10 = smov %s2409_s11  ;;  %s3640_s11 = smov %s2504_s18 }
 0x392   : > { %s3641_s12 = smov %s2493_s15  ;;  %21 = sbr.rel (!%p19_p3) target bundleno = 3 (0x3), region = 97 }
 0x399   :  { %1918 = vsyncpa [#allocation3], 1 }
 0x39a   :  { %1920 = vsyncpa [#allocation3 + $0x1], 1 }

</bundles_post_ra>
